<compile_context>
chip_gen: v7x
topology: tpu7x:2x2x1
jax: 0.10.0
libtpu: 0.0.40
codegen_flags: <defaults>
</compile_context>

<pallas_src>
import jax
import jax.numpy as jnp
from jax import lax
from jax.experimental import pallas as pl
from jax.experimental.pallas import tpu as pltpu


def basic_block2_kernel(xpad_ref, w1_ref, w2_ref,
                        s1_ref, b1_ref, s2_ref, b2_ref,
                        out_ref, mid_ref, col_ref):
    # xpad_ref : (1, H+2, W+2, C)  zero-padded input block (one image / step)
    # w1_ref   : (9*C, C)          conv1 weights, taps flattened into K
    # w2_ref   : (9*C, C)          conv2 weights, taps flattened into K
    # s*/b*    : (1, C)            folded BN scale / shift (f32)
    # out_ref  : (1, H, W, C)      output block (f32)
    # mid_ref  : scratch (1, H+2, W+2, C)  padded conv1 output (compute dtype)
    # col_ref  : scratch (H*W, 9*C)        im2col buffer, reused by both convs
    _, Hp, Wp, C = xpad_ref.shape
    H, W = Hp - 2, Wp - 2
    M = H * W
    cdt = mid_ref.dtype

    # ---- zero only the 1-pixel halo of the padded intermediate ----
    # (interior is fully overwritten below; per-step halo clear keeps this
    #  correct regardless of how the "parallel" grid is sharded across cores)
    mid_ref[:, 0:1, :, :] = jnp.zeros((1, 1, Wp, C), cdt)
    mid_ref[:, Hp - 1:Hp, :, :] = jnp.zeros((1, 1, Wp, C), cdt)
    mid_ref[:, :, 0:1, :] = jnp.zeros((1, Hp, 1, C), cdt)
    mid_ref[:, :, Wp - 1:Wp, :] = jnp.zeros((1, Hp, 1, C), cdt)

    # ---- conv1: build im2col once, then a single fused-K MXU matmul ----
    # (im2col is staged through a small VMEM scratch; could stay in vregs via
    #  lane-concatenation, but the scratch round-trip is tiny and always lowers)
    for t in range(9):
        dy, dx = t // 3, t % 3
        col_ref[:, t * C:(t + 1) * C] = (
            xpad_ref[:, dy:dy + H, dx:dx + W, :].reshape(M, C))
    acc1 = jnp.dot(col_ref[...], w1_ref[...],
                   preferred_element_type=jnp.float32)

    # ---- bn1 (folded affine) + relu ----
    y = jnp.maximum(acc1 * s1_ref[...] + b1_ref[...], 0.0)
    mid_ref[:, 1:H + 1, 1:W + 1, :] = y.reshape(1, H, W, C).astype(cdt)

    # ---- conv2: im2col + fused matmul ----
    for t in range(9):
        dy, dx = t // 3, t % 3
        col_ref[:, t * C:(t + 1) * C] = (
            mid_ref[:, dy:dy + H, dx:dx + W, :].reshape(M, C))
    acc2 = jnp.dot(col_ref[...], w2_ref[...],
                   preferred_element_type=jnp.float32)

    # ---- bn2 + residual add + relu ----
    z = acc2 * s2_ref[...] + b2_ref[...]
    resid = xpad_ref[:, 1:H + 1, 1:W + 1, :].reshape(M, C).astype(jnp.float32)
    out_ref[...] = jnp.maximum(z + resid, 0.0).reshape(1, H, W, C)


def _fold_bn(gamma, beta, mean, var, eps=1e-5):
    scale = gamma / jnp.sqrt(var + eps)
    shift = beta - mean * scale
    return scale, shift


def basic_block2(x_nchw, w1_oihw, w2_oihw, bn1_params, bn2_params,
                 compute_dtype=jnp.bfloat16):
    """x_nchw: (N, C, H, W) float32. Weights in PyTorch OIHW layout.

    compute_dtype: dtype fed to the MXU (bf16 recommended on v6e/v7x);
    accumulation and BN/residual math stay in f32.
    """
    N, C, H, W = x_nchw.shape
    Cout = w1_oihw.shape[0]
    assert Cout == C, "stride=1 / downsample=None requires inplanes == planes"
    Hp, Wp = H + 2, W + 2

    # NCHW -> NHWC, pre-pad spatially (2-pixel halo handled per-image block).
    x = jnp.transpose(x_nchw, (0, 2, 3, 1)).astype(jnp.float32)
    xpad = jnp.pad(x, ((0, 0), (1, 1), (1, 1), (0, 0))).astype(compute_dtype)

    # OIHW -> (dy, dx, ci, co) -> (9*Cin, Cout): K index = (dy*3+dx)*Cin + ci,
    # matching the im2col column layout built in the kernel.
    def prep_w(w):
        return (jnp.transpose(w, (2, 3, 1, 0))
                .reshape(9 * w.shape[1], w.shape[0])
                .astype(compute_dtype))

    w1 = prep_w(w1_oihw)
    w2 = prep_w(w2_oihw)

    s1, b1 = _fold_bn(*bn1_params)
    s2, b2 = _fold_bn(*bn2_params)
    s1 = s1.reshape(1, C).astype(jnp.float32)
    b1 = b1.reshape(1, C).astype(jnp.float32)
    s2 = s2.reshape(1, C).astype(jnp.float32)
    b2 = b2.reshape(1, C).astype(jnp.float32)

    grid_spec = pltpu.PrefetchScalarGridSpec(
        num_scalar_prefetch=0,
        grid=(N,),
        in_specs=[
            pl.BlockSpec((1, Hp, Wp, C), lambda n: (n, 0, 0, 0)),  # xpad
            pl.BlockSpec((9 * C, C), lambda n: (0, 0)),            # w1 (resident)
            pl.BlockSpec((9 * C, C), lambda n: (0, 0)),            # w2 (resident)
            pl.BlockSpec((1, C), lambda n: (0, 0)),                # s1
            pl.BlockSpec((1, C), lambda n: (0, 0)),                # b1
            pl.BlockSpec((1, C), lambda n: (0, 0)),                # s2
            pl.BlockSpec((1, C), lambda n: (0, 0)),                # b2
        ],
        out_specs=pl.BlockSpec((1, H, W, C), lambda n: (n, 0, 0, 0)),
        scratch_shapes=[
            pltpu.VMEM((1, Hp, Wp, C), compute_dtype),   # padded conv1 output
            pltpu.VMEM((H * W, 9 * C), compute_dtype),   # im2col buffer
        ],
    )

    out_nhwc = pl.pallas_call(
        basic_block2_kernel,
        out_shape=jax.ShapeDtypeStruct((N, H, W, C), jnp.float32),
        grid_spec=grid_spec,
        compiler_params=pltpu.CompilerParams(
            dimension_semantics=("parallel",)),  # batch axis -> both v7x TCs
    )(xpad, w1, w2, s1, b1, s2, b2)

    # NHWC -> NCHW
    return jnp.transpose(out_nhwc, (0, 3, 1, 2))


def reference_forward(x_nchw, w1_oihw, w2_oihw, bn1_params, bn2_params):
    """Pure-JAX f32 reference (lax.conv) replicating BasicBlock2.forward (eval)."""
    x = jnp.transpose(x_nchw, (0, 2, 3, 1)).astype(jnp.float32)

    def conv(h, w_oihw):
        w = jnp.transpose(w_oihw, (2, 3, 1, 0))  # HWIO
        return lax.conv_general_dilated(
            h, w, window_strides=(1, 1), padding=((1, 1), (1, 1)),
            dimension_numbers=('NHWC', 'HWIO', 'NHWC'))

    s1, b1 = _fold_bn(*bn1_params)
    s2, b2 = _fold_bn(*bn2_params)
    out = conv(x, w1_oihw)
    out = jnp.maximum(out * s1 + b1, 0.0)
    out = conv(out, w2_oihw)
    out = out * s2 + b2
    out = jnp.maximum(out + x, 0.0)
    return jnp.transpose(out, (0, 3, 1, 2))


if __name__ == "__main__":
    key = jax.random.PRNGKey(0)
    N, C, H, W = 2, 4, 16, 16  # inplanes == planes == 4, stride=1

    kx, k1, k2 = jax.random.split(key, 3)
    x = jax.random.normal(kx, (N, C, H, W), jnp.float32)
    w1 = 0.2 * jax.random.normal(k1, (C, C, 3, 3), jnp.float32)  # OIHW
    w2 = 0.2 * jax.random.normal(k2, (C, C, 3, 3), jnp.float32)  # OIHW

    # Deterministic BatchNorm params (gamma, beta, running_mean, running_var).
    gamma1 = 1.0 + 0.10 * jnp.arange(C, dtype=jnp.float32)
    beta1 = 0.05 * jnp.arange(C, dtype=jnp.float32)
    mean1 = 0.01 * jnp.arange(C, dtype=jnp.float32)
    var1 = 1.0 + 0.02 * jnp.arange(C, dtype=jnp.float32)
    gamma2 = 0.9 + 0.05 * jnp.arange(C, dtype=jnp.float32)
    beta2 = -0.03 * jnp.arange(C, dtype=jnp.float32)
    mean2 = -0.02 * jnp.arange(C, dtype=jnp.float32)
    var2 = 1.0 + 0.01 * jnp.arange(C, dtype=jnp.float32)
    bn1_params = (gamma1, beta1, mean1, var1)
    bn2_params = (gamma2, beta2, mean2, var2)

    ref = reference_forward(x, w1, w2, bn1_params, bn2_params)

    # 1) f32 path: validates kernel logic (indexing / tap layout / BN folding)
    #    against the f32 reference with a tight tolerance.
    out_f32 = basic_block2(x, w1, w2, bn1_params, bn2_params,
                           compute_dtype=jnp.float32)
    out_f32 = jax.block_until_ready(out_f32)
    assert out_f32.shape == (N, C, H, W)
    assert jnp.allclose(out_f32, ref, atol=1e-3, rtol=1e-3), \
        "f32 kernel mismatch vs JAX reference"

    # 2) bf16-operand path (the perf configuration for v6e/v7x): f32 accumulate,
    #    looser tolerance accounts for bf16 operand rounding.
    out_bf16 = basic_block2(x, w1, w2, bn1_params, bn2_params,
                            compute_dtype=jnp.bfloat16)
    out_bf16 = jax.block_until_ready(out_bf16)
    assert out_bf16.shape == (N, C, H, W)
    assert jnp.allclose(out_bf16, ref, atol=5e-2, rtol=5e-2), \
        "bf16 kernel mismatch vs JAX reference"

    print("KERNEL_OK")
</pallas_src>

<mosaic_0001>
module attributes {stable_mosaic.version = 11 : i64} {
  func.func @basic_block2_kernel(%arg0: i32, %arg1: memref<1x18x18x4xf32, #tpu.memory_space<vmem>>, %arg2: memref<36x4xf32, #tpu.memory_space<vmem>>, %arg3: memref<36x4xf32, #tpu.memory_space<vmem>>, %arg4: memref<1x4xf32, #tpu.memory_space<vmem>>, %arg5: memref<1x4xf32, #tpu.memory_space<vmem>>, %arg6: memref<1x4xf32, #tpu.memory_space<vmem>>, %arg7: memref<1x4xf32, #tpu.memory_space<vmem>>, %arg8: memref<1x16x16x4xf32, #tpu.memory_space<vmem>>, %arg9: memref<1x18x18x4xf32, #tpu.memory_space<vmem>>, %arg10: memref<256x36xf32, #tpu.memory_space<vmem>>) attributes {dimension_semantics = [#tpu.dimension_semantics<parallel>], iteration_bounds = array<i64: 2>, scalar_prefetch = 0 : i64, scratch_operands = 2 : i64, tpu.core_type = #tpu.core_type<tc>, window_params = [{transform_indices = @transform_0, window_bounds = array<i64: 1, 18, 18, 4>}, {pipeline_mode = #tpu.pipeline_mode<synchronous>, transform_indices = @transform_1, window_bounds = array<i64: 36, 4>}, {pipeline_mode = #tpu.pipeline_mode<synchronous>, transform_indices = @transform_2, window_bounds = array<i64: 36, 4>}, {pipeline_mode = #tpu.pipeline_mode<synchronous>, transform_indices = @transform_3, window_bounds = array<i64: 1, 4>}, {pipeline_mode = #tpu.pipeline_mode<synchronous>, transform_indices = @transform_4, window_bounds = array<i64: 1, 4>}, {pipeline_mode = #tpu.pipeline_mode<synchronous>, transform_indices = @transform_5, window_bounds = array<i64: 1, 4>}, {pipeline_mode = #tpu.pipeline_mode<synchronous>, transform_indices = @transform_6, window_bounds = array<i64: 1, 4>}, {transform_indices = @transform_7, window_bounds = array<i64: 1, 16, 16, 4>}]} {
    %cst = arith.constant 0.000000e+00 : f32
    %0 = vector.broadcast %cst : f32 to vector<1x1x18x4xf32>
    %c0 = arith.constant 0 : index
    %c0_0 = arith.constant 0 : index
    %c0_1 = arith.constant 0 : index
    %c0_2 = arith.constant 0 : index
    %1 = vector.load %arg9[%c0, %c0_0, %c0_1, %c0_2] : memref<1x18x18x4xf32, #tpu.memory_space<vmem>>, vector<1x1x18x4xf32>
    tpu.vector_store %arg9[%c0, %c0_0, %c0_1, %c0_2], %0 {strides = array<i32>} : memref<1x18x18x4xf32, #tpu.memory_space<vmem>>, vector<1x1x18x4xf32>,
    %cst_3 = arith.constant 0.000000e+00 : f32
    %2 = vector.broadcast %cst_3 : f32 to vector<1x1x18x4xf32>
    %c0_4 = arith.constant 0 : index
    %c17 = arith.constant 17 : index
    %c0_5 = arith.constant 0 : index
    %c0_6 = arith.constant 0 : index
    %3 = vector.load %arg9[%c0_4, %c17, %c0_5, %c0_6] : memref<1x18x18x4xf32, #tpu.memory_space<vmem>>, vector<1x1x18x4xf32>
    tpu.vector_store %arg9[%c0_4, %c17, %c0_5, %c0_6], %2 {strides = array<i32>} : memref<1x18x18x4xf32, #tpu.memory_space<vmem>>, vector<1x1x18x4xf32>,
    %cst_7 = arith.constant 0.000000e+00 : f32
    %4 = vector.broadcast %cst_7 : f32 to vector<1x18x1x4xf32>
    %c0_8 = arith.constant 0 : index
    %c0_9 = arith.constant 0 : index
    %c0_10 = arith.constant 0 : index
    %c0_11 = arith.constant 0 : index
    %5 = vector.load %arg9[%c0_8, %c0_9, %c0_10, %c0_11] : memref<1x18x18x4xf32, #tpu.memory_space<vmem>>, vector<1x18x1x4xf32>
    tpu.vector_store %arg9[%c0_8, %c0_9, %c0_10, %c0_11], %4 {strides = array<i32>} : memref<1x18x18x4xf32, #tpu.memory_space<vmem>>, vector<1x18x1x4xf32>,
    %cst_12 = arith.constant 0.000000e+00 : f32
    %6 = vector.broadcast %cst_12 : f32 to vector<1x18x1x4xf32>
    %c0_13 = arith.constant 0 : index
    %c0_14 = arith.constant 0 : index
    %c17_15 = arith.constant 17 : index
    %c0_16 = arith.constant 0 : index
    %7 = vector.load %arg9[%c0_13, %c0_14, %c17_15, %c0_16] : memref<1x18x18x4xf32, #tpu.memory_space<vmem>>, vector<1x18x1x4xf32>
    tpu.vector_store %arg9[%c0_13, %c0_14, %c17_15, %c0_16], %6 {strides = array<i32>} : memref<1x18x18x4xf32, #tpu.memory_space<vmem>>, vector<1x18x1x4xf32>,
    %c0_17 = arith.constant 0 : index
    %c0_18 = arith.constant 0 : index
    %c0_19 = arith.constant 0 : index
    %c0_20 = arith.constant 0 : index
    %8 = vector.load %arg1[%c0_17, %c0_18, %c0_19, %c0_20] : memref<1x18x18x4xf32, #tpu.memory_space<vmem>>, vector<1x16x16x4xf32>
    %9 = vector.shape_cast %8 : vector<1x16x16x4xf32> to vector<256x4xf32>
    %c0_21 = arith.constant 0 : index
    %c0_22 = arith.constant 0 : index
    %10 = vector.load %arg10[%c0_21, %c0_22] : memref<256x36xf32, #tpu.memory_space<vmem>>, vector<256x4xf32>
    tpu.vector_store %arg10[%c0_21, %c0_22], %9 {strides = array<i32>} : memref<256x36xf32, #tpu.memory_space<vmem>>, vector<256x4xf32>,
    %c0_23 = arith.constant 0 : index
    %c0_24 = arith.constant 0 : index
    %c1 = arith.constant 1 : index
    %c0_25 = arith.constant 0 : index
    %11 = vector.load %arg1[%c0_23, %c0_24, %c1, %c0_25] : memref<1x18x18x4xf32, #tpu.memory_space<vmem>>, vector<1x16x16x4xf32>
    %12 = vector.shape_cast %11 : vector<1x16x16x4xf32> to vector<256x4xf32>
    %c0_26 = arith.constant 0 : index
    %c4 = arith.constant 4 : index
    %13 = vector.load %arg10[%c0_26, %c4] : memref<256x36xf32, #tpu.memory_space<vmem>>, vector<256x4xf32>
    tpu.vector_store %arg10[%c0_26, %c4], %12 {strides = array<i32>} : memref<256x36xf32, #tpu.memory_space<vmem>>, vector<256x4xf32>,
    %c0_27 = arith.constant 0 : index
    %c0_28 = arith.constant 0 : index
    %c2 = arith.constant 2 : index
    %c0_29 = arith.constant 0 : index
    %14 = vector.load %arg1[%c0_27, %c0_28, %c2, %c0_29] : memref<1x18x18x4xf32, #tpu.memory_space<vmem>>, vector<1x16x16x4xf32>
    %15 = vector.shape_cast %14 : vector<1x16x16x4xf32> to vector<256x4xf32>
    %c0_30 = arith.constant 0 : index
    %c8 = arith.constant 8 : index
    %16 = vector.load %arg10[%c0_30, %c8] : memref<256x36xf32, #tpu.memory_space<vmem>>, vector<256x4xf32>
    tpu.vector_store %arg10[%c0_30, %c8], %15 {strides = array<i32>} : memref<256x36xf32, #tpu.memory_space<vmem>>, vector<256x4xf32>,
    %c0_31 = arith.constant 0 : index
    %c1_32 = arith.constant 1 : index
    %c0_33 = arith.constant 0 : index
    %c0_34 = arith.constant 0 : index
    %17 = vector.load %arg1[%c0_31, %c1_32, %c0_33, %c0_34] : memref<1x18x18x4xf32, #tpu.memory_space<vmem>>, vector<1x16x16x4xf32>
    %18 = vector.shape_cast %17 : vector<1x16x16x4xf32> to vector<256x4xf32>
    %c0_35 = arith.constant 0 : index
    %c12 = arith.constant 12 : index
    %19 = vector.load %arg10[%c0_35, %c12] : memref<256x36xf32, #tpu.memory_space<vmem>>, vector<256x4xf32>
    tpu.vector_store %arg10[%c0_35, %c12], %18 {strides = array<i32>} : memref<256x36xf32, #tpu.memory_space<vmem>>, vector<256x4xf32>,
    %c0_36 = arith.constant 0 : index
    %c1_37 = arith.constant 1 : index
    %c1_38 = arith.constant 1 : index
    %c0_39 = arith.constant 0 : index
    %20 = vector.load %arg1[%c0_36, %c1_37, %c1_38, %c0_39] : memref<1x18x18x4xf32, #tpu.memory_space<vmem>>, vector<1x16x16x4xf32>
    %21 = vector.shape_cast %20 : vector<1x16x16x4xf32> to vector<256x4xf32>
    %c0_40 = arith.constant 0 : index
    %c16 = arith.constant 16 : index
    %22 = vector.load %arg10[%c0_40, %c16] : memref<256x36xf32, #tpu.memory_space<vmem>>, vector<256x4xf32>
    tpu.vector_store %arg10[%c0_40, %c16], %21 {strides = array<i32>} : memref<256x36xf32, #tpu.memory_space<vmem>>, vector<256x4xf32>,
    %c0_41 = arith.constant 0 : index
    %c1_42 = arith.constant 1 : index
    %c2_43 = arith.constant 2 : index
    %c0_44 = arith.constant 0 : index
    %23 = vector.load %arg1[%c0_41, %c1_42, %c2_43, %c0_44] : memref<1x18x18x4xf32, #tpu.memory_space<vmem>>, vector<1x16x16x4xf32>
    %24 = vector.shape_cast %23 : vector<1x16x16x4xf32> to vector<256x4xf32>
    %c0_45 = arith.constant 0 : index
    %c20 = arith.constant 20 : index
    %25 = vector.load %arg10[%c0_45, %c20] : memref<256x36xf32, #tpu.memory_space<vmem>>, vector<256x4xf32>
    tpu.vector_store %arg10[%c0_45, %c20], %24 {strides = array<i32>} : memref<256x36xf32, #tpu.memory_space<vmem>>, vector<256x4xf32>,
    %c0_46 = arith.constant 0 : index
    %c2_47 = arith.constant 2 : index
    %c0_48 = arith.constant 0 : index
    %c0_49 = arith.constant 0 : index
    %26 = vector.load %arg1[%c0_46, %c2_47, %c0_48, %c0_49] : memref<1x18x18x4xf32, #tpu.memory_space<vmem>>, vector<1x16x16x4xf32>
    %27 = vector.shape_cast %26 : vector<1x16x16x4xf32> to vector<256x4xf32>
    %c0_50 = arith.constant 0 : index
    %c24 = arith.constant 24 : index
    %28 = vector.load %arg10[%c0_50, %c24] : memref<256x36xf32, #tpu.memory_space<vmem>>, vector<256x4xf32>
    tpu.vector_store %arg10[%c0_50, %c24], %27 {strides = array<i32>} : memref<256x36xf32, #tpu.memory_space<vmem>>, vector<256x4xf32>,
    %c0_51 = arith.constant 0 : index
    %c2_52 = arith.constant 2 : index
    %c1_53 = arith.constant 1 : index
    %c0_54 = arith.constant 0 : index
    %29 = vector.load %arg1[%c0_51, %c2_52, %c1_53, %c0_54] : memref<1x18x18x4xf32, #tpu.memory_space<vmem>>, vector<1x16x16x4xf32>
    %30 = vector.shape_cast %29 : vector<1x16x16x4xf32> to vector<256x4xf32>
    %c0_55 = arith.constant 0 : index
    %c28 = arith.constant 28 : index
    %31 = vector.load %arg10[%c0_55, %c28] : memref<256x36xf32, #tpu.memory_space<vmem>>, vector<256x4xf32>
    tpu.vector_store %arg10[%c0_55, %c28], %30 {strides = array<i32>} : memref<256x36xf32, #tpu.memory_space<vmem>>, vector<256x4xf32>,
    %c0_56 = arith.constant 0 : index
    %c2_57 = arith.constant 2 : index
    %c2_58 = arith.constant 2 : index
    %c0_59 = arith.constant 0 : index
    %32 = vector.load %arg1[%c0_56, %c2_57, %c2_58, %c0_59] : memref<1x18x18x4xf32, #tpu.memory_space<vmem>>, vector<1x16x16x4xf32>
    %33 = vector.shape_cast %32 : vector<1x16x16x4xf32> to vector<256x4xf32>
    %c0_60 = arith.constant 0 : index
    %c32 = arith.constant 32 : index
    %34 = vector.load %arg10[%c0_60, %c32] : memref<256x36xf32, #tpu.memory_space<vmem>>, vector<256x4xf32>
    tpu.vector_store %arg10[%c0_60, %c32], %33 {strides = array<i32>} : memref<256x36xf32, #tpu.memory_space<vmem>>, vector<256x4xf32>,
    %c0_61 = arith.constant 0 : index
    %c0_62 = arith.constant 0 : index
    %35 = vector.load %arg10[%c0_61, %c0_62] : memref<256x36xf32, #tpu.memory_space<vmem>>, vector<256x36xf32>
    %c0_63 = arith.constant 0 : index
    %c0_64 = arith.constant 0 : index
    %36 = vector.load %arg2[%c0_63, %c0_64] : memref<36x4xf32, #tpu.memory_space<vmem>>, vector<36x4xf32>
    %cst_65 = arith.constant dense<0.000000e+00> : vector<256x4xf32>
    %37 = tpu.matmul %35, %36, %cst_65 {dimension_numbers = #tpu.dot_dimension_numbers<[1], [0], [0], [1], [0, 0, 1, 1], [], []>} : vector<256x36xf32>, vector<36x4xf32>, vector<256x4xf32> -> vector<256x4xf32>
    %c0_66 = arith.constant 0 : index
    %c0_67 = arith.constant 0 : index
    %38 = vector.load %arg4[%c0_66, %c0_67] : memref<1x4xf32, #tpu.memory_space<vmem>>, vector<1x4xf32>
    %39 = vector.broadcast %38 : vector<1x4xf32> to vector<256x4xf32>
    %40 = arith.mulf %37, %39 : vector<256x4xf32>
    %c0_68 = arith.constant 0 : index
    %c0_69 = arith.constant 0 : index
    %41 = vector.load %arg5[%c0_68, %c0_69] : memref<1x4xf32, #tpu.memory_space<vmem>>, vector<1x4xf32>
    %42 = vector.broadcast %41 : vector<1x4xf32> to vector<256x4xf32>
    %43 = arith.addf %40, %42 : vector<256x4xf32>
    %cst_70 = arith.constant 0.000000e+00 : f32
    %44 = vector.broadcast %cst_70 : f32 to vector<256x4xf32>
    %45 = arith.maximumf %43, %44 : vector<256x4xf32>
    %46 = vector.shape_cast %45 : vector<256x4xf32> to vector<1x16x16x4xf32>
    %c0_71 = arith.constant 0 : index
    %c1_72 = arith.constant 1 : index
    %c1_73 = arith.constant 1 : index
    %c0_74 = arith.constant 0 : index
    %47 = vector.load %arg9[%c0_71, %c1_72, %c1_73, %c0_74] : memref<1x18x18x4xf32, #tpu.memory_space<vmem>>, vector<1x16x16x4xf32>
    tpu.vector_store %arg9[%c0_71, %c1_72, %c1_73, %c0_74], %46 {strides = array<i32>} : memref<1x18x18x4xf32, #tpu.memory_space<vmem>>, vector<1x16x16x4xf32>,
    %c0_75 = arith.constant 0 : index
    %c0_76 = arith.constant 0 : index
    %c0_77 = arith.constant 0 : index
    %c0_78 = arith.constant 0 : index
    %48 = vector.load %arg9[%c0_75, %c0_76, %c0_77, %c0_78] : memref<1x18x18x4xf32, #tpu.memory_space<vmem>>, vector<1x16x16x4xf32>
    %49 = vector.shape_cast %48 : vector<1x16x16x4xf32> to vector<256x4xf32>
    %c0_79 = arith.constant 0 : index
    %c0_80 = arith.constant 0 : index
    %50 = vector.load %arg10[%c0_79, %c0_80] : memref<256x36xf32, #tpu.memory_space<vmem>>, vector<256x4xf32>
    tpu.vector_store %arg10[%c0_79, %c0_80], %49 {strides = array<i32>} : memref<256x36xf32, #tpu.memory_space<vmem>>, vector<256x4xf32>,
    %c0_81 = arith.constant 0 : index
    %c0_82 = arith.constant 0 : index
    %c1_83 = arith.constant 1 : index
    %c0_84 = arith.constant 0 : index
    %51 = vector.load %arg9[%c0_81, %c0_82, %c1_83, %c0_84] : memref<1x18x18x4xf32, #tpu.memory_space<vmem>>, vector<1x16x16x4xf32>
    %52 = vector.shape_cast %51 : vector<1x16x16x4xf32> to vector<256x4xf32>
    %c0_85 = arith.constant 0 : index
    %c4_86 = arith.constant 4 : index
    %53 = vector.load %arg10[%c0_85, %c4_86] : memref<256x36xf32, #tpu.memory_space<vmem>>, vector<256x4xf32>
    tpu.vector_store %arg10[%c0_85, %c4_86], %52 {strides = array<i32>} : memref<256x36xf32, #tpu.memory_space<vmem>>, vector<256x4xf32>,
    %c0_87 = arith.constant 0 : index
    %c0_88 = arith.constant 0 : index
    %c2_89 = arith.constant 2 : index
    %c0_90 = arith.constant 0 : index
    %54 = vector.load %arg9[%c0_87, %c0_88, %c2_89, %c0_90] : memref<1x18x18x4xf32, #tpu.memory_space<vmem>>, vector<1x16x16x4xf32>
    %55 = vector.shape_cast %54 : vector<1x16x16x4xf32> to vector<256x4xf32>
    %c0_91 = arith.constant 0 : index
    %c8_92 = arith.constant 8 : index
    %56 = vector.load %arg10[%c0_91, %c8_92] : memref<256x36xf32, #tpu.memory_space<vmem>>, vector<256x4xf32>
    tpu.vector_store %arg10[%c0_91, %c8_92], %55 {strides = array<i32>} : memref<256x36xf32, #tpu.memory_space<vmem>>, vector<256x4xf32>,
    %c0_93 = arith.constant 0 : index
    %c1_94 = arith.constant 1 : index
    %c0_95 = arith.constant 0 : index
    %c0_96 = arith.constant 0 : index
    %57 = vector.load %arg9[%c0_93, %c1_94, %c0_95, %c0_96] : memref<1x18x18x4xf32, #tpu.memory_space<vmem>>, vector<1x16x16x4xf32>
    %58 = vector.shape_cast %57 : vector<1x16x16x4xf32> to vector<256x4xf32>
    %c0_97 = arith.constant 0 : index
    %c12_98 = arith.constant 12 : index
    %59 = vector.load %arg10[%c0_97, %c12_98] : memref<256x36xf32, #tpu.memory_space<vmem>>, vector<256x4xf32>
    tpu.vector_store %arg10[%c0_97, %c12_98], %58 {strides = array<i32>} : memref<256x36xf32, #tpu.memory_space<vmem>>, vector<256x4xf32>,
    %c0_99 = arith.constant 0 : index
    %c1_100 = arith.constant 1 : index
    %c1_101 = arith.constant 1 : index
    %c0_102 = arith.constant 0 : index
    %60 = vector.load %arg9[%c0_99, %c1_100, %c1_101, %c0_102] : memref<1x18x18x4xf32, #tpu.memory_space<vmem>>, vector<1x16x16x4xf32>
    %61 = vector.shape_cast %60 : vector<1x16x16x4xf32> to vector<256x4xf32>
    %c0_103 = arith.constant 0 : index
    %c16_104 = arith.constant 16 : index
    %62 = vector.load %arg10[%c0_103, %c16_104] : memref<256x36xf32, #tpu.memory_space<vmem>>, vector<256x4xf32>
    tpu.vector_store %arg10[%c0_103, %c16_104], %61 {strides = array<i32>} : memref<256x36xf32, #tpu.memory_space<vmem>>, vector<256x4xf32>,
    %c0_105 = arith.constant 0 : index
    %c1_106 = arith.constant 1 : index
    %c2_107 = arith.constant 2 : index
    %c0_108 = arith.constant 0 : index
    %63 = vector.load %arg9[%c0_105, %c1_106, %c2_107, %c0_108] : memref<1x18x18x4xf32, #tpu.memory_space<vmem>>, vector<1x16x16x4xf32>
    %64 = vector.shape_cast %63 : vector<1x16x16x4xf32> to vector<256x4xf32>
    %c0_109 = arith.constant 0 : index
    %c20_110 = arith.constant 20 : index
    %65 = vector.load %arg10[%c0_109, %c20_110] : memref<256x36xf32, #tpu.memory_space<vmem>>, vector<256x4xf32>
    tpu.vector_store %arg10[%c0_109, %c20_110], %64 {strides = array<i32>} : memref<256x36xf32, #tpu.memory_space<vmem>>, vector<256x4xf32>,
    %c0_111 = arith.constant 0 : index
    %c2_112 = arith.constant 2 : index
    %c0_113 = arith.constant 0 : index
    %c0_114 = arith.constant 0 : index
    %66 = vector.load %arg9[%c0_111, %c2_112, %c0_113, %c0_114] : memref<1x18x18x4xf32, #tpu.memory_space<vmem>>, vector<1x16x16x4xf32>
    %67 = vector.shape_cast %66 : vector<1x16x16x4xf32> to vector<256x4xf32>
    %c0_115 = arith.constant 0 : index
    %c24_116 = arith.constant 24 : index
    %68 = vector.load %arg10[%c0_115, %c24_116] : memref<256x36xf32, #tpu.memory_space<vmem>>, vector<256x4xf32>
    tpu.vector_store %arg10[%c0_115, %c24_116], %67 {strides = array<i32>} : memref<256x36xf32, #tpu.memory_space<vmem>>, vector<256x4xf32>,
    %c0_117 = arith.constant 0 : index
    %c2_118 = arith.constant 2 : index
    %c1_119 = arith.constant 1 : index
    %c0_120 = arith.constant 0 : index
    %69 = vector.load %arg9[%c0_117, %c2_118, %c1_119, %c0_120] : memref<1x18x18x4xf32, #tpu.memory_space<vmem>>, vector<1x16x16x4xf32>
    %70 = vector.shape_cast %69 : vector<1x16x16x4xf32> to vector<256x4xf32>
    %c0_121 = arith.constant 0 : index
    %c28_122 = arith.constant 28 : index
    %71 = vector.load %arg10[%c0_121, %c28_122] : memref<256x36xf32, #tpu.memory_space<vmem>>, vector<256x4xf32>
    tpu.vector_store %arg10[%c0_121, %c28_122], %70 {strides = array<i32>} : memref<256x36xf32, #tpu.memory_space<vmem>>, vector<256x4xf32>,
    %c0_123 = arith.constant 0 : index
    %c2_124 = arith.constant 2 : index
    %c2_125 = arith.constant 2 : index
    %c0_126 = arith.constant 0 : index
    %72 = vector.load %arg9[%c0_123, %c2_124, %c2_125, %c0_126] : memref<1x18x18x4xf32, #tpu.memory_space<vmem>>, vector<1x16x16x4xf32>
    %73 = vector.shape_cast %72 : vector<1x16x16x4xf32> to vector<256x4xf32>
    %c0_127 = arith.constant 0 : index
    %c32_128 = arith.constant 32 : index
    %74 = vector.load %arg10[%c0_127, %c32_128] : memref<256x36xf32, #tpu.memory_space<vmem>>, vector<256x4xf32>
    tpu.vector_store %arg10[%c0_127, %c32_128], %73 {strides = array<i32>} : memref<256x36xf32, #tpu.memory_space<vmem>>, vector<256x4xf32>,
    %c0_129 = arith.constant 0 : index
    %c0_130 = arith.constant 0 : index
    %75 = vector.load %arg10[%c0_129, %c0_130] : memref<256x36xf32, #tpu.memory_space<vmem>>, vector<256x36xf32>
    %c0_131 = arith.constant 0 : index
    %c0_132 = arith.constant 0 : index
    %76 = vector.load %arg3[%c0_131, %c0_132] : memref<36x4xf32, #tpu.memory_space<vmem>>, vector<36x4xf32>
    %cst_133 = arith.constant dense<0.000000e+00> : vector<256x4xf32>
    %77 = tpu.matmul %75, %76, %cst_133 {dimension_numbers = #tpu.dot_dimension_numbers<[1], [0], [0], [1], [0, 0, 1, 1], [], []>} : vector<256x36xf32>, vector<36x4xf32>, vector<256x4xf32> -> vector<256x4xf32>
    %c0_134 = arith.constant 0 : index
    %c0_135 = arith.constant 0 : index
    %78 = vector.load %arg6[%c0_134, %c0_135] : memref<1x4xf32, #tpu.memory_space<vmem>>, vector<1x4xf32>
    %79 = vector.broadcast %78 : vector<1x4xf32> to vector<256x4xf32>
    %80 = arith.mulf %77, %79 : vector<256x4xf32>
    %c0_136 = arith.constant 0 : index
    %c0_137 = arith.constant 0 : index
    %81 = vector.load %arg7[%c0_136, %c0_137] : memref<1x4xf32, #tpu.memory_space<vmem>>, vector<1x4xf32>
    %82 = vector.broadcast %81 : vector<1x4xf32> to vector<256x4xf32>
    %83 = arith.addf %80, %82 : vector<256x4xf32>
    %c0_138 = arith.constant 0 : index
    %c1_139 = arith.constant 1 : index
    %c1_140 = arith.constant 1 : index
    %c0_141 = arith.constant 0 : index
    %84 = vector.load %arg1[%c0_138, %c1_139, %c1_140, %c0_141] : memref<1x18x18x4xf32, #tpu.memory_space<vmem>>, vector<1x16x16x4xf32>
    %85 = vector.shape_cast %84 : vector<1x16x16x4xf32> to vector<256x4xf32>
    %86 = arith.addf %83, %85 : vector<256x4xf32>
    %cst_142 = arith.constant 0.000000e+00 : f32
    %87 = vector.broadcast %cst_142 : f32 to vector<256x4xf32>
    %88 = arith.maximumf %86, %87 : vector<256x4xf32>
    %89 = vector.shape_cast %88 : vector<256x4xf32> to vector<1x16x16x4xf32>
    %c0_143 = arith.constant 0 : index
    %c0_144 = arith.constant 0 : index
    %c0_145 = arith.constant 0 : index
    %c0_146 = arith.constant 0 : index
    %90 = vector.load %arg8[%c0_143, %c0_144, %c0_145, %c0_146] : memref<1x16x16x4xf32, #tpu.memory_space<vmem>>, vector<1x16x16x4xf32>
    tpu.vector_store %arg8[%c0_143, %c0_144, %c0_145, %c0_146], %89 {strides = array<i32>} : memref<1x16x16x4xf32, #tpu.memory_space<vmem>>, vector<1x16x16x4xf32>,
    return
  }
  func.func @transform_0(%arg0: i32) -> (i32, i32, i32, i32) {
    %c0_i32 = arith.constant 0 : i32
    %c0_i32_0 = arith.constant 0 : i32
    %c0_i32_1 = arith.constant 0 : i32
    %c0_i32_2 = arith.constant 0 : i32
    return %arg0, %c0_i32, %c0_i32_0, %c0_i32_1 : i32, i32, i32, i32
  }
  func.func @transform_1(%arg0: i32) -> (i32, i32) {
    %c0_i32 = arith.constant 0 : i32
    %c0_i32_0 = arith.constant 0 : i32
    %c0_i32_1 = arith.constant 0 : i32
    return %c0_i32, %c0_i32_0 : i32, i32
  }
  func.func @transform_2(%arg0: i32) -> (i32, i32) {
    %c0_i32 = arith.constant 0 : i32
    %c0_i32_0 = arith.constant 0 : i32
    %c0_i32_1 = arith.constant 0 : i32
    return %c0_i32, %c0_i32_0 : i32, i32
  }
  func.func @transform_3(%arg0: i32) -> (i32, i32) {
    %c0_i32 = arith.constant 0 : i32
    %c0_i32_0 = arith.constant 0 : i32
    %c0_i32_1 = arith.constant 0 : i32
    return %c0_i32, %c0_i32_0 : i32, i32
  }
  func.func @transform_4(%arg0: i32) -> (i32, i32) {
    %c0_i32 = arith.constant 0 : i32
    %c0_i32_0 = arith.constant 0 : i32
    %c0_i32_1 = arith.constant 0 : i32
    return %c0_i32, %c0_i32_0 : i32, i32
  }
  func.func @transform_5(%arg0: i32) -> (i32, i32) {
    %c0_i32 = arith.constant 0 : i32
    %c0_i32_0 = arith.constant 0 : i32
    %c0_i32_1 = arith.constant 0 : i32
    return %c0_i32, %c0_i32_0 : i32, i32
  }
  func.func @transform_6(%arg0: i32) -> (i32, i32) {
    %c0_i32 = arith.constant 0 : i32
    %c0_i32_0 = arith.constant 0 : i32
    %c0_i32_1 = arith.constant 0 : i32
    return %c0_i32, %c0_i32_0 : i32, i32
  }
  func.func @transform_7(%arg0: i32) -> (i32, i32, i32, i32) {
    %c0_i32 = arith.constant 0 : i32
    %c0_i32_0 = arith.constant 0 : i32
    %c0_i32_1 = arith.constant 0 : i32
    %c0_i32_2 = arith.constant 0 : i32
    return %arg0, %c0_i32, %c0_i32_0, %c0_i32_1 : i32, i32, i32, i32
  }
}

</mosaic_0001>

<bundles_post_ra>
// kernel: tpu_custom_call.1
= control target key start
LH: loop header
LB: loop body
LE: loop exit
PB: predicated region body
PF: predicated region fallthrough
CT: control target
= control target key end

     0   :  { %s5250_s24 = smov 0   ;;  %s7595_s0 = inlined_call_operand.vmem [shape: f32[2,18,18,4], index: 0, kind: input, shape index: {}]   ;;  %s7596_s1 = inlined_call_operand.vmem [shape: f32[36,4], index: 1, kind: input, shape index: {}]   ;;  %s7597_s2 = inlined_call_operand.vmem [shape: f32[36,4], index: 2, kind: input, shape index: {}]   ;;  %s7598_s3 = inlined_call_operand.vmem [shape: f32[1,4], index: 3, kind: input, shape index: {}]   ;;  %s7599_s4 = inlined_call_operand.vmem [shape: f32[1,4], index: 4, kind: input, shape index: {}]   ;;  %s7600_s5 = inlined_call_operand.vmem [shape: f32[1,4], index: 5, kind: input, shape index: {}]   ;;  %s7601_s6 = inlined_call_operand.vmem [shape: f32[1,4], index: 6, kind: input, shape index: {}]   ;;  %s7602_s7 = inlined_call_operand.vmem [shape: f32[2,16,16,4], index: 7, kind: output, shape index: {}]  }
   0x1 LB: > { %s4664_s25 = sadd.s32 4294967295, %s5199_s24   ;;  %p4668_p0 = scmp.ge.s32.totalorder %s5199_s24, 1  ;;  %s5199_s24 = sphi %s5250_s24, %s17_s24  }
   0x2   : > { %p237_p1 = scmp.lt.s32.totalorder %s5199_s24, 3 }
   0x4   : > { %p238_p2 = pnand %p4668_p0, %p237_p1 }
   0x6   : > { %241 = sbr.rel (%p238_p2) target bundleno = 1661 (0x67d), region = 48 }
   0xd   : > { %p269_p3 = scmp.lt.s32.totalorder %s4664_s25, 1  ;;  %s5201_s30 = smov 4   ;;  %vm279_vm0 = vcmask 31744   ;;  %vm549_vm1 = vcmask 64544   ;;  %vm742_vm2 = vcmask 97344   ;;  %vm936_vm3 = vcmask 130144  }
   0xe   : > { %s5202_s8 = smov 8   ;;  %s5203_s9 = smov 12   ;;  %vm1129_vm4 = vcmask 162944   ;;  %vm1322_vm5 = vcmask 195744   ;;  %vm2069_vm6 = vcmask 1043456   ;;  %vm1516_vm7 = vcmask 228544  }
   0xf   : > { %s7697_s25 = smov (!%p269_p3, %s4664_s25), 1  ;;  %s5204_s10 = smov 16   ;;  %vm1709_vm8 = vcmask 261344   ;;  %vm1902_vm9 = vcmask 294144   ;;  %vm1972_vm10 = vcmask 293888   ;;  %vm282_vm11 = vcmask 25600  }
  0x10   : > { %s5175_s26 = smul.u32 432, %s7697_s25  ;;  %s5205_s11 = smov 20   ;;  %vm288_vm12 = vcmask 24576  }
  0x11   : > { %s5206_s12 = smov 24   ;;  %s5207_s23 = smov 28  }
  0x12   : > { %s5264_s29 = scalar_lea.vmem %s7595_s0, %s5175_s26  ;;  %s5208_s26 = smov 32  }
  0x13   : > { %v389_v0 = vld [vmem:[%s5264_s29 + $0x1] sm:$0xff]  ;;  %v5268_v1 = vld [vmem:[%s5264_s29 + $0x19] sm:$0xff]  ;;  %v390_v2 = vld [vmem:[%s5264_s29 + $0x9] sm:$0xff] }
  0x14   : > { %453 = vrot.lane.b32.xlu0 %v389_v0, %s5201_s30  ;;  %457 = vrot.lane.b32.xlu1 %v5268_v1, %s5201_s30  ;;  %v5275_v3 = vld [vmem:[%s5264_s29 + $0x21] sm:$0xff]  ;;  %v5281_v4 = vld [vmem:[%s5264_s29 + $0x31] sm:$0xff] }
  0x15   : > { %v5284_v5 = vld [vmem:[%s5264_s29 + $0x39] sm:$0xff]  ;;  %v5291_v6 = vld [vmem:[%s5264_s29 + $0x49] sm:$0xff]  ;;  %v5294_v7 = vld [vmem:[%s5264_s29 + $0x51] sm:$0xff] }
  0x16   : > { %v5301_v8 = vld [vmem:[%s5264_s29 + $0x61] sm:$0xff]  ;;  %v5304_v9 = vld [vmem:[%s5264_s29 + $0x69] sm:$0xff]  ;;  %v5311_v10 = vld [vmem:[%s5264_s29 + $0x79] sm:$0xff] }
  0x17   : > { %v5314_v11 = vld [vmem:[%s5264_s29 + $0x81] sm:$0xff]  ;;  %v5322_v13 = vld [vmem:[%s5264_s29 + $0x18] sm:$0xff]  ;;  %v5339_v18 = vld [vmem:[%s5264_s29 + $0xa9] sm:$0xff] }
  0x18   : > { %455 = vrot.lane.b32.xlu0 %v390_v2, %s5201_s30  ;;  %459 = vrot.lane.b32.xlu1 %v5275_v3, %s5201_s30  ;;  %v325_v12 = vld [vmem:[%s5264_s29] sm:$0xff]  ;;  %v5325_v14 = vld [vmem:[%s5264_s29 + $0x91] sm:$0xff]  ;;  %359 = vst.msk [vmem:[#allocation3 + $0x10] sm:$0xff] %vm279_vm0, %v5322_v13 }
  0x19   : > { %v5328_v15 = vld [vmem:[%s5264_s29 + $0x99] sm:$0xff]  ;;  %357 = vst.msk [vmem:[#allocation3] sm:$0xff] %vm279_vm0, %v325_v12  ;;  %v326_v16 = vld [vmem:[%s5264_s29 + $0x8] sm:$0xff]  ;;  %v5344_v19 = vld [vmem:[%s5264_s29 + $0x30] sm:$0xff] }
  0x1a   : > { %358 = vst.msk [vmem:[#allocation3 + $0x8] sm:$0xff] %vm279_vm0, %v326_v16  ;;  %v5336_v17 = vld [vmem:[%s5264_s29 + $0x20] sm:$0xff]  ;;  %v5347_v20 = vld [vmem:[%s5264_s29 + $0x38] sm:$0xff]  ;;  %361 = vst.msk [vmem:[#allocation3 + $0x20] sm:$0xff] %vm279_vm0, %v5344_v19 }
  0x1b   : > { %360 = vst.msk [vmem:[#allocation3 + $0x18] sm:$0xff] %vm279_vm0, %v5336_v17  ;;  %v5354_v21 = vld [vmem:[%s5264_s29 + $0xb1] sm:$0xff]  ;;  %362 = vst.msk [vmem:[#allocation3 + $0x28] sm:$0xff] %vm279_vm0, %v5347_v20  ;;  %v5361_v22 = vld [vmem:[%s5264_s29 + $0x48] sm:$0xff] }
  0x1c   : > { %461 = vrot.lane.b32.xlu0 %v5281_v4, %s5201_s30  ;;  %463 = vrot.lane.b32.xlu1 %v5284_v5, %s5201_s30  ;;  %363 = vst.msk [vmem:[#allocation3 + $0x30] sm:$0xff] %vm279_vm0, %v5361_v22  ;;  %v5366_v23 = vld [vmem:[%s5264_s29 + $0x50] sm:$0xff]  ;;  %v5369_v24 = vld [vmem:[%s5264_s29 + $0x60] sm:$0xff] }
  0x1d   : > { %v5372_v25 = vld [vmem:[%s5264_s29 + $0x68] sm:$0xff]  ;;  %364 = vst.msk [vmem:[#allocation3 + $0x38] sm:$0xff] %vm279_vm0, %v5366_v23  ;;  %365 = vst.msk [vmem:[#allocation3 + $0x40] sm:$0xff] %vm279_vm0, %v5369_v24  ;;  %v5381_v26 = vld [vmem:[%s5264_s29 + $0x78] sm:$0xff] }
  0x1e   : > { %366 = vst.msk [vmem:[#allocation3 + $0x48] sm:$0xff] %vm279_vm0, %v5372_v25  ;;  %v5384_v27 = vld [vmem:[%s5264_s29 + $0x80] sm:$0xff]  ;;  %v5387_v28 = vld [vmem:[%s5264_s29 + $0x90] sm:$0xff]  ;;  %367 = vst.msk [vmem:[#allocation3 + $0x50] sm:$0xff] %vm279_vm0, %v5381_v26 }
  0x1f   : > { %v5390_v29 = vld [vmem:[%s5264_s29 + $0xc1] sm:$0xff]  ;;  %v5393_v30 = vld [vmem:[%s5264_s29 + $0xc9] sm:$0xff]  ;;  %368 = vst.msk [vmem:[#allocation3 + $0x58] sm:$0xff] %vm279_vm0, %v5384_v27  ;;  %369 = vst.msk [vmem:[#allocation3 + $0x60] sm:$0xff] %vm279_vm0, %v5387_v28 }
  0x20   : > { %465 = vrot.lane.b32.xlu0 %v5291_v6, %s5201_s30  ;;  %467 = vrot.lane.b32.xlu1 %v5294_v7, %s5201_s30  ;;  %v5402_v31 = vld [vmem:[%s5264_s29 + $0x98] sm:$0xff]  ;;  %v5405_v32 = vld [vmem:[%s5264_s29 + $0xa8] sm:$0xff] }
  0x21   : > { %v5408_v33 = vld [vmem:[%s5264_s29 + $0xb0] sm:$0xff]  ;;  %370 = vst.msk [vmem:[#allocation3 + $0x68] sm:$0xff] %vm279_vm0, %v5402_v31  ;;  %371 = vst.msk [vmem:[#allocation3 + $0x70] sm:$0xff] %vm279_vm0, %v5405_v32  ;;  %v5421_v34 = vld [vmem:[%s5264_s29 + $0xc0] sm:$0xff] }
  0x22   : > { %372 = vst.msk [vmem:[#allocation3 + $0x78] sm:$0xff] %vm279_vm0, %v5408_v33  ;;  %v5424_v35 = vld [vmem:[%s5264_s29 + $0xc8] sm:$0xff]  ;;  %373 = vst.msk [vmem:[#allocation3 + $0x80] sm:$0xff] %vm279_vm0, %v5421_v34  ;;  %v5431_v36 = vld [vmem:[%s5264_s29 + $0xd8] sm:$0xff] }
  0x23   : > { %374 = vst.msk [vmem:[#allocation3 + $0x88] sm:$0xff] %vm279_vm0, %v5424_v35  ;;  %v5434_v37 = vld [vmem:[%s5264_s29 + $0xe0] sm:$0xff]  ;;  %v5437_v38 = vld [vmem:[%s5264_s29 + $0xf0] sm:$0xff]  ;;  %375 = vst.msk [vmem:[#allocation3 + $0x90] sm:$0xff] %vm279_vm0, %v5431_v36 }
  0x24   : > { %469 = vrot.lane.b32.xlu0 %v5301_v8, %s5201_s30  ;;  %471 = vrot.lane.b32.xlu1 %v5304_v9, %s5201_s30  ;;  %376 = vst.msk [vmem:[#allocation3 + $0x98] sm:$0xff] %vm279_vm0, %v5434_v37  ;;  %377 = vst.msk [vmem:[#allocation3 + $0xa0] sm:$0xff] %vm279_vm0, %v5437_v38  ;;  %v5446_v39 = vld [vmem:[%s5264_s29 + $0xf8] sm:$0xff]  ;;  %v5449_v40 = vld [vmem:[%s5264_s29 + $0x108] sm:$0xff] }
  0x25   : > { %v5452_v41 = vld [vmem:[%s5264_s29 + $0x110] sm:$0xff]  ;;  %378 = vst.msk [vmem:[#allocation3 + $0xa8] sm:$0xff] %vm279_vm0, %v5446_v39  ;;  %379 = vst.msk [vmem:[#allocation3 + $0xb0] sm:$0xff] %vm279_vm0, %v5449_v40  ;;  %v5465_v42 = vld [vmem:[%s5264_s29 + $0xd9] sm:$0xff] }
  0x26   : > { %380 = vst.msk [vmem:[#allocation3 + $0xb8] sm:$0xff] %vm279_vm0, %v5452_v41  ;;  %v5468_v43 = vld [vmem:[%s5264_s29 + $0xe1] sm:$0xff]  ;;  %v5485_v46 = vld [vmem:[%s5264_s29 + $0xf1] sm:$0xff]  ;;  %v5488_v47 = vld [vmem:[%s5264_s29 + $0xf9] sm:$0xff] }
  0x27   : > { %v5471_v44 = vld [vmem:[%s5264_s29 + $0x120] sm:$0xff]  ;;  %v5476_v45 = vld [vmem:[%s5264_s29 + $0x128] sm:$0xff]  ;;  %v5491_v48 = vld [vmem:[%s5264_s29 + $0x138] sm:$0xff] }
  0x28   : > { %473 = vrot.lane.b32.xlu0 %v5311_v10, %s5201_s30  ;;  %475 = vrot.lane.b32.xlu1 %v5314_v11, %s5201_s30  ;;  %381 = vst.msk [vmem:[#allocation3 + $0xc0] sm:$0xff] %vm279_vm0, %v5471_v44  ;;  %382 = vst.msk [vmem:[#allocation3 + $0xc8] sm:$0xff] %vm279_vm0, %v5476_v45  ;;  %v5496_v49 = vld [vmem:[%s5264_s29 + $0x140] sm:$0xff]  ;;  %v5505_v50 = vld [vmem:[%s5264_s29 + $0x109] sm:$0xff] }
  0x29   : > { %383 = vst.msk [vmem:[#allocation3 + $0xd0] sm:$0xff] %vm279_vm0, %v5491_v48  ;;  %384 = vst.msk [vmem:[#allocation3 + $0xd8] sm:$0xff] %vm279_vm0, %v5496_v49  ;;  %v5508_v51 = vld [vmem:[%s5264_s29 + $0x111] sm:$0xff]  ;;  %v5525_v54 = vld [vmem:[%s5264_s29 + $0x121] sm:$0xff] }
  0x2a   : > { %v5511_v52 = vld [vmem:[%s5264_s29 + $0x150] sm:$0xff]  ;;  %v5516_v53 = vld [vmem:[%s5264_s29 + $0x158] sm:$0xff]  ;;  %v5531_v56 = vld [vmem:[%s5264_s29 + $0x168] sm:$0xff] }
  0x2b   : > { %385 = vst.msk [vmem:[#allocation3 + $0xe0] sm:$0xff] %vm279_vm0, %v5511_v52  ;;  %386 = vst.msk [vmem:[#allocation3 + $0xe8] sm:$0xff] %vm279_vm0, %v5516_v53  ;;  %v5528_v55 = vld [vmem:[%s5264_s29 + $0x129] sm:$0xff]  ;;  %v5545_v58 = vld [vmem:[%s5264_s29 + $0x139] sm:$0xff] }
  0x2c   : > { %477 = vrot.lane.b32.xlu0 %v5325_v14, %s5201_s30  ;;  %479 = vrot.lane.b32.xlu1 %v5328_v15, %s5201_s30  ;;  %387 = vst.msk [vmem:[#allocation3 + $0xf0] sm:$0xff] %vm279_vm0, %v5531_v56  ;;  %v5536_v57 = vld [vmem:[%s5264_s29 + $0x170] sm:$0xff]  ;;  %v5548_v59 = vld [vmem:[%s5264_s29 + $0x141] sm:$0xff] }
  0x2d   : > { %7634 = vst [vmem:[#allocation4_spill] sm:$0xff] %v5536_v57  ;;  %388 = vst.msk [vmem:[#allocation3 + $0xf8] sm:$0xff] %vm279_vm0, %v5536_v57  ;;  %v5555_v60 = vld [vmem:[%s5264_s29 + $0x151] sm:$0xff]  ;;  %v5558_v61 = vld [vmem:[%s5264_s29 + $0x159] sm:$0xff] }
  0x2e   : > { %7635 = vst [vmem:[#allocation5_spill] sm:$0xff] %v5555_v60  ;;  %7636 = vst [vmem:[#allocation6_spill] sm:$0xff] %v5558_v61  ;;  %v5565_v62 = vld [vmem:[%s5264_s29 + $0x169] sm:$0xff]  ;;  %v5568_v63 = vld [vmem:[%s5264_s29 + $0x171] sm:$0xff] }
  0x2f   : > { %7637 = vst [vmem:[#allocation7_spill] sm:$0xff] %v5565_v62  ;;  %7638 = vst [vmem:[#allocation8_spill] sm:$0xff] %v5568_v63  ;;  %v582_v0 = vld [vmem:[%s5264_s29 + $0x2] sm:$0xff]  ;;  %v583_v2 = vld [vmem:[%s5264_s29 + $0xa] sm:$0xff] }
  0x30   : > { %481 = vrot.lane.b32.xlu0 %v5339_v18, %s5201_s30  ;;  %483 = vrot.lane.b32.xlu1 %v5354_v21, %s5201_s30  ;;  %v5579_v12 = vld [vmem:[%s5264_s29 + $0x1a] sm:$0xff]  ;;  %v5582_v16 = vld [vmem:[%s5264_s29 + $0x22] sm:$0xff] }
  0x31   : > { %7639 = vst [vmem:[#allocation9_spill] sm:$0xff] %v5579_v12  ;;  %7640 = vst [vmem:[#allocation10_spill] sm:$0xff] %v5582_v16 }
  0x34   : > { %485 = vrot.lane.b32.xlu0 %v5390_v29, %s5201_s30  ;;  %487 = vrot.lane.b32.xlu1 %v5393_v30, %s5201_s30 }
  0x38   : > { %489 = vrot.lane.b32.xlu0 %v5465_v42, %s5201_s30  ;;  %491 = vrot.lane.b32.xlu1 %v5468_v43, %s5201_s30 }
  0x3c   : > { %493 = vrot.lane.b32.xlu0 %v5485_v46, %s5201_s30  ;;  %495 = vrot.lane.b32.xlu1 %v5488_v47, %s5201_s30 }
  0x40   : > { %497 = vrot.lane.b32.xlu0 %v5505_v50, %s5201_s30  ;;  %499 = vrot.lane.b32.xlu1 %v5508_v51, %s5201_s30 }
  0x44   : > { %501 = vrot.lane.b32.xlu0 %v5525_v54, %s5201_s30  ;;  %503 = vrot.lane.b32.xlu1 %v5528_v55, %s5201_s30 }
  0x48   : > { %505 = vrot.lane.b32.xlu0 %v5545_v58, %s5201_s30  ;;  %507 = vrot.lane.b32.xlu1 %v5548_v59, %s5201_s30 }
  0x4c   : > { %509 = vrot.lane.b32.xlu0 %v5555_v60, %s5201_s30  ;;  %511 = vrot.lane.b32.xlu1 %v5558_v61, %s5201_s30 }
  0x50   : > { %513 = vrot.lane.b32.xlu0 %v5565_v62, %s5201_s30  ;;  %515 = vrot.lane.b32.xlu1 %v5568_v63, %s5201_s30  ;;  %v5589_v63 = vld [vmem:[%s5264_s29 + $0x32] sm:$0xff]  ;;  %v5592_v62 = vld [vmem:[%s5264_s29 + $0x3a] sm:$0xff] }
  0x51   : > { %7641 = vst [vmem:[#allocation11_spill] sm:$0xff] %v5589_v63  ;;  %7642 = vst [vmem:[#allocation12_spill] sm:$0xff] %v5592_v62 }
  0x54   : > { %646 = vrot.lane.b32.xlu0 %v582_v0, %s5202_s8  ;;  %648 = vrot.lane.b32.xlu1 %v583_v2, %s5202_s8  ;;  %v5599_v0 = vld [vmem:[%s5264_s29 + $0x4a] sm:$0xff]  ;;  %v5602_v2 = vld [vmem:[%s5264_s29 + $0x52] sm:$0xff] }
  0x55   : > { %7643 = vst [vmem:[#allocation13_spill] sm:$0xff] %v5599_v0  ;;  %7644 = vst [vmem:[#allocation14_spill] sm:$0xff] %v5602_v2 }
  0x58   : > { %650 = vrot.lane.b32.xlu0 %v5579_v12, %s5202_s8  ;;  %652 = vrot.lane.b32.xlu1 %v5582_v16, %s5202_s8  ;;  %v5609_v16 = vld [vmem:[%s5264_s29 + $0x62] sm:$0xff]  ;;  %v5612_v12 = vld [vmem:[%s5264_s29 + $0x6a] sm:$0xff] }
  0x59   : > { %7645 = vst [vmem:[#allocation15_spill] sm:$0xff] %v5609_v16  ;;  %7646 = vst [vmem:[#allocation16_spill] sm:$0xff] %v5612_v12 }
  0x5c   : > { %654 = vrot.lane.b32.xlu0 %v5589_v63, %s5202_s8  ;;  %656 = vrot.lane.b32.xlu1 %v5592_v62, %s5202_s8  ;;  %v5619_v62 = vld [vmem:[%s5264_s29 + $0x7a] sm:$0xff]  ;;  %v5622_v63 = vld [vmem:[%s5264_s29 + $0x82] sm:$0xff] }
  0x5d   : > { %7647 = vst [vmem:[#allocation17_spill] sm:$0xff] %v5619_v62  ;;  %7648 = vst [vmem:[#allocation18_spill] sm:$0xff] %v5622_v63 }
  0x60   : > { %658 = vrot.lane.b32.xlu0 %v5599_v0, %s5202_s8  ;;  %660 = vrot.lane.b32.xlu1 %v5602_v2, %s5202_s8  ;;  %v5629_v2 = vld [vmem:[%s5264_s29 + $0x92] sm:$0xff]  ;;  %v5632_v0 = vld [vmem:[%s5264_s29 + $0x9a] sm:$0xff] }
  0x61   : > { %7649 = vst [vmem:[#allocation19_spill] sm:$0xff] %v5629_v2  ;;  %7650 = vst [vmem:[#allocation20_spill] sm:$0xff] %v5632_v0 }
  0x64   : > { %662 = vrot.lane.b32.xlu0 %v5609_v16, %s5202_s8  ;;  %664 = vrot.lane.b32.xlu1 %v5612_v12, %s5202_s8  ;;  %v5639_v12 = vld [vmem:[%s5264_s29 + $0xaa] sm:$0xff]  ;;  %v5642_v16 = vld [vmem:[%s5264_s29 + $0xb2] sm:$0xff] }
  0x65   : > { %7651 = vst [vmem:[#allocation21_spill] sm:$0xff] %v5639_v12  ;;  %7652 = vst [vmem:[#allocation22_spill] sm:$0xff] %v5642_v16 }
  0x68   : > { %666 = vrot.lane.b32.xlu0 %v5619_v62, %s5202_s8  ;;  %668 = vrot.lane.b32.xlu1 %v5622_v63, %s5202_s8  ;;  %v5649_v63 = vld [vmem:[%s5264_s29 + $0xc2] sm:$0xff]  ;;  %v5652_v62 = vld [vmem:[%s5264_s29 + $0xca] sm:$0xff] }
  0x69   : > { %7653 = vst [vmem:[#allocation23_spill] sm:$0xff] %v5649_v63  ;;  %7654 = vst [vmem:[#allocation24_spill] sm:$0xff] %v5652_v62 }
  0x6c   : > { %670 = vrot.lane.b32.xlu0 %v5629_v2, %s5202_s8  ;;  %672 = vrot.lane.b32.xlu1 %v5632_v0, %s5202_s8  ;;  %v5659_v0 = vld [vmem:[%s5264_s29 + $0xda] sm:$0xff]  ;;  %v5662_v2 = vld [vmem:[%s5264_s29 + $0xe2] sm:$0xff] }
  0x6d   : > { %7655 = vst [vmem:[#allocation25_spill] sm:$0xff] %v5659_v0  ;;  %7656 = vst [vmem:[#allocation26_spill] sm:$0xff] %v5662_v2 }
  0x70   : > { %674 = vrot.lane.b32.xlu0 %v5639_v12, %s5202_s8  ;;  %676 = vrot.lane.b32.xlu1 %v5642_v16, %s5202_s8  ;;  %v5669_v16 = vld [vmem:[%s5264_s29 + $0xf2] sm:$0xff]  ;;  %v5672_v12 = vld [vmem:[%s5264_s29 + $0xfa] sm:$0xff] }
  0x71   : > { %7657 = vst [vmem:[#allocation27_spill] sm:$0xff] %v5669_v16  ;;  %7658 = vst [vmem:[#allocation28_spill] sm:$0xff] %v5672_v12 }
  0x74   : > { %678 = vrot.lane.b32.xlu0 %v5649_v63, %s5202_s8  ;;  %680 = vrot.lane.b32.xlu1 %v5652_v62, %s5202_s8  ;;  %v5679_v62 = vld [vmem:[%s5264_s29 + $0x10a] sm:$0xff]  ;;  %v5682_v63 = vld [vmem:[%s5264_s29 + $0x112] sm:$0xff] }
  0x75   : > { %7659 = vst [vmem:[#allocation29_spill] sm:$0xff] %v5679_v62  ;;  %7660 = vst [vmem:[#allocation30_spill] sm:$0xff] %v5682_v63 }
  0x78   : > { %682 = vrot.lane.b32.xlu0 %v5659_v0, %s5202_s8  ;;  %684 = vrot.lane.b32.xlu1 %v5662_v2, %s5202_s8  ;;  %v5689_v2 = vld [vmem:[%s5264_s29 + $0x122] sm:$0xff]  ;;  %v5692_v0 = vld [vmem:[%s5264_s29 + $0x12a] sm:$0xff] }
  0x79   : > { %7661 = vst [vmem:[#allocation31_spill] sm:$0xff] %v5689_v2  ;;  %7662 = vst [vmem:[#allocation32_spill] sm:$0xff] %v5692_v0 }
  0x7c   : > { %686 = vrot.lane.b32.xlu0 %v5669_v16, %s5202_s8  ;;  %688 = vrot.lane.b32.xlu1 %v5672_v12, %s5202_s8  ;;  %v5699_v12 = vld [vmem:[%s5264_s29 + $0x13a] sm:$0xff]  ;;  %v5702_v16 = vld [vmem:[%s5264_s29 + $0x142] sm:$0xff] }
  0x7d   : > { %7663 = vst [vmem:[#allocation33_spill] sm:$0xff] %v5699_v12  ;;  %7664 = vst [vmem:[#allocation34_spill] sm:$0xff] %v5702_v16 }
  0x80   : > { %690 = vrot.lane.b32.xlu0 %v5679_v62, %s5202_s8  ;;  %692 = vrot.lane.b32.xlu1 %v5682_v63, %s5202_s8 }
  0x84   : > { %694 = vrot.lane.b32.xlu0 %v5689_v2, %s5202_s8  ;;  %696 = vrot.lane.b32.xlu1 %v5692_v0, %s5202_s8  ;;  %v5711_v0 = vld [vmem:[%s5264_s29 + $0x152] sm:$0xff]  ;;  %v5714_v2 = vld [vmem:[%s5264_s29 + $0x15a] sm:$0xff] }
  0x86   : > { %v454_v62 = vpop.permute.xlu0 %453  ;;  %v458_v61 = vpop.permute.xlu1 %457 }
  0x87   : > { %550 = vst.msk [vmem:[#allocation3] sm:$0xff] %vm549_vm1, %v454_v62  ;;  %552 = vst.msk [vmem:[#allocation3 + $0x10] sm:$0xff] %vm549_vm1, %v458_v61  ;;  %v5723_v61 = vld [vmem:[%s5264_s29 + $0x16a] sm:$0xff]  ;;  %v5726_v62 = vld [vmem:[%s5264_s29 + $0x172] sm:$0xff] }
  0x88   : > { %698 = vrot.lane.b32.xlu0 %v5699_v12, %s5202_s8  ;;  %700 = vrot.lane.b32.xlu1 %v5702_v16, %s5202_s8 }
  0x8a   : > { %v456_v63 = vpop.permute.xlu0 %455  ;;  %v460_v60 = vpop.permute.xlu1 %459 }
  0x8b   : > { %551 = vst.msk [vmem:[#allocation3 + $0x8] sm:$0xff] %vm549_vm1, %v456_v63  ;;  %553 = vst.msk [vmem:[#allocation3 + $0x18] sm:$0xff] %vm549_vm1, %v460_v60 }
  0x8c   : > { %702 = vrot.lane.b32.xlu0 %v5711_v0, %s5202_s8  ;;  %704 = vrot.lane.b32.xlu1 %v5714_v2, %s5202_s8 }
  0x8e   : > { %v462_v16 = vpop.permute.xlu0 %461  ;;  %v464_v12 = vpop.permute.xlu1 %463 }
  0x8f   : > { %554 = vst.msk [vmem:[#allocation3 + $0x20] sm:$0xff] %vm549_vm1, %v462_v16  ;;  %555 = vst.msk [vmem:[#allocation3 + $0x28] sm:$0xff] %vm549_vm1, %v464_v12 }
  0x90   : > { %706 = vrot.lane.b32.xlu0 %v5723_v61, %s5202_s8  ;;  %708 = vrot.lane.b32.xlu1 %v5726_v62, %s5202_s8 }
  0x92   : > { %v466_v60 = vpop.permute.xlu0 %465  ;;  %v468_v63 = vpop.permute.xlu1 %467 }
  0x93   : > { %556 = vst.msk [vmem:[#allocation3 + $0x30] sm:$0xff] %vm549_vm1, %v466_v60  ;;  %557 = vst.msk [vmem:[#allocation3 + $0x38] sm:$0xff] %vm549_vm1, %v468_v63 }
  0x94   : > { %840 = vrot.lane.b32.xlu0 %v5322_v13, %s5203_s9  ;;  %842 = vrot.lane.b32.xlu1 %v5336_v17, %s5203_s9 }
  0x96   : > { %v470_v12 = vpop.permute.xlu0 %469  ;;  %v472_v16 = vpop.permute.xlu1 %471 }
  0x97   : > { %558 = vst.msk [vmem:[#allocation3 + $0x40] sm:$0xff] %vm549_vm1, %v470_v12  ;;  %559 = vst.msk [vmem:[#allocation3 + $0x48] sm:$0xff] %vm549_vm1, %v472_v16 }
  0x98   : > { %844 = vrot.lane.b32.xlu0 %v5344_v19, %s5203_s9  ;;  %846 = vrot.lane.b32.xlu1 %v5347_v20, %s5203_s9 }
  0x9a   : > { %v474_v60 = vpop.permute.xlu0 %473  ;;  %v476_v63 = vpop.permute.xlu1 %475 }
  0x9b   : > { %560 = vst.msk [vmem:[#allocation3 + $0x50] sm:$0xff] %vm549_vm1, %v474_v60  ;;  %561 = vst.msk [vmem:[#allocation3 + $0x58] sm:$0xff] %vm549_vm1, %v476_v63 }
  0x9c   : > { %848 = vrot.lane.b32.xlu0 %v5361_v22, %s5203_s9  ;;  %850 = vrot.lane.b32.xlu1 %v5366_v23, %s5203_s9 }
  0x9e   : > { %v478_v13 = vpop.permute.xlu0 %477  ;;  %v480_v17 = vpop.permute.xlu1 %479 }
  0x9f   : > { %562 = vst.msk [vmem:[#allocation3 + $0x60] sm:$0xff] %vm549_vm1, %v478_v13  ;;  %563 = vst.msk [vmem:[#allocation3 + $0x68] sm:$0xff] %vm549_vm1, %v480_v17 }
  0xa0   : > { %852 = vrot.lane.b32.xlu0 %v5369_v24, %s5203_s9  ;;  %854 = vrot.lane.b32.xlu1 %v5372_v25, %s5203_s9 }
  0xa2   : > { %v482_v12 = vpop.permute.xlu0 %481  ;;  %v484_v16 = vpop.permute.xlu1 %483 }
  0xa3   : > { %564 = vst.msk [vmem:[#allocation3 + $0x70] sm:$0xff] %vm549_vm1, %v482_v12  ;;  %565 = vst.msk [vmem:[#allocation3 + $0x78] sm:$0xff] %vm549_vm1, %v484_v16 }
  0xa4   : > { %856 = vrot.lane.b32.xlu0 %v5381_v26, %s5203_s9  ;;  %858 = vrot.lane.b32.xlu1 %v5384_v27, %s5203_s9 }
  0xa6   : > { %v486_v60 = vpop.permute.xlu0 %485  ;;  %v488_v63 = vpop.permute.xlu1 %487 }
  0xa7   : > { %566 = vst.msk [vmem:[#allocation3 + $0x80] sm:$0xff] %vm549_vm1, %v486_v60  ;;  %567 = vst.msk [vmem:[#allocation3 + $0x88] sm:$0xff] %vm549_vm1, %v488_v63 }
  0xa8   : > { %860 = vrot.lane.b32.xlu0 %v5387_v28, %s5203_s9  ;;  %862 = vrot.lane.b32.xlu1 %v5402_v31, %s5203_s9 }
  0xaa   : > { %v490_v13 = vpop.permute.xlu0 %489  ;;  %v492_v17 = vpop.permute.xlu1 %491 }
  0xab   : > { %568 = vst.msk [vmem:[#allocation3 + $0x90] sm:$0xff] %vm549_vm1, %v490_v13  ;;  %569 = vst.msk [vmem:[#allocation3 + $0x98] sm:$0xff] %vm549_vm1, %v492_v17 }
  0xac   : > { %864 = vrot.lane.b32.xlu0 %v5405_v32, %s5203_s9  ;;  %866 = vrot.lane.b32.xlu1 %v5408_v33, %s5203_s9 }
  0xae   : > { %v494_v12 = vpop.permute.xlu0 %493  ;;  %v496_v16 = vpop.permute.xlu1 %495 }
  0xaf   : > { %570 = vst.msk [vmem:[#allocation3 + $0xa0] sm:$0xff] %vm549_vm1, %v494_v12  ;;  %571 = vst.msk [vmem:[#allocation3 + $0xa8] sm:$0xff] %vm549_vm1, %v496_v16 }
  0xb0   : > { %868 = vrot.lane.b32.xlu0 %v5421_v34, %s5203_s9  ;;  %870 = vrot.lane.b32.xlu1 %v5424_v35, %s5203_s9 }
  0xb2   : > { %v498_v60 = vpop.permute.xlu0 %497  ;;  %v500_v63 = vpop.permute.xlu1 %499 }
  0xb3   : > { %572 = vst.msk [vmem:[#allocation3 + $0xb0] sm:$0xff] %vm549_vm1, %v498_v60  ;;  %573 = vst.msk [vmem:[#allocation3 + $0xb8] sm:$0xff] %vm549_vm1, %v500_v63 }
  0xb4   : > { %872 = vrot.lane.b32.xlu0 %v5431_v36, %s5203_s9  ;;  %874 = vrot.lane.b32.xlu1 %v5434_v37, %s5203_s9 }
  0xb6   : > { %v502_v13 = vpop.permute.xlu0 %501  ;;  %v504_v17 = vpop.permute.xlu1 %503 }
  0xb7   : > { %574 = vst.msk [vmem:[#allocation3 + $0xc0] sm:$0xff] %vm549_vm1, %v502_v13  ;;  %575 = vst.msk [vmem:[#allocation3 + $0xc8] sm:$0xff] %vm549_vm1, %v504_v17 }
  0xb8   : > { %876 = vrot.lane.b32.xlu0 %v5437_v38, %s5203_s9  ;;  %878 = vrot.lane.b32.xlu1 %v5446_v39, %s5203_s9 }
  0xba   : > { %v506_v12 = vpop.permute.xlu0 %505  ;;  %v508_v16 = vpop.permute.xlu1 %507 }
  0xbb   : > { %576 = vst.msk [vmem:[#allocation3 + $0xd0] sm:$0xff] %vm549_vm1, %v506_v12  ;;  %577 = vst.msk [vmem:[#allocation3 + $0xd8] sm:$0xff] %vm549_vm1, %v508_v16 }
  0xbc   : > { %880 = vrot.lane.b32.xlu0 %v5449_v40, %s5203_s9  ;;  %882 = vrot.lane.b32.xlu1 %v5452_v41, %s5203_s9 }
  0xbe   : > { %v510_v60 = vpop.permute.xlu0 %509  ;;  %v512_v63 = vpop.permute.xlu1 %511 }
  0xbf   : > { %578 = vst.msk [vmem:[#allocation3 + $0xe0] sm:$0xff] %vm549_vm1, %v510_v60  ;;  %579 = vst.msk [vmem:[#allocation3 + $0xe8] sm:$0xff] %vm549_vm1, %v512_v63 }
  0xc0   : > { %884 = vrot.lane.b32.xlu0 %v5471_v44, %s5203_s9  ;;  %886 = vrot.lane.b32.xlu1 %v5476_v45, %s5203_s9 }
  0xc2   : > { %v514_v13 = vpop.permute.xlu0 %513  ;;  %v516_v17 = vpop.permute.xlu1 %515 }
  0xc3   : > { %580 = vst.msk [vmem:[#allocation3 + $0xf0] sm:$0xff] %vm549_vm1, %v514_v13  ;;  %581 = vst.msk [vmem:[#allocation3 + $0xf8] sm:$0xff] %vm549_vm1, %v516_v17  ;;  %v4702_v13 = vld [vmem:[%s5264_s29 + $0x180] sm:$0xff]  ;;  %v4703_v17 = vld [vmem:[%s5264_s29 + $0x188] sm:$0xff] }
  0xc4   : > { %888 = vrot.lane.b32.xlu0 %v5491_v48, %s5203_s9  ;;  %890 = vrot.lane.b32.xlu1 %v5496_v49, %s5203_s9 }
  0xc6   : > { %v647_v12 = vpop.permute.xlu0 %646  ;;  %v649_v16 = vpop.permute.xlu1 %648 }
  0xc7   : > { %743 = vst.msk [vmem:[#allocation3] sm:$0xff] %vm742_vm2, %v647_v12  ;;  %744 = vst.msk [vmem:[#allocation3 + $0x8] sm:$0xff] %vm742_vm2, %v649_v16 }
  0xc8   : > { %892 = vrot.lane.b32.xlu0 %v5511_v52, %s5203_s9  ;;  %894 = vrot.lane.b32.xlu1 %v5516_v53, %s5203_s9 }
  0xca   : > { %v651_v60 = vpop.permute.xlu0 %650  ;;  %v653_v63 = vpop.permute.xlu1 %652 }
  0xcb   : > { %745 = vst.msk [vmem:[#allocation3 + $0x10] sm:$0xff] %vm742_vm2, %v651_v60  ;;  %746 = vst.msk [vmem:[#allocation3 + $0x18] sm:$0xff] %vm742_vm2, %v653_v63 }
  0xcc   : > { %896 = vrot.lane.b32.xlu0 %v5531_v56, %s5203_s9  ;;  %898 = vrot.lane.b32.xlu1 %v5536_v57, %s5203_s9 }
  0xce   : > { %v655_v12 = vpop.permute.xlu0 %654  ;;  %v657_v16 = vpop.permute.xlu1 %656 }
  0xcf   : > { %747 = vst.msk [vmem:[#allocation3 + $0x20] sm:$0xff] %vm742_vm2, %v655_v12  ;;  %748 = vst.msk [vmem:[#allocation3 + $0x28] sm:$0xff] %vm742_vm2, %v657_v16 }
  0xd0   : > { %900 = vrot.lane.b32.xlu0 %v4702_v13, %s5203_s9  ;;  %902 = vrot.lane.b32.xlu1 %v4703_v17, %s5203_s9 }
  0xd2   : > { %v659_v60 = vpop.permute.xlu0 %658  ;;  %v661_v63 = vpop.permute.xlu1 %660 }
  0xd3   : > { %749 = vst.msk [vmem:[#allocation3 + $0x30] sm:$0xff] %vm742_vm2, %v659_v60  ;;  %750 = vst.msk [vmem:[#allocation3 + $0x38] sm:$0xff] %vm742_vm2, %v661_v63  ;;  %v5921_v60 = vld [vmem:[%s5264_s29 + $0x181] sm:$0xff]  ;;  %v5924_v63 = vld [vmem:[%s5264_s29 + $0x189] sm:$0xff] }
  0xd4   : > { %1033 = vrot.lane.b32.xlu0 %v5268_v1, %s5204_s10  ;;  %1035 = vrot.lane.b32.xlu1 %v5275_v3, %s5204_s10 }
  0xd6   : > { %v663_v12 = vpop.permute.xlu0 %662  ;;  %v665_v57 = vpop.permute.xlu1 %664 }
  0xd7   : > { %751 = vst.msk [vmem:[#allocation3 + $0x40] sm:$0xff] %vm742_vm2, %v663_v12  ;;  %752 = vst.msk [vmem:[#allocation3 + $0x48] sm:$0xff] %vm742_vm2, %v665_v57 }
  0xd8   : > { %1037 = vrot.lane.b32.xlu0 %v5281_v4, %s5204_s10  ;;  %1039 = vrot.lane.b32.xlu1 %v5284_v5, %s5204_s10 }
  0xda   : > { %v667_v13 = vpop.permute.xlu0 %666  ;;  %v669_v17 = vpop.permute.xlu1 %668 }
  0xdb   : > { %753 = vst.msk [vmem:[#allocation3 + $0x50] sm:$0xff] %vm742_vm2, %v667_v13  ;;  %754 = vst.msk [vmem:[#allocation3 + $0x58] sm:$0xff] %vm742_vm2, %v669_v17 }
  0xdc   : > { %1041 = vrot.lane.b32.xlu0 %v5291_v6, %s5204_s10  ;;  %1043 = vrot.lane.b32.xlu1 %v5294_v7, %s5204_s10 }
  0xde   : > { %v671_v1 = vpop.permute.xlu0 %670  ;;  %v673_v3 = vpop.permute.xlu1 %672 }
  0xdf   : > { %755 = vst.msk [vmem:[#allocation3 + $0x60] sm:$0xff] %vm742_vm2, %v671_v1  ;;  %756 = vst.msk [vmem:[#allocation3 + $0x68] sm:$0xff] %vm742_vm2, %v673_v3  ;;  %v7669_v3 = vld [vmem:[#allocation9_spill] sm:$0xff] }
  0xe0   : > { %1045 = vrot.lane.b32.xlu0 %v5301_v8, %s5204_s10  ;;  %1047 = vrot.lane.b32.xlu1 %v5304_v9, %s5204_s10 }
  0xe2   : > { %v675_v4 = vpop.permute.xlu0 %674  ;;  %v677_v5 = vpop.permute.xlu1 %676 }
  0xe3   : > { %757 = vst.msk [vmem:[#allocation3 + $0x70] sm:$0xff] %vm742_vm2, %v675_v4  ;;  %758 = vst.msk [vmem:[#allocation3 + $0x78] sm:$0xff] %vm742_vm2, %v677_v5  ;;  %v7670_v4 = vld [vmem:[#allocation10_spill] sm:$0xff] }
  0xe4   : > { %1049 = vrot.lane.b32.xlu0 %v5311_v10, %s5204_s10  ;;  %1051 = vrot.lane.b32.xlu1 %v5314_v11, %s5204_s10 }
  0xe6   : > { %v679_v6 = vpop.permute.xlu0 %678  ;;  %v681_v7 = vpop.permute.xlu1 %680 }
  0xe7   : > { %759 = vst.msk [vmem:[#allocation3 + $0x80] sm:$0xff] %vm742_vm2, %v679_v6  ;;  %760 = vst.msk [vmem:[#allocation3 + $0x88] sm:$0xff] %vm742_vm2, %v681_v7  ;;  %v7671_v7 = vld [vmem:[#allocation11_spill] sm:$0xff] }
  0xe8   : > { %1053 = vrot.lane.b32.xlu0 %v5325_v14, %s5204_s10  ;;  %1055 = vrot.lane.b32.xlu1 %v5328_v15, %s5204_s10 }
  0xea   : > { %v683_v8 = vpop.permute.xlu0 %682  ;;  %v685_v9 = vpop.permute.xlu1 %684 }
  0xeb   : > { %761 = vst.msk [vmem:[#allocation3 + $0x90] sm:$0xff] %vm742_vm2, %v683_v8  ;;  %762 = vst.msk [vmem:[#allocation3 + $0x98] sm:$0xff] %vm742_vm2, %v685_v9  ;;  %v7672_v8 = vld [vmem:[#allocation12_spill] sm:$0xff] }
  0xec   : > { %1057 = vrot.lane.b32.xlu0 %v5339_v18, %s5204_s10  ;;  %1059 = vrot.lane.b32.xlu1 %v5354_v21, %s5204_s10 }
  0xee   : > { %v687_v10 = vpop.permute.xlu0 %686  ;;  %v689_v11 = vpop.permute.xlu1 %688 }
  0xef   : > { %763 = vst.msk [vmem:[#allocation3 + $0xa0] sm:$0xff] %vm742_vm2, %v687_v10  ;;  %764 = vst.msk [vmem:[#allocation3 + $0xa8] sm:$0xff] %vm742_vm2, %v689_v11  ;;  %v7673_v11 = vld [vmem:[#allocation13_spill] sm:$0xff] }
  0xf0   : > { %1061 = vrot.lane.b32.xlu0 %v5390_v29, %s5204_s10  ;;  %1063 = vrot.lane.b32.xlu1 %v5393_v30, %s5204_s10 }
  0xf2   : > { %v691_v14 = vpop.permute.xlu0 %690  ;;  %v693_v15 = vpop.permute.xlu1 %692 }
  0xf3   : > { %765 = vst.msk [vmem:[#allocation3 + $0xb0] sm:$0xff] %vm742_vm2, %v691_v14  ;;  %766 = vst.msk [vmem:[#allocation3 + $0xb8] sm:$0xff] %vm742_vm2, %v693_v15  ;;  %v7674_v14 = vld [vmem:[#allocation14_spill] sm:$0xff] }
  0xf4   : > { %1065 = vrot.lane.b32.xlu0 %v5465_v42, %s5204_s10  ;;  %1067 = vrot.lane.b32.xlu1 %v5468_v43, %s5204_s10 }
  0xf6   : > { %v695_v18 = vpop.permute.xlu0 %694  ;;  %v697_v21 = vpop.permute.xlu1 %696 }
  0xf7   : > { %767 = vst.msk [vmem:[#allocation3 + $0xc0] sm:$0xff] %vm742_vm2, %v695_v18  ;;  %768 = vst.msk [vmem:[#allocation3 + $0xc8] sm:$0xff] %vm742_vm2, %v697_v21  ;;  %v7675_v21 = vld [vmem:[#allocation15_spill] sm:$0xff] }
  0xf8   : > { %1069 = vrot.lane.b32.xlu0 %v5485_v46, %s5204_s10  ;;  %1071 = vrot.lane.b32.xlu1 %v5488_v47, %s5204_s10 }
  0xfa   : > { %v699_v29 = vpop.permute.xlu0 %698  ;;  %v701_v30 = vpop.permute.xlu1 %700 }
  0xfb   : > { %769 = vst.msk [vmem:[#allocation3 + $0xd0] sm:$0xff] %vm742_vm2, %v699_v29  ;;  %770 = vst.msk [vmem:[#allocation3 + $0xd8] sm:$0xff] %vm742_vm2, %v701_v30  ;;  %v7676_v29 = vld [vmem:[#allocation16_spill] sm:$0xff] }
  0xfc   : > { %1073 = vrot.lane.b32.xlu0 %v5505_v50, %s5204_s10  ;;  %1075 = vrot.lane.b32.xlu1 %v5508_v51, %s5204_s10 }
  0xfe   : > { %v703_v42 = vpop.permute.xlu0 %702  ;;  %v705_v43 = vpop.permute.xlu1 %704 }
  0xff   : > { %771 = vst.msk [vmem:[#allocation3 + $0xe0] sm:$0xff] %vm742_vm2, %v703_v42  ;;  %772 = vst.msk [vmem:[#allocation3 + $0xe8] sm:$0xff] %vm742_vm2, %v705_v43  ;;  %v7677_v43 = vld [vmem:[#allocation17_spill] sm:$0xff] }
 0x100   : > { %1077 = vrot.lane.b32.xlu0 %v5525_v54, %s5204_s10  ;;  %1079 = vrot.lane.b32.xlu1 %v5528_v55, %s5204_s10  ;;  %v7665_v54 = vld [vmem:[#allocation5_spill] sm:$0xff]  ;;  %v7666_v55 = vld [vmem:[#allocation6_spill] sm:$0xff] }
 0x102   : > { %v707_v46 = vpop.permute.xlu0 %706  ;;  %v709_v47 = vpop.permute.xlu1 %708 }
 0x103   : > { %773 = vst.msk [vmem:[#allocation3 + $0xf0] sm:$0xff] %vm742_vm2, %v707_v46  ;;  %774 = vst.msk [vmem:[#allocation3 + $0xf8] sm:$0xff] %vm742_vm2, %v709_v47  ;;  %v7678_v46 = vld [vmem:[#allocation18_spill] sm:$0xff] }
 0x104   : > { %1081 = vrot.lane.b32.xlu0 %v5545_v58, %s5204_s10  ;;  %1083 = vrot.lane.b32.xlu1 %v5548_v59, %s5204_s10  ;;  %v7667_v58 = vld [vmem:[#allocation7_spill] sm:$0xff]  ;;  %v7668_v59 = vld [vmem:[#allocation8_spill] sm:$0xff] }
 0x106   : > { %v841_v50 = vpop.permute.xlu0 %840  ;;  %v843_v51 = vpop.permute.xlu1 %842 }
 0x107   : > { %937 = vst.msk [vmem:[#allocation3] sm:$0xff] %vm936_vm3, %v841_v50  ;;  %938 = vst.msk [vmem:[#allocation3 + $0x8] sm:$0xff] %vm936_vm3, %v843_v51  ;;  %v7679_v51 = vld [vmem:[#allocation19_spill] sm:$0xff] }
 0x108   : > { %1085 = vrot.lane.b32.xlu0 %v7665_v54, %s5204_s10  ;;  %1087 = vrot.lane.b32.xlu1 %v7666_v55, %s5204_s10  ;;  %v7680_v54 = vld [vmem:[#allocation20_spill] sm:$0xff] }
 0x10a   : > { %v845_v57 = vpop.permute.xlu0 %844  ;;  %v847_v16 = vpop.permute.xlu1 %846 }
 0x10b   : > { %939 = vst.msk [vmem:[#allocation3 + $0x10] sm:$0xff] %vm936_vm3, %v845_v57  ;;  %940 = vst.msk [vmem:[#allocation3 + $0x18] sm:$0xff] %vm936_vm3, %v847_v16  ;;  %v7681_v16 = vld [vmem:[#allocation21_spill] sm:$0xff] }
 0x10c   : > { %1089 = vrot.lane.b32.xlu0 %v7667_v58, %s5204_s10  ;;  %1091 = vrot.lane.b32.xlu1 %v7668_v59, %s5204_s10  ;;  %v7682_v58 = vld [vmem:[#allocation22_spill] sm:$0xff] }
 0x10e   : > { %v849_v12 = vpop.permute.xlu0 %848  ;;  %v851_v13 = vpop.permute.xlu1 %850 }
 0x10f   : > { %941 = vst.msk [vmem:[#allocation3 + $0x20] sm:$0xff] %vm936_vm3, %v849_v12  ;;  %942 = vst.msk [vmem:[#allocation3 + $0x28] sm:$0xff] %vm936_vm3, %v851_v13  ;;  %v7683_v13 = vld [vmem:[#allocation23_spill] sm:$0xff] }
 0x110   : > { %1093 = vrot.lane.b32.xlu0 %v5921_v60, %s5204_s10  ;;  %1095 = vrot.lane.b32.xlu1 %v5924_v63, %s5204_s10 }
 0x112   : > { %v853_v17 = vpop.permute.xlu0 %852  ;;  %v855_v1 = vpop.permute.xlu1 %854 }
 0x113   : > { %943 = vst.msk [vmem:[#allocation3 + $0x30] sm:$0xff] %vm936_vm3, %v853_v17  ;;  %944 = vst.msk [vmem:[#allocation3 + $0x38] sm:$0xff] %vm936_vm3, %v855_v1  ;;  %v7684_v17 = vld [vmem:[#allocation24_spill] sm:$0xff] }
 0x114   : > { %1226 = vrot.lane.b32.xlu0 %v7669_v3, %s5205_s11  ;;  %1228 = vrot.lane.b32.xlu1 %v7670_v4, %s5205_s11  ;;  %v7685_v4 = vld [vmem:[#allocation25_spill] sm:$0xff] }
 0x116   : > { %v857_v5 = vpop.permute.xlu0 %856  ;;  %v859_v6 = vpop.permute.xlu1 %858 }
 0x117   : > { %945 = vst.msk [vmem:[#allocation3 + $0x40] sm:$0xff] %vm936_vm3, %v857_v5  ;;  %946 = vst.msk [vmem:[#allocation3 + $0x48] sm:$0xff] %vm936_vm3, %v859_v6  ;;  %v7686_v5 = vld [vmem:[#allocation26_spill] sm:$0xff] }
 0x118   : > { %1230 = vrot.lane.b32.xlu0 %v7671_v7, %s5205_s11  ;;  %1232 = vrot.lane.b32.xlu1 %v7672_v8, %s5205_s11  ;;  %v7687_v8 = vld [vmem:[#allocation27_spill] sm:$0xff] }
 0x11a   : > { %v861_v9 = vpop.permute.xlu0 %860  ;;  %v863_v10 = vpop.permute.xlu1 %862 }
 0x11b   : > { %947 = vst.msk [vmem:[#allocation3 + $0x50] sm:$0xff] %vm936_vm3, %v861_v9  ;;  %948 = vst.msk [vmem:[#allocation3 + $0x58] sm:$0xff] %vm936_vm3, %v863_v10  ;;  %v7688_v9 = vld [vmem:[#allocation28_spill] sm:$0xff] }
 0x11c   : > { %1234 = vrot.lane.b32.xlu0 %v7673_v11, %s5205_s11  ;;  %1236 = vrot.lane.b32.xlu1 %v7674_v14, %s5205_s11  ;;  %v7689_v14 = vld [vmem:[#allocation29_spill] sm:$0xff] }
 0x11e   : > { %v865_v15 = vpop.permute.xlu0 %864  ;;  %v867_v18 = vpop.permute.xlu1 %866 }
 0x11f   : > { %949 = vst.msk [vmem:[#allocation3 + $0x60] sm:$0xff] %vm936_vm3, %v865_v15  ;;  %950 = vst.msk [vmem:[#allocation3 + $0x68] sm:$0xff] %vm936_vm3, %v867_v18  ;;  %v7690_v15 = vld [vmem:[#allocation30_spill] sm:$0xff] }
 0x120   : > { %1238 = vrot.lane.b32.xlu0 %v7675_v21, %s5205_s11  ;;  %1240 = vrot.lane.b32.xlu1 %v7676_v29, %s5205_s11  ;;  %v7691_v29 = vld [vmem:[#allocation31_spill] sm:$0xff] }
 0x122   : > { %v869_v30 = vpop.permute.xlu0 %868  ;;  %v871_v42 = vpop.permute.xlu1 %870 }
 0x123   : > { %951 = vst.msk [vmem:[#allocation3 + $0x70] sm:$0xff] %vm936_vm3, %v869_v30  ;;  %952 = vst.msk [vmem:[#allocation3 + $0x78] sm:$0xff] %vm936_vm3, %v871_v42  ;;  %v7692_v30 = vld [vmem:[#allocation32_spill] sm:$0xff] }
 0x124   : > { %1242 = vrot.lane.b32.xlu0 %v7677_v43, %s5205_s11  ;;  %1244 = vrot.lane.b32.xlu1 %v7678_v46, %s5205_s11  ;;  %v7693_v46 = vld [vmem:[#allocation33_spill] sm:$0xff] }
 0x126   : > { %v873_v47 = vpop.permute.xlu0 %872  ;;  %v875_v50 = vpop.permute.xlu1 %874 }
 0x127   : > { %953 = vst.msk [vmem:[#allocation3 + $0x80] sm:$0xff] %vm936_vm3, %v873_v47  ;;  %954 = vst.msk [vmem:[#allocation3 + $0x88] sm:$0xff] %vm936_vm3, %v875_v50  ;;  %v7694_v47 = vld [vmem:[#allocation34_spill] sm:$0xff] }
 0x128   : > { %1246 = vrot.lane.b32.xlu0 %v7679_v51, %s5205_s11  ;;  %1248 = vrot.lane.b32.xlu1 %v7680_v54, %s5205_s11 }
 0x12a   : > { %v877_v55 = vpop.permute.xlu0 %876  ;;  %v879_v57 = vpop.permute.xlu1 %878 }
 0x12b   : > { %955 = vst.msk [vmem:[#allocation3 + $0x90] sm:$0xff] %vm936_vm3, %v877_v55  ;;  %956 = vst.msk [vmem:[#allocation3 + $0x98] sm:$0xff] %vm936_vm3, %v879_v57  ;;  %v6023_v57 = vld [vmem:[%s5264_s29 + $0x182] sm:$0xff] }
 0x12c   : > { %1250 = vrot.lane.b32.xlu0 %v7681_v16, %s5205_s11  ;;  %1252 = vrot.lane.b32.xlu1 %v7682_v58, %s5205_s11  ;;  %v6026_v16 = vld [vmem:[%s5264_s29 + $0x18a] sm:$0xff] }
 0x12e   : > { %v881_v59 = vpop.permute.xlu0 %880  ;;  %v883_v12 = vpop.permute.xlu1 %882 }
 0x12f   : > { %957 = vst.msk [vmem:[#allocation3 + $0xa0] sm:$0xff] %vm936_vm3, %v881_v59  ;;  %958 = vst.msk [vmem:[#allocation3 + $0xa8] sm:$0xff] %vm936_vm3, %v883_v12 }
 0x130   : > { %1254 = vrot.lane.b32.xlu0 %v7683_v13, %s5205_s11  ;;  %1256 = vrot.lane.b32.xlu1 %v7684_v17, %s5205_s11 }
 0x132   : > { %v885_v1 = vpop.permute.xlu0 %884  ;;  %v887_v3 = vpop.permute.xlu1 %886 }
 0x133   : > { %959 = vst.msk [vmem:[#allocation3 + $0xb0] sm:$0xff] %vm936_vm3, %v885_v1  ;;  %960 = vst.msk [vmem:[#allocation3 + $0xb8] sm:$0xff] %vm936_vm3, %v887_v3  ;;  %v1969_v1 = vld [vmem:[%s7596_s1 + $0x10] sm:$0xff] }
 0x134   : > { %1258 = vrot.lane.b32.xlu0 %v7685_v4, %s5205_s11  ;;  %1260 = vrot.lane.b32.xlu1 %v7686_v5, %s5205_s11  ;;  %v1971_v5 = vld [vmem:[%s7596_s1 + $0x20] sm:$0xf] }
 0x136   : > { %v889_v6 = vpop.permute.xlu0 %888  ;;  %v891_v7 = vpop.permute.xlu1 %890 }
 0x137   : > { %961 = vst.msk [vmem:[#allocation3 + $0xc0] sm:$0xff] %vm936_vm3, %v889_v6  ;;  %962 = vst.msk [vmem:[#allocation3 + $0xc8] sm:$0xff] %vm936_vm3, %v891_v7  ;;  %v4801_v6 = vld [vmem:[%s5264_s29 + $0x39] sm:$0xff] }
 0x138   : > { %1262 = vrot.lane.b32.xlu0 %v7687_v8, %s5205_s11  ;;  %1264 = vrot.lane.b32.xlu1 %v7688_v9, %s5205_s11  ;;  %v4833_v9 = vld [vmem:[%s5264_s29 + $0x3a] sm:$0xff] }
 0x13a   : > { %v893_v10 = vpop.permute.xlu0 %892  ;;  %v895_v11 = vpop.permute.xlu1 %894 }
 0x13b   : > { %963 = vst.msk [vmem:[#allocation3 + $0xd0] sm:$0xff] %vm936_vm3, %v893_v10  ;;  %964 = vst.msk [vmem:[#allocation3 + $0xd8] sm:$0xff] %vm936_vm3, %v895_v11 }
 0x13c   : > { %1266 = vrot.lane.b32.xlu0 %v7689_v14, %s5205_s11  ;;  %1268 = vrot.lane.b32.xlu1 %v7690_v15, %s5205_s11  ;;  %v4802_v14 = vld [vmem:[%s5264_s29 + $0x49] sm:$0xff]  ;;  %v4803_v15 = vld [vmem:[%s5264_s29 + $0x51] sm:$0xff] }
 0x13e   : > { %v897_v18 = vpop.permute.xlu0 %896  ;;  %v899_v21 = vpop.permute.xlu1 %898 }
 0x13f   : > { %965 = vst.msk [vmem:[#allocation3 + $0xe0] sm:$0xff] %vm936_vm3, %v897_v18  ;;  %966 = vst.msk [vmem:[#allocation3 + $0xe8] sm:$0xff] %vm936_vm3, %v899_v21 }
 0x140   : > { %1270 = vrot.lane.b32.xlu0 %v7691_v29, %s5205_s11  ;;  %1272 = vrot.lane.b32.xlu1 %v7692_v30, %s5205_s11  ;;  %v4834_v29 = vld [vmem:[%s5264_s29 + $0x4a] sm:$0xff]  ;;  %v4835_v30 = vld [vmem:[%s5264_s29 + $0x52] sm:$0xff] }
 0x142   : > { %v901_v42 = vpop.permute.xlu0 %900  ;;  %v903_v43 = vpop.permute.xlu1 %902 }
 0x143   : > { %967 = vst.msk [vmem:[#allocation3 + $0xf0] sm:$0xff] %vm936_vm3, %v901_v42  ;;  %968 = vst.msk [vmem:[#allocation3 + $0xf8] sm:$0xff] %vm936_vm3, %v903_v43 }
 0x144   : > { %1274 = vrot.lane.b32.xlu0 %v7693_v46, %s5205_s11  ;;  %1276 = vrot.lane.b32.xlu1 %v7694_v47, %s5205_s11  ;;  %v4804_v46 = vld [vmem:[%s5264_s29 + $0x61] sm:$0xff]  ;;  %v4805_v47 = vld [vmem:[%s5264_s29 + $0x69] sm:$0xff] }
 0x146   : > { %v1034_v50 = vpop.permute.xlu0 %1033  ;;  %v1036_v51 = vpop.permute.xlu1 %1035 }
 0x147   : > { %1130 = vst.msk [vmem:[#allocation3] sm:$0xff] %vm1129_vm4, %v1034_v50  ;;  %1131 = vst.msk [vmem:[#allocation3 + $0x8] sm:$0xff] %vm1129_vm4, %v1036_v51 }
 0x148   : > { %1278 = vrot.lane.b32.xlu0 %v5711_v0, %s5205_s11  ;;  %1280 = vrot.lane.b32.xlu1 %v5714_v2, %s5205_s11 }
 0x14a   : > { %v1038_v54 = vpop.permute.xlu0 %1037  ;;  %v1040_v55 = vpop.permute.xlu1 %1039 }
 0x14b   : > { %1132 = vst.msk [vmem:[#allocation3 + $0x10] sm:$0xff] %vm1129_vm4, %v1038_v54  ;;  %1133 = vst.msk [vmem:[#allocation3 + $0x18] sm:$0xff] %vm1129_vm4, %v1040_v55  ;;  %v4836_v54 = vld [vmem:[%s5264_s29 + $0x62] sm:$0xff]  ;;  %v4837_v55 = vld [vmem:[%s5264_s29 + $0x6a] sm:$0xff] }
 0x14c   : > { %1282 = vrot.lane.b32.xlu0 %v5723_v61, %s5205_s11  ;;  %1284 = vrot.lane.b32.xlu1 %v5726_v62, %s5205_s11 }
 0x14e   : > { %v1042_v0 = vpop.permute.xlu0 %1041  ;;  %v1044_v58 = vpop.permute.xlu1 %1043 }
 0x14f   : > { %1134 = vst.msk [vmem:[#allocation3 + $0x20] sm:$0xff] %vm1129_vm4, %v1042_v0  ;;  %1135 = vst.msk [vmem:[#allocation3 + $0x28] sm:$0xff] %vm1129_vm4, %v1044_v58 }
 0x150   : > { %1286 = vrot.lane.b32.xlu0 %v6023_v57, %s5205_s11  ;;  %1288 = vrot.lane.b32.xlu1 %v6026_v16, %s5205_s11 }
 0x152   : > { %v1046_v2 = vpop.permute.xlu0 %1045  ;;  %v1048_v61 = vpop.permute.xlu1 %1047 }
 0x153   : > { %1136 = vst.msk [vmem:[#allocation3 + $0x30] sm:$0xff] %vm1129_vm4, %v1046_v2  ;;  %1137 = vst.msk [vmem:[#allocation3 + $0x38] sm:$0xff] %vm1129_vm4, %v1048_v61  ;;  %v4806_v2 = vld [vmem:[%s5264_s29 + $0x79] sm:$0xff]  ;;  %v4807_v61 = vld [vmem:[%s5264_s29 + $0x81] sm:$0xff] }
 0x154   : > { %1420 = vrot.lane.b32.xlu0 %v5344_v19, %s5206_s12  ;;  %1422 = vrot.lane.b32.xlu1 %v5347_v20, %s5206_s12 }
 0x156   : > { %v1050_v62 = vpop.permute.xlu0 %1049  ;;  %v1052_v59 = vpop.permute.xlu1 %1051 }
 0x157   : > { %1138 = vst.msk [vmem:[#allocation3 + $0x40] sm:$0xff] %vm1129_vm4, %v1050_v62  ;;  %1139 = vst.msk [vmem:[#allocation3 + $0x48] sm:$0xff] %vm1129_vm4, %v1052_v59 }
 0x158   : > { %1424 = vrot.lane.b32.xlu0 %v5361_v22, %s5206_s12  ;;  %1426 = vrot.lane.b32.xlu1 %v5366_v23, %s5206_s12 }
 0x15a   : > { %v1054_v12 = vpop.permute.xlu0 %1053  ;;  %v1056_v13 = vpop.permute.xlu1 %1055 }
 0x15b   : > { %1140 = vst.msk [vmem:[#allocation3 + $0x50] sm:$0xff] %vm1129_vm4, %v1054_v12  ;;  %1141 = vst.msk [vmem:[#allocation3 + $0x58] sm:$0xff] %vm1129_vm4, %v1056_v13  ;;  %v4838_v12 = vld [vmem:[%s5264_s29 + $0x7a] sm:$0xff]  ;;  %v4839_v13 = vld [vmem:[%s5264_s29 + $0x82] sm:$0xff] }
 0x15c   : > { %1428 = vrot.lane.b32.xlu0 %v5369_v24, %s5206_s12  ;;  %1430 = vrot.lane.b32.xlu1 %v5372_v25, %s5206_s12 }
 0x15e   : > { %v1058_v19 = vpop.permute.xlu0 %1057  ;;  %v1060_v20 = vpop.permute.xlu1 %1059 }
 0x15f   : > { %1142 = vst.msk [vmem:[#allocation3 + $0x60] sm:$0xff] %vm1129_vm4, %v1058_v19  ;;  %1143 = vst.msk [vmem:[#allocation3 + $0x68] sm:$0xff] %vm1129_vm4, %v1060_v20 }
 0x160   : > { %1432 = vrot.lane.b32.xlu0 %v5381_v26, %s5206_s12  ;;  %1434 = vrot.lane.b32.xlu1 %v5384_v27, %s5206_s12 }
 0x162   : > { %v1062_v22 = vpop.permute.xlu0 %1061  ;;  %v1064_v23 = vpop.permute.xlu1 %1063 }
 0x163   : > { %1144 = vst.msk [vmem:[#allocation3 + $0x70] sm:$0xff] %vm1129_vm4, %v1062_v22  ;;  %1145 = vst.msk [vmem:[#allocation3 + $0x78] sm:$0xff] %vm1129_vm4, %v1064_v23  ;;  %v4808_v22 = vld [vmem:[%s5264_s29 + $0x91] sm:$0xff]  ;;  %v4809_v23 = vld [vmem:[%s5264_s29 + $0x99] sm:$0xff] }
 0x164   : > { %1436 = vrot.lane.b32.xlu0 %v5387_v28, %s5206_s12  ;;  %1438 = vrot.lane.b32.xlu1 %v5402_v31, %s5206_s12 }
 0x166   : > { %v1066_v24 = vpop.permute.xlu0 %1065  ;;  %v1068_v25 = vpop.permute.xlu1 %1067 }
 0x167   : > { %1146 = vst.msk [vmem:[#allocation3 + $0x80] sm:$0xff] %vm1129_vm4, %v1066_v24  ;;  %1147 = vst.msk [vmem:[#allocation3 + $0x88] sm:$0xff] %vm1129_vm4, %v1068_v25 }
 0x168   : > { %1440 = vrot.lane.b32.xlu0 %v5405_v32, %s5206_s12  ;;  %1442 = vrot.lane.b32.xlu1 %v5408_v33, %s5206_s12 }
 0x16a   : > { %v1070_v26 = vpop.permute.xlu0 %1069  ;;  %v1072_v27 = vpop.permute.xlu1 %1071 }
 0x16b   : > { %1148 = vst.msk [vmem:[#allocation3 + $0x90] sm:$0xff] %vm1129_vm4, %v1070_v26  ;;  %1149 = vst.msk [vmem:[#allocation3 + $0x98] sm:$0xff] %vm1129_vm4, %v1072_v27  ;;  %v4840_v26 = vld [vmem:[%s5264_s29 + $0x92] sm:$0xff]  ;;  %v4841_v27 = vld [vmem:[%s5264_s29 + $0x9a] sm:$0xff] }
 0x16c   : > { %1444 = vrot.lane.b32.xlu0 %v5421_v34, %s5206_s12  ;;  %1446 = vrot.lane.b32.xlu1 %v5424_v35, %s5206_s12 }
 0x16e   : > { %v1074_v28 = vpop.permute.xlu0 %1073  ;;  %v1076_v31 = vpop.permute.xlu1 %1075 }
 0x16f   : > { %1150 = vst.msk [vmem:[#allocation3 + $0xa0] sm:$0xff] %vm1129_vm4, %v1074_v28  ;;  %1151 = vst.msk [vmem:[#allocation3 + $0xa8] sm:$0xff] %vm1129_vm4, %v1076_v31 }
 0x170   : > { %1448 = vrot.lane.b32.xlu0 %v5431_v36, %s5206_s12  ;;  %1450 = vrot.lane.b32.xlu1 %v5434_v37, %s5206_s12 }
 0x172   : > { %v1078_v32 = vpop.permute.xlu0 %1077  ;;  %v1080_v33 = vpop.permute.xlu1 %1079 }
 0x173   : > { %1152 = vst.msk [vmem:[#allocation3 + $0xb0] sm:$0xff] %vm1129_vm4, %v1078_v32  ;;  %1153 = vst.msk [vmem:[#allocation3 + $0xb8] sm:$0xff] %vm1129_vm4, %v1080_v33  ;;  %v4810_v32 = vld [vmem:[%s5264_s29 + $0xa9] sm:$0xff]  ;;  %v4811_v33 = vld [vmem:[%s5264_s29 + $0xb1] sm:$0xff] }
 0x174   : > { %1452 = vrot.lane.b32.xlu0 %v5437_v38, %s5206_s12  ;;  %1454 = vrot.lane.b32.xlu1 %v5446_v39, %s5206_s12 }
 0x176   : > { %v1082_v34 = vpop.permute.xlu0 %1081  ;;  %v1084_v35 = vpop.permute.xlu1 %1083 }
 0x177   : > { %1154 = vst.msk [vmem:[#allocation3 + $0xc0] sm:$0xff] %vm1129_vm4, %v1082_v34  ;;  %1155 = vst.msk [vmem:[#allocation3 + $0xc8] sm:$0xff] %vm1129_vm4, %v1084_v35 }
 0x178   : > { %1456 = vrot.lane.b32.xlu0 %v5449_v40, %s5206_s12  ;;  %1458 = vrot.lane.b32.xlu1 %v5452_v41, %s5206_s12  ;;  %v1967_v40 = vld [vmem:[%s7596_s1] sm:$0xff]  ;;  %v1968_v41 = vld [vmem:[%s7596_s1 + $0x8] sm:$0xff] }
 0x17a   : > { %v1086_v36 = vpop.permute.xlu0 %1085  ;;  %v1088_v37 = vpop.permute.xlu1 %1087 }
 0x17b   : > { %1156 = vst.msk [vmem:[#allocation3 + $0xd0] sm:$0xff] %vm1129_vm4, %v1086_v36  ;;  %1157 = vst.msk [vmem:[#allocation3 + $0xd8] sm:$0xff] %vm1129_vm4, %v1088_v37  ;;  %v4842_v36 = vld [vmem:[%s5264_s29 + $0xaa] sm:$0xff]  ;;  %v4843_v37 = vld [vmem:[%s5264_s29 + $0xb2] sm:$0xff] }
 0x17c   : > { %1460 = vrot.lane.b32.xlu0 %v5471_v44, %s5206_s12  ;;  %1462 = vrot.lane.b32.xlu1 %v5476_v45, %s5206_s12  ;;  %v5159_v44 = vpack.c.bf16 %v1968_v41, %v1967_v40  ;;  %v4812_v40 = vld [vmem:[%s5264_s29 + $0xc1] sm:$0xff]  ;;  %v4813_v41 = vld [vmem:[%s5264_s29 + $0xc9] sm:$0xff] }
 0x17e   : > { %v1090_v38 = vpop.permute.xlu0 %1089  ;;  %v1092_v39 = vpop.permute.xlu1 %1091  ;;  %5160 = vmatprep.subr.bf16.mxu0 %v5159_v44 }
 0x17f   : > { %1158 = vst.msk [vmem:[#allocation3 + $0xe0] sm:$0xff] %vm1129_vm4, %v1090_v38  ;;  %1159 = vst.msk [vmem:[#allocation3 + $0xe8] sm:$0xff] %vm1129_vm4, %v1092_v39  ;;  %5162 = vmatpush3.bf16.msra.mxu0 %v5159_v44 }
 0x180   : > { %1464 = vrot.lane.b32.xlu0 %v5491_v48, %s5206_s12  ;;  %1466 = vrot.lane.b32.xlu1 %v5496_v49, %s5206_s12  ;;  %v1970_v48 = vld [vmem:[%s7596_s1 + $0x18] sm:$0xff] }
 0x181   : > { %v5163_v49 = vpack.c.bf16 %v1970_v48, %v1969_v1  ;;  %v4845_v1 = vld [vmem:[%s5264_s29 + $0xca] sm:$0xff] }
 0x182   : > { %v1094_v45 = vpop.permute.xlu0 %1093  ;;  %v1096_v17 = vpop.permute.xlu1 %1095 }
 0x183   : > { %1160 = vst.msk [vmem:[#allocation3 + $0xf0] sm:$0xff] %vm1129_vm4, %v1094_v45  ;;  %1161 = vst.msk [vmem:[#allocation3 + $0xf8] sm:$0xff] %vm1129_vm4, %v1096_v17  ;;  %5164 = vmatprep.subr.bf16.mxu0 %v5163_v49  ;;  %v4844_v17 = vld [vmem:[%s5264_s29 + $0xc2] sm:$0xff] }
 0x184   : > { %1468 = vrot.lane.b32.xlu0 %v5511_v52, %s5206_s12  ;;  %1470 = vrot.lane.b32.xlu1 %v5516_v53, %s5206_s12  ;;  %v7695_v52 = vld [vmem:[#allocation4_spill] sm:$0xff] }
 0x185   : > { %5166 = vmatpush3.bf16.msra.mxu0 %v5163_v49  ;;  %v4800_v53 = vld [vmem:[%s5264_s29 + $0x31] sm:$0xff] }
 0x186   : > { %v1227_v3 = vpop.permute.xlu0 %1226  ;;  %v1229_v4 = vpop.permute.xlu1 %1228  ;;  %5051 = vmatprep.subr.msk.mxu0 %vm2069_vm6, %v1971_v5 }
 0x187   : > { %1323 = vst.msk [vmem:[#allocation3] sm:$0xff] %vm1322_vm5, %v1227_v3  ;;  %1324 = vst.msk [vmem:[#allocation3 + $0x8] sm:$0xff] %vm1322_vm5, %v1229_v4  ;;  %v4814_v3 = vld [vmem:[%s5264_s29 + $0xd9] sm:$0xff]  ;;  %v4815_v4 = vld [vmem:[%s5264_s29 + $0xe1] sm:$0xff] }
 0x188   : > { %1472 = vrot.lane.b32.xlu0 %v5531_v56, %s5206_s12  ;;  %1474 = vrot.lane.b32.xlu1 %v7695_v52, %s5206_s12  ;;  %v4832_v56 = vld [vmem:[%s5264_s29 + $0x32] sm:$0xff] }
 0x189   : > { %5052 = vmatpush3.msk.msra.mxu0 %vm2069_vm6, %v1971_v5 }
 0x18a   : > { %v1231_v7 = vpop.permute.xlu0 %1230  ;;  %v1233_v8 = vpop.permute.xlu1 %1232 }
 0x18b   : > { %1325 = vst.msk [vmem:[#allocation3 + $0x10] sm:$0xff] %vm1322_vm5, %v1231_v7  ;;  %1326 = vst.msk [vmem:[#allocation3 + $0x18] sm:$0xff] %vm1322_vm5, %v1233_v8 }
 0x18c   : > { %1613 = vrot.lane.b32.xlu0 %v4800_v53, %s5207_s23  ;;  %1615 = vrot.lane.b32.xlu1 %v4801_v6, %s5207_s23  ;;  %v4846_v53 = vld [vmem:[%s5264_s29 + $0xda] sm:$0xff]  ;;  %v4847_v6 = vld [vmem:[%s5264_s29 + $0xe2] sm:$0xff] }
 0x18e   : > { %v1235_v10 = vpop.permute.xlu0 %1234  ;;  %v1237_v11 = vpop.permute.xlu1 %1236 }
 0x18f   : > { %1327 = vst.msk [vmem:[#allocation3 + $0x20] sm:$0xff] %vm1322_vm5, %v1235_v10  ;;  %1328 = vst.msk [vmem:[#allocation3 + $0x28] sm:$0xff] %vm1322_vm5, %v1237_v11 }
 0x190   : > { %1806 = vrot.lane.b32.xlu0 %v4832_v56, %s5208_s26  ;;  %1808 = vrot.lane.b32.xlu1 %v4833_v9, %s5208_s26  ;;  %v4816_v56 = vld [vmem:[%s5264_s29 + $0xf1] sm:$0xff]  ;;  %v4817_v9 = vld [vmem:[%s5264_s29 + $0xf9] sm:$0xff] }
 0x192   : > { %v1239_v18 = vpop.permute.xlu0 %1238  ;;  %v1241_v21 = vpop.permute.xlu1 %1240 }
 0x193   : > { %1329 = vst.msk [vmem:[#allocation3 + $0x30] sm:$0xff] %vm1322_vm5, %v1239_v18  ;;  %1330 = vst.msk [vmem:[#allocation3 + $0x38] sm:$0xff] %vm1322_vm5, %v1241_v21 }
 0x194   : > { %1617 = vrot.lane.b32.xlu0 %v4802_v14, %s5207_s23  ;;  %1619 = vrot.lane.b32.xlu1 %v4803_v15, %s5207_s23  ;;  %v4848_v14 = vld [vmem:[%s5264_s29 + $0xf2] sm:$0xff]  ;;  %v4849_v15 = vld [vmem:[%s5264_s29 + $0xfa] sm:$0xff] }
 0x196   : > { %v1243_v42 = vpop.permute.xlu0 %1242  ;;  %v1245_v43 = vpop.permute.xlu1 %1244 }
 0x197   : > { %1331 = vst.msk [vmem:[#allocation3 + $0x40] sm:$0xff] %vm1322_vm5, %v1243_v42  ;;  %1332 = vst.msk [vmem:[#allocation3 + $0x48] sm:$0xff] %vm1322_vm5, %v1245_v43 }
 0x198   : > { %1810 = vrot.lane.b32.xlu0 %v4834_v29, %s5208_s26  ;;  %1812 = vrot.lane.b32.xlu1 %v4835_v30, %s5208_s26  ;;  %v4818_v29 = vld [vmem:[%s5264_s29 + $0x109] sm:$0xff]  ;;  %v4819_v30 = vld [vmem:[%s5264_s29 + $0x111] sm:$0xff] }
 0x19a   : > { %v1247_v50 = vpop.permute.xlu0 %1246  ;;  %v1249_v51 = vpop.permute.xlu1 %1248 }
 0x19b   : > { %1333 = vst.msk [vmem:[#allocation3 + $0x50] sm:$0xff] %vm1322_vm5, %v1247_v50  ;;  %1334 = vst.msk [vmem:[#allocation3 + $0x58] sm:$0xff] %vm1322_vm5, %v1249_v51 }
 0x19c   : > { %1621 = vrot.lane.b32.xlu0 %v4804_v46, %s5207_s23  ;;  %1623 = vrot.lane.b32.xlu1 %v4805_v47, %s5207_s23  ;;  %v4850_v46 = vld [vmem:[%s5264_s29 + $0x10a] sm:$0xff]  ;;  %v4851_v47 = vld [vmem:[%s5264_s29 + $0x112] sm:$0xff] }
 0x19e   : > { %v1251_v0 = vpop.permute.xlu0 %1250  ;;  %v1253_v58 = vpop.permute.xlu1 %1252 }
 0x19f   : > { %1335 = vst.msk [vmem:[#allocation3 + $0x60] sm:$0xff] %vm1322_vm5, %v1251_v0  ;;  %1336 = vst.msk [vmem:[#allocation3 + $0x68] sm:$0xff] %vm1322_vm5, %v1253_v58 }
 0x1a0   : > { %1814 = vrot.lane.b32.xlu0 %v4836_v54, %s5208_s26  ;;  %1816 = vrot.lane.b32.xlu1 %v4837_v55, %s5208_s26  ;;  %v4820_v54 = vld [vmem:[%s5264_s29 + $0x121] sm:$0xff]  ;;  %v4821_v55 = vld [vmem:[%s5264_s29 + $0x129] sm:$0xff] }
 0x1a2   : > { %v1255_v62 = vpop.permute.xlu0 %1254  ;;  %v1257_v59 = vpop.permute.xlu1 %1256 }
 0x1a3   : > { %1337 = vst.msk [vmem:[#allocation3 + $0x70] sm:$0xff] %vm1322_vm5, %v1255_v62  ;;  %1338 = vst.msk [vmem:[#allocation3 + $0x78] sm:$0xff] %vm1322_vm5, %v1257_v59 }
 0x1a4   : > { %1625 = vrot.lane.b32.xlu0 %v4806_v2, %s5207_s23  ;;  %1627 = vrot.lane.b32.xlu1 %v4807_v61, %s5207_s23  ;;  %v4852_v2 = vld [vmem:[%s5264_s29 + $0x122] sm:$0xff]  ;;  %v4853_v61 = vld [vmem:[%s5264_s29 + $0x12a] sm:$0xff] }
 0x1a6   : > { %v1259_v19 = vpop.permute.xlu0 %1258  ;;  %v1261_v20 = vpop.permute.xlu1 %1260 }
 0x1a7   : > { %1339 = vst.msk [vmem:[#allocation3 + $0x80] sm:$0xff] %vm1322_vm5, %v1259_v19  ;;  %1340 = vst.msk [vmem:[#allocation3 + $0x88] sm:$0xff] %vm1322_vm5, %v1261_v20 }
 0x1a8   : > { %1818 = vrot.lane.b32.xlu0 %v4838_v12, %s5208_s26  ;;  %1820 = vrot.lane.b32.xlu1 %v4839_v13, %s5208_s26  ;;  %v4822_v12 = vld [vmem:[%s5264_s29 + $0x139] sm:$0xff]  ;;  %v4823_v13 = vld [vmem:[%s5264_s29 + $0x141] sm:$0xff] }
 0x1aa   : > { %v1263_v24 = vpop.permute.xlu0 %1262  ;;  %v1265_v25 = vpop.permute.xlu1 %1264 }
 0x1ab   : > { %1341 = vst.msk [vmem:[#allocation3 + $0x90] sm:$0xff] %vm1322_vm5, %v1263_v24  ;;  %1342 = vst.msk [vmem:[#allocation3 + $0x98] sm:$0xff] %vm1322_vm5, %v1265_v25 }
 0x1ac   : > { %1629 = vrot.lane.b32.xlu0 %v4808_v22, %s5207_s23  ;;  %1631 = vrot.lane.b32.xlu1 %v4809_v23, %s5207_s23  ;;  %v4854_v22 = vld [vmem:[%s5264_s29 + $0x13a] sm:$0xff]  ;;  %v4855_v23 = vld [vmem:[%s5264_s29 + $0x142] sm:$0xff] }
 0x1ae   : > { %v1267_v28 = vpop.permute.xlu0 %1266  ;;  %v1269_v31 = vpop.permute.xlu1 %1268 }
 0x1af   : > { %1343 = vst.msk [vmem:[#allocation3 + $0xa0] sm:$0xff] %vm1322_vm5, %v1267_v28  ;;  %1344 = vst.msk [vmem:[#allocation3 + $0xa8] sm:$0xff] %vm1322_vm5, %v1269_v31 }
 0x1b0   : > { %1822 = vrot.lane.b32.xlu0 %v4840_v26, %s5208_s26  ;;  %1824 = vrot.lane.b32.xlu1 %v4841_v27, %s5208_s26  ;;  %v4824_v26 = vld [vmem:[%s5264_s29 + $0x151] sm:$0xff]  ;;  %v4825_v27 = vld [vmem:[%s5264_s29 + $0x159] sm:$0xff] }
 0x1b2   : > { %v1271_v34 = vpop.permute.xlu0 %1270  ;;  %v1273_v35 = vpop.permute.xlu1 %1272 }
 0x1b3   : > { %1345 = vst.msk [vmem:[#allocation3 + $0xb0] sm:$0xff] %vm1322_vm5, %v1271_v34  ;;  %1346 = vst.msk [vmem:[#allocation3 + $0xb8] sm:$0xff] %vm1322_vm5, %v1273_v35 }
 0x1b4   : > { %1633 = vrot.lane.b32.xlu0 %v4810_v32, %s5207_s23  ;;  %1635 = vrot.lane.b32.xlu1 %v4811_v33, %s5207_s23  ;;  %v4856_v32 = vld [vmem:[%s5264_s29 + $0x152] sm:$0xff]  ;;  %v4857_v33 = vld [vmem:[%s5264_s29 + $0x15a] sm:$0xff] }
 0x1b6   : > { %v1275_v38 = vpop.permute.xlu0 %1274  ;;  %v1277_v39 = vpop.permute.xlu1 %1276 }
 0x1b7   : > { %1347 = vst.msk [vmem:[#allocation3 + $0xc0] sm:$0xff] %vm1322_vm5, %v1275_v38  ;;  %1348 = vst.msk [vmem:[#allocation3 + $0xc8] sm:$0xff] %vm1322_vm5, %v1277_v39 }
 0x1b8   : > { %1826 = vrot.lane.b32.xlu0 %v4842_v36, %s5208_s26  ;;  %1828 = vrot.lane.b32.xlu1 %v4843_v37, %s5208_s26  ;;  %v4826_v36 = vld [vmem:[%s5264_s29 + $0x169] sm:$0xff]  ;;  %v4827_v37 = vld [vmem:[%s5264_s29 + $0x171] sm:$0xff] }
 0x1ba   : > { %v1279_v44 = vpop.permute.xlu0 %1278  ;;  %v1281_v45 = vpop.permute.xlu1 %1280 }
 0x1bb   : > { %1349 = vst.msk [vmem:[#allocation3 + $0xd0] sm:$0xff] %vm1322_vm5, %v1279_v44  ;;  %1350 = vst.msk [vmem:[#allocation3 + $0xd8] sm:$0xff] %vm1322_vm5, %v1281_v45 }
 0x1bc   : > { %1637 = vrot.lane.b32.xlu0 %v4812_v40, %s5207_s23  ;;  %1639 = vrot.lane.b32.xlu1 %v4813_v41, %s5207_s23  ;;  %v4858_v40 = vld [vmem:[%s5264_s29 + $0x16a] sm:$0xff]  ;;  %v4859_v41 = vld [vmem:[%s5264_s29 + $0x172] sm:$0xff] }
 0x1be   : > { %v1283_v48 = vpop.permute.xlu0 %1282  ;;  %v1285_v49 = vpop.permute.xlu1 %1284 }
 0x1bf   : > { %1351 = vst.msk [vmem:[#allocation3 + $0xe0] sm:$0xff] %vm1322_vm5, %v1283_v48  ;;  %1352 = vst.msk [vmem:[#allocation3 + $0xe8] sm:$0xff] %vm1322_vm5, %v1285_v49 }
 0x1c0   : > { %1830 = vrot.lane.b32.xlu0 %v4844_v17, %s5208_s26  ;;  %1832 = vrot.lane.b32.xlu1 %v4845_v1, %s5208_s26  ;;  %v4796_v17 = vld [vmem:[%s5264_s29 + $0x180] sm:$0xff]  ;;  %v4797_v1 = vld [vmem:[%s5264_s29 + $0x188] sm:$0xff] }
 0x1c2   : > { %v1287_v5 = vpop.permute.xlu0 %1286  ;;  %v1289_v52 = vpop.permute.xlu1 %1288 }
 0x1c3   : > { %1353 = vst.msk [vmem:[#allocation3 + $0xf0] sm:$0xff] %vm1322_vm5, %v1287_v5  ;;  %1354 = vst.msk [vmem:[#allocation3 + $0xf8] sm:$0xff] %vm1322_vm5, %v1289_v52 }
 0x1c4   : > { %1641 = vrot.lane.b32.xlu0 %v4814_v3, %s5207_s23  ;;  %1643 = vrot.lane.b32.xlu1 %v4815_v4, %s5207_s23 }
 0x1c6   : > { %v1421_v7 = vpop.permute.xlu0 %1420  ;;  %v1423_v8 = vpop.permute.xlu1 %1422 }
 0x1c7   : > { %1517 = vst.msk [vmem:[#allocation3] sm:$0xff] %vm1516_vm7, %v1421_v7  ;;  %1518 = vst.msk [vmem:[#allocation3 + $0x8] sm:$0xff] %vm1516_vm7, %v1423_v8 }
 0x1c8   : > { %1834 = vrot.lane.b32.xlu0 %v4846_v53, %s5208_s26  ;;  %1836 = vrot.lane.b32.xlu1 %v4847_v6, %s5208_s26  ;;  %v4799_v53 = vld [vmem:[%s5264_s29 + $0x1a0] sm:$0xff]  ;;  %v4798_v6 = vld [vmem:[%s5264_s29 + $0x198] sm:$0xff] }
 0x1ca   : > { %v1425_v10 = vpop.permute.xlu0 %1424  ;;  %v1427_v11 = vpop.permute.xlu1 %1426 }
 0x1cb   : > { %1519 = vst.msk [vmem:[#allocation3 + $0x10] sm:$0xff] %vm1516_vm7, %v1425_v10  ;;  %1520 = vst.msk [vmem:[#allocation3 + $0x18] sm:$0xff] %vm1516_vm7, %v1427_v11 }
 0x1cc   : > { %1645 = vrot.lane.b32.xlu0 %v4816_v56, %s5207_s23  ;;  %1647 = vrot.lane.b32.xlu1 %v4817_v9, %s5207_s23 }
 0x1ce   : > { %v1429_v18 = vpop.permute.xlu0 %1428  ;;  %v1431_v21 = vpop.permute.xlu1 %1430 }
 0x1cf   : > { %1521 = vst.msk [vmem:[#allocation3 + $0x20] sm:$0xff] %vm1516_vm7, %v1429_v18  ;;  %1522 = vst.msk [vmem:[#allocation3 + $0x28] sm:$0xff] %vm1516_vm7, %v1431_v21 }
 0x1d0   : > { %1838 = vrot.lane.b32.xlu0 %v4848_v14, %s5208_s26  ;;  %1840 = vrot.lane.b32.xlu1 %v4849_v15, %s5208_s26 }
 0x1d2   : > { %v1433_v42 = vpop.permute.xlu0 %1432  ;;  %v1435_v43 = vpop.permute.xlu1 %1434 }
 0x1d3   : > { %1523 = vst.msk [vmem:[#allocation3 + $0x30] sm:$0xff] %vm1516_vm7, %v1433_v42  ;;  %1524 = vst.msk [vmem:[#allocation3 + $0x38] sm:$0xff] %vm1516_vm7, %v1435_v43 }
 0x1d4   : > { %1649 = vrot.lane.b32.xlu0 %v4818_v29, %s5207_s23  ;;  %1651 = vrot.lane.b32.xlu1 %v4819_v30, %s5207_s23 }
 0x1d6   : > { %v1437_v50 = vpop.permute.xlu0 %1436  ;;  %v1439_v51 = vpop.permute.xlu1 %1438 }
 0x1d7   : > { %1525 = vst.msk [vmem:[#allocation3 + $0x40] sm:$0xff] %vm1516_vm7, %v1437_v50  ;;  %1526 = vst.msk [vmem:[#allocation3 + $0x48] sm:$0xff] %vm1516_vm7, %v1439_v51 }
 0x1d8   : > { %1842 = vrot.lane.b32.xlu0 %v4850_v46, %s5208_s26  ;;  %1844 = vrot.lane.b32.xlu1 %v4851_v47, %s5208_s26 }
 0x1da   : > { %v1441_v0 = vpop.permute.xlu0 %1440  ;;  %v1443_v58 = vpop.permute.xlu1 %1442 }
 0x1db   : > { %1527 = vst.msk [vmem:[#allocation3 + $0x50] sm:$0xff] %vm1516_vm7, %v1441_v0  ;;  %1528 = vst.msk [vmem:[#allocation3 + $0x58] sm:$0xff] %vm1516_vm7, %v1443_v58 }
 0x1dc   : > { %1653 = vrot.lane.b32.xlu0 %v4820_v54, %s5207_s23  ;;  %1655 = vrot.lane.b32.xlu1 %v4821_v55, %s5207_s23 }
 0x1de   : > { %v1445_v62 = vpop.permute.xlu0 %1444  ;;  %v1447_v59 = vpop.permute.xlu1 %1446 }
 0x1df   : > { %1529 = vst.msk [vmem:[#allocation3 + $0x60] sm:$0xff] %vm1516_vm7, %v1445_v62  ;;  %1530 = vst.msk [vmem:[#allocation3 + $0x68] sm:$0xff] %vm1516_vm7, %v1447_v59 }
 0x1e0   : > { %1846 = vrot.lane.b32.xlu0 %v4852_v2, %s5208_s26  ;;  %1848 = vrot.lane.b32.xlu1 %v4853_v61, %s5208_s26 }
 0x1e2   : > { %v1449_v19 = vpop.permute.xlu0 %1448  ;;  %v1451_v20 = vpop.permute.xlu1 %1450 }
 0x1e3   : > { %1531 = vst.msk [vmem:[#allocation3 + $0x70] sm:$0xff] %vm1516_vm7, %v1449_v19  ;;  %1532 = vst.msk [vmem:[#allocation3 + $0x78] sm:$0xff] %vm1516_vm7, %v1451_v20 }
 0x1e4   : > { %1657 = vrot.lane.b32.xlu0 %v4822_v12, %s5207_s23  ;;  %1659 = vrot.lane.b32.xlu1 %v4823_v13, %s5207_s23 }
 0x1e6   : > { %v1453_v24 = vpop.permute.xlu0 %1452  ;;  %v1455_v25 = vpop.permute.xlu1 %1454 }
 0x1e7   : > { %1533 = vst.msk [vmem:[#allocation3 + $0x80] sm:$0xff] %vm1516_vm7, %v1453_v24  ;;  %1534 = vst.msk [vmem:[#allocation3 + $0x88] sm:$0xff] %vm1516_vm7, %v1455_v25 }
 0x1e8   : > { %1850 = vrot.lane.b32.xlu0 %v4854_v22, %s5208_s26  ;;  %1852 = vrot.lane.b32.xlu1 %v4855_v23, %s5208_s26 }
 0x1ea   : > { %v1457_v28 = vpop.permute.xlu0 %1456  ;;  %v1459_v31 = vpop.permute.xlu1 %1458 }
 0x1eb   : > { %1535 = vst.msk [vmem:[#allocation3 + $0x90] sm:$0xff] %vm1516_vm7, %v1457_v28  ;;  %1536 = vst.msk [vmem:[#allocation3 + $0x98] sm:$0xff] %vm1516_vm7, %v1459_v31 }
 0x1ec   : > { %1661 = vrot.lane.b32.xlu0 %v4824_v26, %s5207_s23  ;;  %1663 = vrot.lane.b32.xlu1 %v4825_v27, %s5207_s23 }
 0x1ee   : > { %v1461_v34 = vpop.permute.xlu0 %1460  ;;  %v1463_v35 = vpop.permute.xlu1 %1462 }
 0x1ef   : > { %1537 = vst.msk [vmem:[#allocation3 + $0xa0] sm:$0xff] %vm1516_vm7, %v1461_v34  ;;  %1538 = vst.msk [vmem:[#allocation3 + $0xa8] sm:$0xff] %vm1516_vm7, %v1463_v35 }
 0x1f0   : > { %1854 = vrot.lane.b32.xlu0 %v4856_v32, %s5208_s26  ;;  %1856 = vrot.lane.b32.xlu1 %v4857_v33, %s5208_s26 }
 0x1f2   : > { %v1465_v38 = vpop.permute.xlu0 %1464  ;;  %v1467_v39 = vpop.permute.xlu1 %1466 }
 0x1f3   : > { %1539 = vst.msk [vmem:[#allocation3 + $0xb0] sm:$0xff] %vm1516_vm7, %v1465_v38  ;;  %1540 = vst.msk [vmem:[#allocation3 + $0xb8] sm:$0xff] %vm1516_vm7, %v1467_v39 }
 0x1f4   : > { %1665 = vrot.lane.b32.xlu0 %v4826_v36, %s5207_s23  ;;  %1667 = vrot.lane.b32.xlu1 %v4827_v37, %s5207_s23 }
 0x1f6   : > { %v1469_v44 = vpop.permute.xlu0 %1468  ;;  %v1471_v45 = vpop.permute.xlu1 %1470 }
 0x1f7   : > { %1541 = vst.msk [vmem:[#allocation3 + $0xc0] sm:$0xff] %vm1516_vm7, %v1469_v44  ;;  %1542 = vst.msk [vmem:[#allocation3 + $0xc8] sm:$0xff] %vm1516_vm7, %v1471_v45 }
 0x1f8   : > { %1858 = vrot.lane.b32.xlu0 %v4858_v40, %s5208_s26  ;;  %1860 = vrot.lane.b32.xlu1 %v4859_v41, %s5208_s26 }
 0x1fa   : > { %v1473_v48 = vpop.permute.xlu0 %1472  ;;  %v1475_v49 = vpop.permute.xlu1 %1474 }
 0x1fb   : > { %1543 = vst.msk [vmem:[#allocation3 + $0xd0] sm:$0xff] %vm1516_vm7, %v1473_v48  ;;  %1544 = vst.msk [vmem:[#allocation3 + $0xd8] sm:$0xff] %vm1516_vm7, %v1475_v49 }
 0x1fc   : > { %1476 = vrot.lane.b32.xlu0 %v4796_v17, %s5206_s12  ;;  %1478 = vrot.lane.b32.xlu1 %v4797_v1, %s5206_s12 }
 0x1fe   : > { %v1614_v3 = vpop.permute.xlu0 %1613  ;;  %v1616_v4 = vpop.permute.xlu1 %1615 }
 0x1ff   : > { %1710 = vst.msk [vmem:[#allocation3] sm:$0xff] %vm1709_vm8, %v1614_v3  ;;  %1711 = vst.msk [vmem:[#allocation3 + $0x8] sm:$0xff] %vm1709_vm8, %v1616_v4 }
 0x200   : > { %1669 = vrot.lane.b32.xlu0 %v5921_v60, %s5207_s23  ;;  %1671 = vrot.lane.b32.xlu1 %v5924_v63, %s5207_s23 }
 0x202   : > { %v1807_v5 = vpop.permute.xlu0 %1806  ;;  %v1809_v52 = vpop.permute.xlu1 %1808 }
 0x203   : > { %1903 = vst.msk [vmem:[#allocation3] sm:$0xff] %vm1902_vm9, %v1807_v5  ;;  %1904 = vst.msk [vmem:[#allocation3 + $0x8] sm:$0xff] %vm1902_vm9, %v1809_v52 }
 0x204   : > { %1862 = vrot.lane.b32.xlu0 %v6023_v57, %s5208_s26  ;;  %1864 = vrot.lane.b32.xlu1 %v6026_v16, %s5208_s26 }
 0x206   : > { %v1618_v7 = vpop.permute.xlu0 %1617  ;;  %v1620_v60 = vpop.permute.xlu1 %1619 }
 0x207   : > { %1712 = vst.msk [vmem:[#allocation3 + $0x10] sm:$0xff] %vm1709_vm8, %v1618_v7  ;;  %1713 = vst.msk [vmem:[#allocation3 + $0x18] sm:$0xff] %vm1709_vm8, %v1620_v60 }
 0x208   : > { %1482 = vrot.lane.b32.xlu1 %v4799_v53, %s5206_s12  ;;  %1480 = vrot.lane.b32.xlu0 %v4798_v6, %s5206_s12 }
 0x20a   : > { %v1811_v63 = vpop.permute.xlu0 %1810  ;;  %v1813_v8 = vpop.permute.xlu1 %1812  ;;  %v1935_v56 = vld [vmem:[#allocation3] sm:$0xff]  ;;  %v1936_v57 = vld [vmem:[#allocation3 + $0x8] sm:$0xff] }
 0x20b   : > { %1905 = vst.msk [vmem:[#allocation3 + $0x10] sm:$0xff] %vm1902_vm9, %v1811_v63  ;;  %1906 = vst.msk [vmem:[#allocation3 + $0x18] sm:$0xff] %vm1902_vm9, %v1813_v8  ;;  %5053 = vmatprep.mubr.msk.f32.mxu0 %vm1972_vm10, %v1935_v56  ;;  %v4831_v56 = vld [vmem:[%s5264_s29 + $0x1a1] sm:$0xff] }
 0x20c   : > { %5054 = vmatmul.mubr.msk.f32.vlgmr.msra.gmra.mrb[0].mxu0 %vm1972_vm10, %v1936_v57  ;;  %1675 = vrot.lane.b32.xlu1 %v4831_v56, %s5207_s23 }
 0x20e   : > { %v1622_v16 = vpop.permute.xlu0 %1621  ;;  %v1624_v9 = vpop.permute.xlu1 %1623 }
 0x20f   : > { %1714 = vst.msk [vmem:[#allocation3 + $0x20] sm:$0xff] %vm1709_vm8, %v1622_v16  ;;  %1715 = vst.msk [vmem:[#allocation3 + $0x28] sm:$0xff] %vm1709_vm8, %v1624_v9 }
 0x212   : > { %v1815_v10 = vpop.permute.xlu0 %1814  ;;  %v1817_v11 = vpop.permute.xlu1 %1816  ;;  %v1937_v14 = vld [vmem:[#allocation3 + $0x10] sm:$0xff]  ;;  %v1938_v15 = vld [vmem:[#allocation3 + $0x18] sm:$0xff] }
 0x213   : > { %1907 = vst.msk [vmem:[#allocation3 + $0x20] sm:$0xff] %vm1902_vm9, %v1815_v10  ;;  %1908 = vst.msk [vmem:[#allocation3 + $0x28] sm:$0xff] %vm1902_vm9, %v1817_v11  ;;  %5056 = vmatprep.mubr.msk.f32.mxu0 %vm1972_vm10, %v1937_v14  ;;  %v4830_v11 = vld [vmem:[%s5264_s29 + $0x199] sm:$0xff]  ;;  %v5209_v14 = vmov 0.0  }
 0x214   : > { %5057 = vmatmul.mubr.msk.f32.gmra.mrb[2].mxu0 %vm1972_vm10, %v1938_v15  ;;  %281 = vst.msk [vmem:[#allocation2 + $0x8] sm:$0xff] %vm279_vm0, %v5209_v14  ;;  %280 = vst.msk [vmem:[#allocation2] sm:$0xff] %vm279_vm0, %v5209_v14  ;;  %1673 = vrot.lane.b32.xlu0 %v4830_v11, %s5207_s23  ;;  %v4863_v15 = vld [vmem:[%s5264_s29 + $0x1a2] sm:$0xff] }
 0x215   : > { %283 = vst.msk [vmem:[#allocation2 + $0x10] sm:$0x3] %vm282_vm11, %v5209_v14  ;;  %287 = vst.msk [vmem:[#allocation2 + $0x1a8] sm:$0x3] %vm282_vm11, %v5209_v14  ;;  %1868 = vrot.lane.b32.xlu1 %v4863_v15, %s5208_s26 }
 0x216   : > { %v1626_v18 = vpop.permute.xlu0 %1625  ;;  %v1628_v21 = vpop.permute.xlu1 %1627  ;;  %285 = vst.msk [vmem:[#allocation2 + $0x198] sm:$0xff] %vm279_vm0, %v5209_v14  ;;  %286 = vst.msk [vmem:[#allocation2 + $0x1a0] sm:$0xff] %vm279_vm0, %v5209_v14 }
 0x217   : > { %1716 = vst.msk [vmem:[#allocation3 + $0x30] sm:$0xff] %vm1709_vm8, %v1626_v18  ;;  %1717 = vst.msk [vmem:[#allocation3 + $0x38] sm:$0xff] %vm1709_vm8, %v1628_v21 }
 0x218   : > { %289 = vst.msk [vmem:[#allocation2] sm:$0x1] %vm288_vm12, %v5209_v14  ;;  %290 = vst.msk [vmem:[#allocation2 + $0x18] sm:$0x1] %vm288_vm12, %v5209_v14 }
 0x219   : > { %291 = vst.msk [vmem:[#allocation2 + $0x30] sm:$0x1] %vm288_vm12, %v5209_v14  ;;  %292 = vst.msk [vmem:[#allocation2 + $0x48] sm:$0x1] %vm288_vm12, %v5209_v14 }
 0x21a   : > { %v1819_v29 = vpop.permute.xlu0 %1818  ;;  %v1821_v30 = vpop.permute.xlu1 %1820  ;;  %v1939_v42 = vld [vmem:[#allocation3 + $0x20] sm:$0xff]  ;;  %v1940_v43 = vld [vmem:[#allocation3 + $0x28] sm:$0xff]  ;;  %293 = vst.msk [vmem:[#allocation2 + $0x60] sm:$0x1] %vm288_vm12, %v5209_v14  ;;  %294 = vst.msk [vmem:[#allocation2 + $0x78] sm:$0x1] %vm288_vm12, %v5209_v14 }
 0x21b   : > { %1909 = vst.msk [vmem:[#allocation3 + $0x30] sm:$0xff] %vm1902_vm9, %v1819_v29  ;;  %1910 = vst.msk [vmem:[#allocation3 + $0x38] sm:$0xff] %vm1902_vm9, %v1821_v30  ;;  %5059 = vmatprep.mubr.msk.f32.mxu0 %vm1972_vm10, %v1939_v42  ;;  %v4862_v29 = vld [vmem:[%s5264_s29 + $0x19a] sm:$0xff] }
 0x21c   : > { %5060 = vmatmul.mubr.msk.f32.gmra.mrb[4].mxu0 %vm1972_vm10, %v1940_v43  ;;  %295 = vst.msk [vmem:[#allocation2 + $0x90] sm:$0x1] %vm288_vm12, %v5209_v14  ;;  %296 = vst.msk [vmem:[#allocation2 + $0xa8] sm:$0x1] %vm288_vm12, %v5209_v14  ;;  %1866 = vrot.lane.b32.xlu0 %v4862_v29, %s5208_s26  ;;  %v2506_v30 = vld [vmem:[#allocation2 + $0x9] sm:$0xff] }
 0x21d   : > { %297 = vst.msk [vmem:[#allocation2 + $0xc0] sm:$0x1] %vm288_vm12, %v5209_v14  ;;  %298 = vst.msk [vmem:[#allocation2 + $0xd8] sm:$0x1] %vm288_vm12, %v5209_v14  ;;  %2571 = vrot.lane.b32.xlu1 %v2506_v30, %s5201_s30 }
 0x21e   : > { %v1630_v46 = vpop.permute.xlu0 %1629  ;;  %v1632_v47 = vpop.permute.xlu1 %1631  ;;  %299 = vst.msk [vmem:[#allocation2 + $0xf0] sm:$0x1] %vm288_vm12, %v5209_v14  ;;  %300 = vst.msk [vmem:[#allocation2 + $0x108] sm:$0x1] %vm288_vm12, %v5209_v14 }
 0x21f   : > { %1718 = vst.msk [vmem:[#allocation3 + $0x40] sm:$0xff] %vm1709_vm8, %v1630_v46  ;;  %1719 = vst.msk [vmem:[#allocation3 + $0x48] sm:$0xff] %vm1709_vm8, %v1632_v47 }
 0x220   : > { %301 = vst.msk [vmem:[#allocation2 + $0x120] sm:$0x1] %vm288_vm12, %v5209_v14  ;;  %302 = vst.msk [vmem:[#allocation2 + $0x138] sm:$0x1] %vm288_vm12, %v5209_v14 }
 0x221   : > { %303 = vst.msk [vmem:[#allocation2 + $0x150] sm:$0x1] %vm288_vm12, %v5209_v14  ;;  %304 = vst.msk [vmem:[#allocation2 + $0x168] sm:$0x1] %vm288_vm12, %v5209_v14 }
 0x222   : > { %v1823_v50 = vpop.permute.xlu0 %1822  ;;  %v1825_v51 = vpop.permute.xlu1 %1824  ;;  %v1941_v54 = vld [vmem:[#allocation3 + $0x30] sm:$0xff]  ;;  %v1942_v55 = vld [vmem:[#allocation3 + $0x38] sm:$0xff]  ;;  %305 = vst.msk [vmem:[#allocation2 + $0x180] sm:$0x1] %vm288_vm12, %v5209_v14  ;;  %306 = vst.msk [vmem:[#allocation2 + $0x198] sm:$0x1] %vm288_vm12, %v5209_v14 }
 0x223   : > { %1911 = vst.msk [vmem:[#allocation3 + $0x40] sm:$0xff] %vm1902_vm9, %v1823_v50  ;;  %1912 = vst.msk [vmem:[#allocation3 + $0x48] sm:$0xff] %vm1902_vm9, %v1825_v51  ;;  %5062 = vmatprep.mubr.msk.f32.mxu0 %vm1972_vm10, %v1941_v54  ;;  %v2505_v50 = vld [vmem:[#allocation2 + $0x1] sm:$0xff] }
 0x224   : > { %5063 = vmatmul.mubr.msk.f32.gmra.mrb[6].mxu0 %vm1972_vm10, %v1942_v55  ;;  %307 = vst.msk [vmem:[#allocation2 + $0x11] sm:$0x1] %vm288_vm12, %v5209_v14  ;;  %308 = vst.msk [vmem:[#allocation2 + $0x29] sm:$0x1] %vm288_vm12, %v5209_v14  ;;  %2569 = vrot.lane.b32.xlu0 %v2505_v50, %s5201_s30 }
 0x225   : > { %309 = vst.msk [vmem:[#allocation2 + $0x41] sm:$0x1] %vm288_vm12, %v5209_v14  ;;  %310 = vst.msk [vmem:[#allocation2 + $0x59] sm:$0x1] %vm288_vm12, %v5209_v14 }
 0x226   : > { %v1634_v0 = vpop.permute.xlu0 %1633  ;;  %v1636_v58 = vpop.permute.xlu1 %1635  ;;  %311 = vst.msk [vmem:[#allocation2 + $0x71] sm:$0x1] %vm288_vm12, %v5209_v14  ;;  %312 = vst.msk [vmem:[#allocation2 + $0x89] sm:$0x1] %vm288_vm12, %v5209_v14 }
 0x227   : > { %1720 = vst.msk [vmem:[#allocation3 + $0x50] sm:$0xff] %vm1709_vm8, %v1634_v0  ;;  %1721 = vst.msk [vmem:[#allocation3 + $0x58] sm:$0xff] %vm1709_vm8, %v1636_v58 }
 0x228   : > { %313 = vst.msk [vmem:[#allocation2 + $0xa1] sm:$0x1] %vm288_vm12, %v5209_v14  ;;  %314 = vst.msk [vmem:[#allocation2 + $0xb9] sm:$0x1] %vm288_vm12, %v5209_v14 }
 0x229   : > { %315 = vst.msk [vmem:[#allocation2 + $0xd1] sm:$0x1] %vm288_vm12, %v5209_v14  ;;  %316 = vst.msk [vmem:[#allocation2 + $0xe9] sm:$0x1] %vm288_vm12, %v5209_v14 }
 0x22a   : > { %v1827_v2 = vpop.permute.xlu0 %1826  ;;  %v1829_v61 = vpop.permute.xlu1 %1828  ;;  %v1943_v62 = vld [vmem:[#allocation3 + $0x40] sm:$0xff]  ;;  %v1944_v59 = vld [vmem:[#allocation3 + $0x48] sm:$0xff]  ;;  %317 = vst.msk [vmem:[#allocation2 + $0x101] sm:$0x1] %vm288_vm12, %v5209_v14  ;;  %318 = vst.msk [vmem:[#allocation2 + $0x119] sm:$0x1] %vm288_vm12, %v5209_v14 }
 0x22b   : > { %1913 = vst.msk [vmem:[#allocation3 + $0x50] sm:$0xff] %vm1902_vm9, %v1827_v2  ;;  %1914 = vst.msk [vmem:[#allocation3 + $0x58] sm:$0xff] %vm1902_vm9, %v1829_v61  ;;  %5065 = vmatprep.mubr.msk.f32.mxu0 %vm1972_vm10, %v1943_v62 }
 0x22c   : > { %5066 = vmatmul.mubr.msk.f32.gmra.mrb[8].mxu0 %vm1972_vm10, %v1944_v59  ;;  %319 = vst.msk [vmem:[#allocation2 + $0x131] sm:$0x1] %vm288_vm12, %v5209_v14  ;;  %320 = vst.msk [vmem:[#allocation2 + $0x149] sm:$0x1] %vm288_vm12, %v5209_v14 }
 0x22d   : > { %321 = vst.msk [vmem:[#allocation2 + $0x161] sm:$0x1] %vm288_vm12, %v5209_v14  ;;  %322 = vst.msk [vmem:[#allocation2 + $0x179] sm:$0x1] %vm288_vm12, %v5209_v14 }
 0x22e   : > { %v1638_v12 = vpop.permute.xlu0 %1637  ;;  %v1640_v13 = vpop.permute.xlu1 %1639  ;;  %323 = vst.msk [vmem:[#allocation2 + $0x191] sm:$0x1] %vm288_vm12, %v5209_v14  ;;  %324 = vst.msk [vmem:[#allocation2 + $0x1a9] sm:$0x1] %vm288_vm12, %v5209_v14 }
 0x22f   : > { %1722 = vst.msk [vmem:[#allocation3 + $0x60] sm:$0xff] %vm1709_vm8, %v1638_v12  ;;  %1723 = vst.msk [vmem:[#allocation3 + $0x68] sm:$0xff] %vm1709_vm8, %v1640_v13 }
 0x232   : > { %v1831_v19 = vpop.permute.xlu0 %1830  ;;  %v1833_v20 = vpop.permute.xlu1 %1832  ;;  %v1945_v22 = vld [vmem:[#allocation3 + $0x50] sm:$0xff]  ;;  %v1946_v23 = vld [vmem:[#allocation3 + $0x58] sm:$0xff] }
 0x233   : > { %1915 = vst.msk [vmem:[#allocation3 + $0x60] sm:$0xff] %vm1902_vm9, %v1831_v19  ;;  %1916 = vst.msk [vmem:[#allocation3 + $0x68] sm:$0xff] %vm1902_vm9, %v1833_v20  ;;  %5068 = vmatprep.mubr.msk.f32.mxu0 %vm1972_vm10, %v1945_v22 }
 0x234   : > { %5069 = vmatmul.mubr.msk.f32.gmra.mrb[10].mxu0 %vm1972_vm10, %v1946_v23 }
 0x236   : > { %v1642_v24 = vpop.permute.xlu0 %1641  ;;  %v1644_v25 = vpop.permute.xlu1 %1643 }
 0x237   : > { %1724 = vst.msk [vmem:[#allocation3 + $0x70] sm:$0xff] %vm1709_vm8, %v1642_v24  ;;  %1725 = vst.msk [vmem:[#allocation3 + $0x78] sm:$0xff] %vm1709_vm8, %v1644_v25  ;;  %v2442_v25 = vld [vmem:[#allocation2 + $0x8] sm:$0xff] }
 0x238   : > { %2474 = vst.msk [vmem:[#allocation3 + $0x8] sm:$0xff] %vm279_vm0, %v2442_v25 }
 0x23a   : > { %v1835_v26 = vpop.permute.xlu0 %1834  ;;  %v1837_v27 = vpop.permute.xlu1 %1836  ;;  %v1947_v28 = vld [vmem:[#allocation3 + $0x60] sm:$0xff]  ;;  %v1948_v31 = vld [vmem:[#allocation3 + $0x68] sm:$0xff] }
 0x23b   : > { %1917 = vst.msk [vmem:[#allocation3 + $0x70] sm:$0xff] %vm1902_vm9, %v1835_v26  ;;  %1918 = vst.msk [vmem:[#allocation3 + $0x78] sm:$0xff] %vm1902_vm9, %v1837_v27  ;;  %5071 = vmatprep.mubr.msk.f32.mxu0 %vm1972_vm10, %v1947_v28  ;;  %v2441_v26 = vld [vmem:[#allocation2] sm:$0xff] }
 0x23c   : > { %5072 = vmatmul.mubr.msk.f32.gmra.mrb[12].mxu0 %vm1972_vm10, %v1948_v31  ;;  %2473 = vst.msk [vmem:[#allocation3] sm:$0xff] %vm279_vm0, %v2441_v26  ;;  %v6474_v28 = vld [vmem:[%s7598_s3] ss:$0 sm:$0xff] }
 0x23e   : > { %v1646_v32 = vpop.permute.xlu0 %1645  ;;  %v1648_v33 = vpop.permute.xlu1 %1647 }
 0x23f   : > { %1726 = vst.msk [vmem:[#allocation3 + $0x80] sm:$0xff] %vm1709_vm8, %v1646_v32  ;;  %1727 = vst.msk [vmem:[#allocation3 + $0x88] sm:$0xff] %vm1709_vm8, %v1648_v33  ;;  %v6481_v33 = vld [vmem:[%s7599_s4] ss:$0 sm:$0xff] }
 0x242   : > { %v1839_v34 = vpop.permute.xlu0 %1838  ;;  %v1841_v35 = vpop.permute.xlu1 %1840  ;;  %v1949_v36 = vld [vmem:[#allocation3 + $0x70] sm:$0xff]  ;;  %v1950_v37 = vld [vmem:[#allocation3 + $0x78] sm:$0xff] }
 0x243   : > { %1919 = vst.msk [vmem:[#allocation3 + $0x80] sm:$0xff] %vm1902_vm9, %v1839_v34  ;;  %1920 = vst.msk [vmem:[#allocation3 + $0x88] sm:$0xff] %vm1902_vm9, %v1841_v35  ;;  %5074 = vmatprep.mubr.msk.f32.mxu0 %vm1972_vm10, %v1949_v36 }
 0x244   : > { %5075 = vmatmul.mubr.msk.f32.gmra.mrb[14].mxu0 %vm1972_vm10, %v1950_v37 }
 0x246   : > { %v1650_v38 = vpop.permute.xlu0 %1649  ;;  %v1652_v39 = vpop.permute.xlu1 %1651 }
 0x247   : > { %1728 = vst.msk [vmem:[#allocation3 + $0x90] sm:$0xff] %vm1709_vm8, %v1650_v38  ;;  %1729 = vst.msk [vmem:[#allocation3 + $0x98] sm:$0xff] %vm1709_vm8, %v1652_v39 }
 0x24a   : > { %v1843_v40 = vpop.permute.xlu0 %1842  ;;  %v1845_v41 = vpop.permute.xlu1 %1844  ;;  %v1951_v44 = vld [vmem:[#allocation3 + $0x80] sm:$0xff]  ;;  %v1952_v45 = vld [vmem:[#allocation3 + $0x88] sm:$0xff] }
 0x24b   : > { %1921 = vst.msk [vmem:[#allocation3 + $0x90] sm:$0xff] %vm1902_vm9, %v1843_v40  ;;  %1922 = vst.msk [vmem:[#allocation3 + $0x98] sm:$0xff] %vm1902_vm9, %v1845_v41  ;;  %5077 = vmatprep.mubr.msk.f32.mxu0 %vm1972_vm10, %v1951_v44 }
 0x24c   : > { %5078 = vmatmul.mubr.msk.f32.gmra.mrb[16].mxu0 %vm1972_vm10, %v1952_v45 }
 0x24e   : > { %v1654_v17 = vpop.permute.xlu0 %1653  ;;  %v1656_v1 = vpop.permute.xlu1 %1655 }
 0x24f   : > { %1730 = vst.msk [vmem:[#allocation3 + $0xa0] sm:$0xff] %vm1709_vm8, %v1654_v17  ;;  %1731 = vst.msk [vmem:[#allocation3 + $0xa8] sm:$0xff] %vm1709_vm8, %v1656_v1 }
 0x252   : > { %v1847_v48 = vpop.permute.xlu0 %1846  ;;  %v1849_v49 = vpop.permute.xlu1 %1848  ;;  %v1953_v3 = vld [vmem:[#allocation3 + $0x90] sm:$0xff]  ;;  %v1954_v4 = vld [vmem:[#allocation3 + $0x98] sm:$0xff] }
 0x253   : > { %1923 = vst.msk [vmem:[#allocation3 + $0xa0] sm:$0xff] %vm1902_vm9, %v1847_v48  ;;  %1924 = vst.msk [vmem:[#allocation3 + $0xa8] sm:$0xff] %vm1902_vm9, %v1849_v49  ;;  %5080 = vmatprep.mubr.msk.f32.mxu0 %vm1972_vm10, %v1953_v3 }
 0x254   : > { %5081 = vmatmul.mubr.msk.f32.gmra.mrb[18].mxu0 %vm1972_vm10, %v1954_v4 }
 0x256   : > { %v1658_v5 = vpop.permute.xlu0 %1657  ;;  %v1660_v52 = vpop.permute.xlu1 %1659 }
 0x257   : > { %1732 = vst.msk [vmem:[#allocation3 + $0xb0] sm:$0xff] %vm1709_vm8, %v1658_v5  ;;  %1733 = vst.msk [vmem:[#allocation3 + $0xb8] sm:$0xff] %vm1709_vm8, %v1660_v52 }
 0x25a   : > { %v1851_v53 = vpop.permute.xlu0 %1850  ;;  %v1853_v6 = vpop.permute.xlu1 %1852  ;;  %v1955_v7 = vld [vmem:[#allocation3 + $0xa0] sm:$0xff]  ;;  %v1956_v60 = vld [vmem:[#allocation3 + $0xa8] sm:$0xff] }
 0x25b   : > { %1925 = vst.msk [vmem:[#allocation3 + $0xb0] sm:$0xff] %vm1902_vm9, %v1851_v53  ;;  %1926 = vst.msk [vmem:[#allocation3 + $0xb8] sm:$0xff] %vm1902_vm9, %v1853_v6  ;;  %5083 = vmatprep.mubr.msk.f32.mxu0 %vm1972_vm10, %v1955_v7 }
 0x25c   : > { %5084 = vmatmul.mubr.msk.f32.gmra.mrb[20].mxu0 %vm1972_vm10, %v1956_v60 }
 0x25e   : > { %v1662_v63 = vpop.permute.xlu0 %1661  ;;  %v1664_v8 = vpop.permute.xlu1 %1663 }
 0x25f   : > { %1734 = vst.msk [vmem:[#allocation3 + $0xc0] sm:$0xff] %vm1709_vm8, %v1662_v63  ;;  %1735 = vst.msk [vmem:[#allocation3 + $0xc8] sm:$0xff] %vm1709_vm8, %v1664_v8 }
 0x262   : > { %v1855_v57 = vpop.permute.xlu0 %1854  ;;  %v1857_v16 = vpop.permute.xlu1 %1856  ;;  %v1957_v9 = vld [vmem:[#allocation3 + $0xb0] sm:$0xff]  ;;  %v1958_v10 = vld [vmem:[#allocation3 + $0xb8] sm:$0xff] }
 0x263   : > { %1927 = vst.msk [vmem:[#allocation3 + $0xc0] sm:$0xff] %vm1902_vm9, %v1855_v57  ;;  %1928 = vst.msk [vmem:[#allocation3 + $0xc8] sm:$0xff] %vm1902_vm9, %v1857_v16  ;;  %5086 = vmatprep.mubr.msk.f32.mxu0 %vm1972_vm10, %v1957_v9 }
 0x264   : > { %5087 = vmatmul.mubr.msk.f32.gmra.mrb[22].mxu0 %vm1972_vm10, %v1958_v10 }
 0x266   : > { %v1666_v18 = vpop.permute.xlu0 %1665  ;;  %v1668_v21 = vpop.permute.xlu1 %1667 }
 0x267   : > { %1736 = vst.msk [vmem:[#allocation3 + $0xd0] sm:$0xff] %vm1709_vm8, %v1666_v18  ;;  %1737 = vst.msk [vmem:[#allocation3 + $0xd8] sm:$0xff] %vm1709_vm8, %v1668_v21 }
 0x26a   : > { %v1859_v42 = vpop.permute.xlu0 %1858  ;;  %v1861_v43 = vpop.permute.xlu1 %1860  ;;  %v1959_v46 = vld [vmem:[#allocation3 + $0xc0] sm:$0xff]  ;;  %v1960_v47 = vld [vmem:[#allocation3 + $0xc8] sm:$0xff] }
 0x26b   : > { %1929 = vst.msk [vmem:[#allocation3 + $0xd0] sm:$0xff] %vm1902_vm9, %v1859_v42  ;;  %1930 = vst.msk [vmem:[#allocation3 + $0xd8] sm:$0xff] %vm1902_vm9, %v1861_v43  ;;  %5089 = vmatprep.mubr.msk.f32.mxu0 %vm1972_vm10, %v1959_v46 }
 0x26c   : > { %5090 = vmatmul.mubr.msk.f32.gmra.mrb[24].mxu0 %vm1972_vm10, %v1960_v47 }
 0x26e   : > { %v1477_v51 = vpop.permute.xlu0 %1476  ;;  %v1479_v54 = vpop.permute.xlu1 %1478 }
 0x26f   : > { %1545 = vst.msk [vmem:[#allocation3 + $0xe0] sm:$0xff] %vm1516_vm7, %v1477_v51  ;;  %1546 = vst.msk [vmem:[#allocation3 + $0xe8] sm:$0xff] %vm1516_vm7, %v1479_v54 }
 0x272   : > { %v1670_v55 = vpop.permute.xlu0 %1669  ;;  %v1672_v0 = vpop.permute.xlu1 %1671  ;;  %v1961_v58 = vld [vmem:[#allocation3 + $0xd0] sm:$0xff]  ;;  %v1962_v2 = vld [vmem:[#allocation3 + $0xd8] sm:$0xff] }
 0x273   : > { %1738 = vst.msk [vmem:[#allocation3 + $0xe0] sm:$0xff] %vm1709_vm8, %v1670_v55  ;;  %1739 = vst.msk [vmem:[#allocation3 + $0xe8] sm:$0xff] %vm1709_vm8, %v1672_v0  ;;  %5092 = vmatprep.mubr.msk.f32.mxu0 %vm1972_vm10, %v1961_v58 }
 0x274   : > { %5093 = vmatmul.mubr.msk.f32.gmra.mrb[26].mxu0 %vm1972_vm10, %v1962_v2 }
 0x276   : > { %v1863_v61 = vpop.permute.xlu0 %1862  ;;  %v1865_v62 = vpop.permute.xlu1 %1864 }
 0x277   : > { %1931 = vst.msk [vmem:[#allocation3 + $0xe0] sm:$0xff] %vm1902_vm9, %v1863_v61  ;;  %1932 = vst.msk [vmem:[#allocation3 + $0xe8] sm:$0xff] %vm1902_vm9, %v1865_v62 }
 0x27a   : > { %v1483_v13 = vpop.permute.xlu1 %1482  ;;  %v1481_v19 = vpop.permute.xlu0 %1480 }
 0x27b   : > { %1548 = vst.msk [vmem:[#allocation3 + $0xf8] sm:$0xff] %vm1516_vm7, %v1483_v13  ;;  %1547 = vst.msk [vmem:[#allocation3 + $0xf0] sm:$0xff] %vm1516_vm7, %v1481_v19 }
 0x27e   : > { %v1963_v59 = vld [vmem:[#allocation3 + $0xe0] sm:$0xff]  ;;  %v1964_v12 = vld [vmem:[#allocation3 + $0xe8] sm:$0xff]  ;;  %v1676_v20 = vpop.permute.xlu1 %1675 }
 0x27f   : > { %5095 = vmatprep.mubr.msk.f32.mxu0 %vm1972_vm10, %v1963_v59  ;;  %1741 = vst.msk [vmem:[#allocation3 + $0xf8] sm:$0xff] %vm1709_vm8, %v1676_v20 }
 0x280   : > { %5096 = vmatmul.mubr.msk.f32.gmra.mrb[28].mxu0 %vm1972_vm10, %v1964_v12 }
 0x286   : > { %v1674_v22 = vpop.permute.xlu0 %1673 }
 0x287   : > { %1740 = vst.msk [vmem:[#allocation3 + $0xf0] sm:$0xff] %vm1709_vm8, %v1674_v22  ;;  %v1869_v23 = vpop.permute.xlu1 %1868 }
 0x288   : > { %1934 = vst.msk [vmem:[#allocation3 + $0xf8] sm:$0xff] %vm1902_vm9, %v1869_v23 }
 0x28e   : > { %v1867_v24 = vpop.permute.xlu0 %1866 }
 0x28f   : > { %1933 = vst.msk [vmem:[#allocation3 + $0xf0] sm:$0xff] %vm1902_vm9, %v1867_v24  ;;  %v2572_v27 = vpop.permute.xlu1 %2571  ;;  %v1966_v41 = vld [vmem:[#allocation3 + $0xf8] sm:$0xff] }
 0x290   : > { %2666 = vst.msk [vmem:[#allocation3 + $0x8] sm:$0xff] %vm549_vm1, %v2572_v27 }
 0x296   : > { %v2570_v31 = vpop.permute.xlu0 %2569  ;;  %v1965_v39 = vld [vmem:[#allocation3 + $0xf0] sm:$0xff] }
 0x297   : > { %2665 = vst.msk [vmem:[#allocation3] sm:$0xff] %vm549_vm1, %v2570_v31  ;;  %5098 = vmatprep.mubr.msk.f32.mxu0 %vm1972_vm10, %v1965_v39 }
 0x298   : > { %5099 = vmatmul.mubr.msk.f32.gmra.mrb[30].mxu0 %vm1972_vm10, %v1966_v41 }
 0x2df   : > { %v5055_v32 = vpop.f32.mrb[0].mxu0 }
 0x2e0   : > { %v2306_v34 = vmul.f32 %v5055_v32, %v6474_v28  ;;  %v2139_v35 = vpop.f32.mrb[1].mxu0 }
 0x2e1   : > { %v2305_v36 = vmul.f32 %v6474_v28, %v2139_v35 }
 0x2e2   : > { %v2345_v37 = vadd.f32 %v6481_v33, %v2306_v34 }
 0x2e3   : > { %v2344_v38 = vadd.f32 %v6481_v33, %v2305_v36 }
 0x2e4   : > { %v2377_v40 = vmax.f32 %v2345_v37, 0.0 }
 0x2e5   : > { %v2376_v44 = vmax.f32 %v2344_v38, 0.0 }
 0x2e6   : > { %2410 = vst.msk [vmem:[#allocation2 + $0x21] sm:$0xff] %vm279_vm0, %v2377_v40 }
 0x2e7   : > { %2409 = vst.msk [vmem:[#allocation2 + $0x19] sm:$0xff] %vm279_vm0, %v2376_v44  ;;  %v5058_v45 = vpop.f32.mrb[2].mxu0 }
 0x2e8   : > { %v2308_v17 = vmul.f32 %v5058_v45, %v6474_v28  ;;  %v2149_v1 = vpop.f32.mrb[3].mxu0 }
 0x2e9   : > { %v2307_v48 = vmul.f32 %v6474_v28, %v2149_v1 }
 0x2ea   : > { %v2347_v49 = vadd.f32 %v6481_v33, %v2308_v17 }
 0x2eb   : > { %v2346_v3 = vadd.f32 %v6481_v33, %v2307_v48 }
 0x2ec   : > { %v2379_v4 = vmax.f32 %v2347_v49, 0.0 }
 0x2ed   : > { %v2378_v5 = vmax.f32 %v2346_v3, 0.0  ;;  %v6495_v52 = vld [vmem:[#allocation2 + $0x21] sm:$0xff] }
 0x2ee   : > { %2412 = vst.msk [vmem:[#allocation2 + $0x39] sm:$0xff] %vm279_vm0, %v2379_v4  ;;  %2575 = vrot.lane.b32.xlu1 %v6495_v52, %s5201_s30  ;;  %v6500_v53 = vld [vmem:[#allocation2 + $0x19] sm:$0xff] }
 0x2ef   : > { %v6502_v6 = vld [vmem:[#allocation2 + $0x20] sm:$0xff]  ;;  %v6504_v7 = vld [vmem:[#allocation2 + $0x18] sm:$0xff]  ;;  %2411 = vst.msk [vmem:[#allocation2 + $0x31] sm:$0xff] %vm279_vm0, %v2378_v5  ;;  %2573 = vrot.lane.b32.xlu0 %v6500_v53, %s5201_s30  ;;  %v5061_v60 = vpop.f32.mrb[4].mxu0 }
 0x2f0   : > { %2476 = vst.msk [vmem:[#allocation3 + $0x18] sm:$0xff] %vm279_vm0, %v6502_v6  ;;  %2475 = vst.msk [vmem:[#allocation3 + $0x10] sm:$0xff] %vm279_vm0, %v6504_v7  ;;  %v2310_v63 = vmul.f32 %v5061_v60, %v6474_v28  ;;  %v2159_v8 = vpop.f32.mrb[5].mxu0 }
 0x2f1   : > { %v2309_v56 = vmul.f32 %v6474_v28, %v2159_v8 }
 0x2f2   : > { %v2349_v57 = vadd.f32 %v6481_v33, %v2310_v63 }
 0x2f3   : > { %v2348_v16 = vadd.f32 %v6481_v33, %v2309_v56 }
 0x2f4   : > { %v2381_v9 = vmax.f32 %v2349_v57, 0.0 }
 0x2f5   : > { %v2380_v10 = vmax.f32 %v2348_v16, 0.0  ;;  %v6517_v11 = vld [vmem:[#allocation2 + $0x39] sm:$0xff] }
 0x2f6   : > { %2414 = vst.msk [vmem:[#allocation2 + $0x51] sm:$0xff] %vm279_vm0, %v2381_v9  ;;  %2579 = vrot.lane.b32.xlu1 %v6517_v11, %s5201_s30  ;;  %v6522_v14 = vld [vmem:[#allocation2 + $0x31] sm:$0xff] }
 0x2f7   : > { %v6524_v15 = vld [vmem:[#allocation2 + $0x38] sm:$0xff]  ;;  %v6526_v18 = vld [vmem:[#allocation2 + $0x30] sm:$0xff]  ;;  %2413 = vst.msk [vmem:[#allocation2 + $0x49] sm:$0xff] %vm279_vm0, %v2380_v10  ;;  %2577 = vrot.lane.b32.xlu0 %v6522_v14, %s5201_s30  ;;  %v5064_v21 = vpop.f32.mrb[6].mxu0 }
 0x2f8   : > { %2478 = vst.msk [vmem:[#allocation3 + $0x28] sm:$0xff] %vm279_vm0, %v6524_v15  ;;  %2477 = vst.msk [vmem:[#allocation3 + $0x20] sm:$0xff] %vm279_vm0, %v6526_v18  ;;  %v2312_v29 = vmul.f32 %v5064_v21, %v6474_v28  ;;  %v2169_v30 = vpop.f32.mrb[7].mxu0 }
 0x2f9   : > { %v2311_v42 = vmul.f32 %v6474_v28, %v2169_v30 }
 0x2fa   : > { %v2351_v43 = vadd.f32 %v6481_v33, %v2312_v29 }
 0x2fb   : > { %v2350_v46 = vadd.f32 %v6481_v33, %v2311_v42 }
 0x2fc   : > { %v2383_v47 = vmax.f32 %v2351_v43, 0.0 }
 0x2fd   : > { %v2382_v50 = vmax.f32 %v2350_v46, 0.0  ;;  %v6539_v51 = vld [vmem:[#allocation2 + $0x51] sm:$0xff] }
 0x2fe   : > { %2416 = vst.msk [vmem:[#allocation2 + $0x69] sm:$0xff] %vm279_vm0, %v2383_v47  ;;  %2583 = vrot.lane.b32.xlu1 %v6539_v51, %s5201_s30  ;;  %v6544_v54 = vld [vmem:[#allocation2 + $0x49] sm:$0xff] }
 0x2ff   : > { %v6546_v55 = vld [vmem:[#allocation2 + $0x50] sm:$0xff]  ;;  %v6548_v0 = vld [vmem:[#allocation2 + $0x48] sm:$0xff]  ;;  %2415 = vst.msk [vmem:[#allocation2 + $0x61] sm:$0xff] %vm279_vm0, %v2382_v50  ;;  %2581 = vrot.lane.b32.xlu0 %v6544_v54, %s5201_s30  ;;  %v5067_v58 = vpop.f32.mrb[8].mxu0 }
 0x300   : > { %2480 = vst.msk [vmem:[#allocation3 + $0x38] sm:$0xff] %vm279_vm0, %v6546_v55  ;;  %2479 = vst.msk [vmem:[#allocation3 + $0x30] sm:$0xff] %vm279_vm0, %v6548_v0  ;;  %v2314_v2 = vmul.f32 %v5067_v58, %v6474_v28  ;;  %v2179_v61 = vpop.f32.mrb[9].mxu0 }
 0x301   : > { %v2313_v62 = vmul.f32 %v6474_v28, %v2179_v61 }
 0x302   : > { %v2353_v59 = vadd.f32 %v6481_v33, %v2314_v2 }
 0x303   : > { %v2352_v12 = vadd.f32 %v6481_v33, %v2313_v62 }
 0x304   : > { %v2385_v13 = vmax.f32 %v2353_v59, 0.0 }
 0x305   : > { %v2384_v19 = vmax.f32 %v2352_v12, 0.0  ;;  %v6561_v20 = vld [vmem:[#allocation2 + $0x69] sm:$0xff] }
 0x306   : > { %2418 = vst.msk [vmem:[#allocation2 + $0x81] sm:$0xff] %vm279_vm0, %v2385_v13  ;;  %2587 = vrot.lane.b32.xlu1 %v6561_v20, %s5201_s30  ;;  %v6566_v22 = vld [vmem:[#allocation2 + $0x61] sm:$0xff] }
 0x307   : > { %v6568_v23 = vld [vmem:[#allocation2 + $0x68] sm:$0xff]  ;;  %2417 = vst.msk [vmem:[#allocation2 + $0x79] sm:$0xff] %vm279_vm0, %v2384_v19  ;;  %2585 = vrot.lane.b32.xlu0 %v6566_v22, %s5201_s30  ;;  %v5070_v24 = vpop.f32.mrb[10].mxu0  ;;  %v6575_v25 = vld [vmem:[#allocation2 + $0x60] sm:$0xff] }
 0x308   : > { %2482 = vst.msk [vmem:[#allocation3 + $0x48] sm:$0xff] %vm279_vm0, %v6568_v23  ;;  %v2316_v26 = vmul.f32 %v5070_v24, %v6474_v28  ;;  %v2189_v27 = vpop.f32.mrb[11].mxu0  ;;  %2481 = vst.msk [vmem:[#allocation3 + $0x40] sm:$0xff] %vm279_vm0, %v6575_v25 }
 0x309   : > { %v2315_v31 = vmul.f32 %v6474_v28, %v2189_v27 }
 0x30a   : > { %v2355_v32 = vadd.f32 %v6481_v33, %v2316_v26 }
 0x30b   : > { %v2354_v34 = vadd.f32 %v6481_v33, %v2315_v31 }
 0x30c   : > { %v2387_v35 = vmax.f32 %v2355_v32, 0.0 }
 0x30d   : > { %v2386_v36 = vmax.f32 %v2354_v34, 0.0  ;;  %v6583_v37 = vld [vmem:[#allocation2 + $0x81] sm:$0xff] }
 0x30e   : > { %2420 = vst.msk [vmem:[#allocation2 + $0x99] sm:$0xff] %vm279_vm0, %v2387_v35  ;;  %2591 = vrot.lane.b32.xlu1 %v6583_v37, %s5201_s30  ;;  %v6588_v38 = vld [vmem:[#allocation2 + $0x79] sm:$0xff] }
 0x30f   : > { %v6590_v39 = vld [vmem:[#allocation2 + $0x80] sm:$0xff]  ;;  %2419 = vst.msk [vmem:[#allocation2 + $0x91] sm:$0xff] %vm279_vm0, %v2386_v36  ;;  %2589 = vrot.lane.b32.xlu0 %v6588_v38, %s5201_s30  ;;  %v5073_v40 = vpop.f32.mrb[12].mxu0  ;;  %v6597_v41 = vld [vmem:[#allocation2 + $0x78] sm:$0xff] }
 0x310   : > { %2484 = vst.msk [vmem:[#allocation3 + $0x58] sm:$0xff] %vm279_vm0, %v6590_v39  ;;  %v2318_v44 = vmul.f32 %v5073_v40, %v6474_v28  ;;  %v2199_v45 = vpop.f32.mrb[13].mxu0  ;;  %2483 = vst.msk [vmem:[#allocation3 + $0x50] sm:$0xff] %vm279_vm0, %v6597_v41 }
 0x311   : > { %v2317_v17 = vmul.f32 %v6474_v28, %v2199_v45 }
 0x312   : > { %v2357_v1 = vadd.f32 %v6481_v33, %v2318_v44 }
 0x313   : > { %v2356_v48 = vadd.f32 %v6481_v33, %v2317_v17 }
 0x314   : > { %v2389_v49 = vmax.f32 %v2357_v1, 0.0 }
 0x315   : > { %v2388_v3 = vmax.f32 %v2356_v48, 0.0  ;;  %v2518_v4 = vld [vmem:[#allocation2 + $0x99] sm:$0xff] }
 0x316   : > { %2422 = vst.msk [vmem:[#allocation2 + $0xb1] sm:$0xff] %vm279_vm0, %v2389_v49  ;;  %2595 = vrot.lane.b32.xlu1 %v2518_v4, %s5201_s30  ;;  %v2517_v5 = vld [vmem:[#allocation2 + $0x91] sm:$0xff] }
 0x317   : > { %v6607_v60 = vld [vmem:[#allocation2 + $0x98] sm:$0xff]  ;;  %2421 = vst.msk [vmem:[#allocation2 + $0xa9] sm:$0xff] %vm279_vm0, %v2388_v3  ;;  %2593 = vrot.lane.b32.xlu0 %v2517_v5, %s5201_s30  ;;  %v5076_v63 = vpop.f32.mrb[14].mxu0  ;;  %v6613_v8 = vld [vmem:[#allocation2 + $0x90] sm:$0xff] }
 0x318   : > { %2486 = vst.msk [vmem:[#allocation3 + $0x68] sm:$0xff] %vm279_vm0, %v6607_v60  ;;  %v2320_v56 = vmul.f32 %v5076_v63, %v6474_v28  ;;  %v2209_v57 = vpop.f32.mrb[15].mxu0  ;;  %2485 = vst.msk [vmem:[#allocation3 + $0x60] sm:$0xff] %vm279_vm0, %v6613_v8 }
 0x319   : > { %v2319_v16 = vmul.f32 %v6474_v28, %v2209_v57 }
 0x31a   : > { %v2359_v9 = vadd.f32 %v6481_v33, %v2320_v56 }
 0x31b   : > { %v2358_v10 = vadd.f32 %v6481_v33, %v2319_v16 }
 0x31c   : > { %v2391_v21 = vmax.f32 %v2359_v9, 0.0 }
 0x31d   : > { %v2390_v29 = vmax.f32 %v2358_v10, 0.0  ;;  %v2520_v30 = vld [vmem:[#allocation2 + $0xb1] sm:$0xff] }
 0x31e   : > { %2424 = vst.msk [vmem:[#allocation2 + $0xc9] sm:$0xff] %vm279_vm0, %v2391_v21  ;;  %2599 = vrot.lane.b32.xlu1 %v2520_v30, %s5201_s30  ;;  %v2519_v42 = vld [vmem:[#allocation2 + $0xa9] sm:$0xff] }
 0x31f   : > { %v6623_v43 = vld [vmem:[#allocation2 + $0xb0] sm:$0xff]  ;;  %2423 = vst.msk [vmem:[#allocation2 + $0xc1] sm:$0xff] %vm279_vm0, %v2390_v29  ;;  %2597 = vrot.lane.b32.xlu0 %v2519_v42, %s5201_s30  ;;  %v5079_v46 = vpop.f32.mrb[16].mxu0  ;;  %v6629_v47 = vld [vmem:[#allocation2 + $0xa8] sm:$0xff] }
 0x320   : > { %2488 = vst.msk [vmem:[#allocation3 + $0x78] sm:$0xff] %vm279_vm0, %v6623_v43  ;;  %v2322_v50 = vmul.f32 %v5079_v46, %v6474_v28  ;;  %v2219_v58 = vpop.f32.mrb[17].mxu0  ;;  %2487 = vst.msk [vmem:[#allocation3 + $0x70] sm:$0xff] %vm279_vm0, %v6629_v47 }
 0x321   : > { %v2321_v2 = vmul.f32 %v6474_v28, %v2219_v58 }
 0x322   : > { %v2361_v61 = vadd.f32 %v6481_v33, %v2322_v50 }
 0x323   : > { %v2360_v62 = vadd.f32 %v6481_v33, %v2321_v2 }
 0x324   : > { %v2393_v59 = vmax.f32 %v2361_v61, 0.0 }
 0x325   : > { %v2392_v12 = vmax.f32 %v2360_v62, 0.0  ;;  %v2522_v13 = vld [vmem:[#allocation2 + $0xc9] sm:$0xff] }
 0x326   : > { %2426 = vst.msk [vmem:[#allocation2 + $0xe1] sm:$0xff] %vm279_vm0, %v2393_v59  ;;  %2603 = vrot.lane.b32.xlu1 %v2522_v13, %s5201_s30  ;;  %v2521_v19 = vld [vmem:[#allocation2 + $0xc1] sm:$0xff] }
 0x327   : > { %v6639_v24 = vld [vmem:[#allocation2 + $0xc8] sm:$0xff]  ;;  %2425 = vst.msk [vmem:[#allocation2 + $0xd9] sm:$0xff] %vm279_vm0, %v2392_v12  ;;  %2601 = vrot.lane.b32.xlu0 %v2521_v19, %s5201_s30  ;;  %v5082_v26 = vpop.f32.mrb[18].mxu0  ;;  %v6645_v27 = vld [vmem:[#allocation2 + $0xc0] sm:$0xff] }
 0x328   : > { %2490 = vst.msk [vmem:[#allocation3 + $0x88] sm:$0xff] %vm279_vm0, %v6639_v24  ;;  %v2324_v31 = vmul.f32 %v5082_v26, %v6474_v28  ;;  %v2229_v32 = vpop.f32.mrb[19].mxu0  ;;  %2489 = vst.msk [vmem:[#allocation3 + $0x80] sm:$0xff] %vm279_vm0, %v6645_v27 }
 0x329   : > { %v2323_v34 = vmul.f32 %v6474_v28, %v2229_v32 }
 0x32a   : > { %v2363_v35 = vadd.f32 %v6481_v33, %v2324_v31 }
 0x32b   : > { %v2362_v36 = vadd.f32 %v6481_v33, %v2323_v34 }
 0x32c   : > { %v2395_v40 = vmax.f32 %v2363_v35, 0.0 }
 0x32d   : > { %v2394_v44 = vmax.f32 %v2362_v36, 0.0  ;;  %v2524_v45 = vld [vmem:[#allocation2 + $0xe1] sm:$0xff] }
 0x32e   : > { %2428 = vst.msk [vmem:[#allocation2 + $0xf9] sm:$0xff] %vm279_vm0, %v2395_v40  ;;  %2607 = vrot.lane.b32.xlu1 %v2524_v45, %s5201_s30  ;;  %v2523_v17 = vld [vmem:[#allocation2 + $0xd9] sm:$0xff] }
 0x32f   : > { %v6655_v1 = vld [vmem:[#allocation2 + $0xe0] sm:$0xff]  ;;  %2427 = vst.msk [vmem:[#allocation2 + $0xf1] sm:$0xff] %vm279_vm0, %v2394_v44  ;;  %2605 = vrot.lane.b32.xlu0 %v2523_v17, %s5201_s30  ;;  %v5085_v48 = vpop.f32.mrb[20].mxu0  ;;  %v6661_v49 = vld [vmem:[#allocation2 + $0xd8] sm:$0xff] }
 0x330   : > { %2492 = vst.msk [vmem:[#allocation3 + $0x98] sm:$0xff] %vm279_vm0, %v6655_v1  ;;  %v2326_v3 = vmul.f32 %v5085_v48, %v6474_v28  ;;  %v2239_v4 = vpop.f32.mrb[21].mxu0  ;;  %2491 = vst.msk [vmem:[#allocation3 + $0x90] sm:$0xff] %vm279_vm0, %v6661_v49 }
 0x331   : > { %v2325_v5 = vmul.f32 %v6474_v28, %v2239_v4 }
 0x332   : > { %v2365_v63 = vadd.f32 %v6481_v33, %v2326_v3 }
 0x333   : > { %v2364_v56 = vadd.f32 %v6481_v33, %v2325_v5 }
 0x334   : > { %v2397_v57 = vmax.f32 %v2365_v63, 0.0 }
 0x335   : > { %v2396_v16 = vmax.f32 %v2364_v56, 0.0  ;;  %v2526_v9 = vld [vmem:[#allocation2 + $0xf9] sm:$0xff] }
 0x336   : > { %2430 = vst.msk [vmem:[#allocation2 + $0x111] sm:$0xff] %vm279_vm0, %v2397_v57  ;;  %2611 = vrot.lane.b32.xlu1 %v2526_v9, %s5201_s30  ;;  %v2525_v10 = vld [vmem:[#allocation2 + $0xf1] sm:$0xff] }
 0x337   : > { %v6671_v21 = vld [vmem:[#allocation2 + $0xf8] sm:$0xff]  ;;  %2429 = vst.msk [vmem:[#allocation2 + $0x109] sm:$0xff] %vm279_vm0, %v2396_v16  ;;  %2609 = vrot.lane.b32.xlu0 %v2525_v10, %s5201_s30  ;;  %v5088_v29 = vpop.f32.mrb[22].mxu0  ;;  %v6677_v30 = vld [vmem:[#allocation2 + $0xf0] sm:$0xff] }
 0x338   : > { %2494 = vst.msk [vmem:[#allocation3 + $0xa8] sm:$0xff] %vm279_vm0, %v6671_v21  ;;  %v2328_v42 = vmul.f32 %v5088_v29, %v6474_v28  ;;  %v2249_v46 = vpop.f32.mrb[23].mxu0  ;;  %2493 = vst.msk [vmem:[#allocation3 + $0xa0] sm:$0xff] %vm279_vm0, %v6677_v30 }
 0x339   : > { %v2327_v50 = vmul.f32 %v6474_v28, %v2249_v46 }
 0x33a   : > { %v2367_v58 = vadd.f32 %v6481_v33, %v2328_v42 }
 0x33b   : > { %v2366_v2 = vadd.f32 %v6481_v33, %v2327_v50 }
 0x33c   : > { %v2399_v61 = vmax.f32 %v2367_v58, 0.0 }
 0x33d   : > { %v2398_v62 = vmax.f32 %v2366_v2, 0.0  ;;  %v2528_v59 = vld [vmem:[#allocation2 + $0x111] sm:$0xff] }
 0x33e   : > { %2432 = vst.msk [vmem:[#allocation2 + $0x129] sm:$0xff] %vm279_vm0, %v2399_v61  ;;  %2615 = vrot.lane.b32.xlu1 %v2528_v59, %s5201_s30  ;;  %v2527_v12 = vld [vmem:[#allocation2 + $0x109] sm:$0xff] }
 0x33f   : > { %v6687_v13 = vld [vmem:[#allocation2 + $0x110] sm:$0xff]  ;;  %2431 = vst.msk [vmem:[#allocation2 + $0x121] sm:$0xff] %vm279_vm0, %v2398_v62  ;;  %2613 = vrot.lane.b32.xlu0 %v2527_v12, %s5201_s30  ;;  %v5091_v19 = vpop.f32.mrb[24].mxu0  ;;  %v6693_v26 = vld [vmem:[#allocation2 + $0x108] sm:$0xff] }
 0x340   : > { %2496 = vst.msk [vmem:[#allocation3 + $0xb8] sm:$0xff] %vm279_vm0, %v6687_v13  ;;  %v2330_v31 = vmul.f32 %v5091_v19, %v6474_v28  ;;  %v2259_v32 = vpop.f32.mrb[25].mxu0  ;;  %2495 = vst.msk [vmem:[#allocation3 + $0xb0] sm:$0xff] %vm279_vm0, %v6693_v26 }
 0x341   : > { %v2329_v34 = vmul.f32 %v6474_v28, %v2259_v32 }
 0x342   : > { %v2369_v35 = vadd.f32 %v6481_v33, %v2330_v31 }
 0x343   : > { %v2368_v36 = vadd.f32 %v6481_v33, %v2329_v34 }
 0x344   : > { %v2401_v40 = vmax.f32 %v2369_v35, 0.0 }
 0x345   : > { %v2400_v44 = vmax.f32 %v2368_v36, 0.0  ;;  %v2530_v45 = vld [vmem:[#allocation2 + $0x129] sm:$0xff] }
 0x346   : > { %2434 = vst.msk [vmem:[#allocation2 + $0x141] sm:$0xff] %vm279_vm0, %v2401_v40  ;;  %2619 = vrot.lane.b32.xlu1 %v2530_v45, %s5201_s30  ;;  %v2529_v17 = vld [vmem:[#allocation2 + $0x121] sm:$0xff] }
 0x347   : > { %v2466_v48 = vld [vmem:[#allocation2 + $0x128] sm:$0xff]  ;;  %2433 = vst.msk [vmem:[#allocation2 + $0x139] sm:$0xff] %vm279_vm0, %v2400_v44  ;;  %2617 = vrot.lane.b32.xlu0 %v2529_v17, %s5201_s30  ;;  %v5094_v3 = vpop.f32.mrb[26].mxu0  ;;  %v6706_v4 = vld [vmem:[#allocation2 + $0x120] sm:$0xff] }
 0x348   : > { %2498 = vst.msk [vmem:[#allocation3 + $0xc8] sm:$0xff] %vm279_vm0, %v2466_v48  ;;  %v2332_v5 = vmul.f32 %v5094_v3, %v6474_v28  ;;  %v2269_v63 = vpop.f32.mrb[27].mxu0  ;;  %2497 = vst.msk [vmem:[#allocation3 + $0xc0] sm:$0xff] %vm279_vm0, %v6706_v4  ;;  %v2698_v3 = vld [vmem:[#allocation2 + $0xa] sm:$0xff] }
 0x349   : > { %v2331_v56 = vmul.f32 %v6474_v28, %v2269_v63  ;;  %v2697_v63 = vld [vmem:[#allocation2 + $0x2] sm:$0xff] }
 0x34a   : > { %v2371_v57 = vadd.f32 %v6481_v33, %v2332_v5 }
 0x34b   : > { %v2370_v16 = vadd.f32 %v6481_v33, %v2331_v56 }
 0x34c   : > { %v2403_v9 = vmax.f32 %v2371_v57, 0.0 }
 0x34d   : > { %v2402_v10 = vmax.f32 %v2370_v16, 0.0  ;;  %v2532_v29 = vld [vmem:[#allocation2 + $0x141] sm:$0xff] }
 0x34e   : > { %2436 = vst.msk [vmem:[#allocation2 + $0x159] sm:$0xff] %vm279_vm0, %v2403_v9  ;;  %2623 = vrot.lane.b32.xlu1 %v2532_v29, %s5201_s30  ;;  %v2531_v42 = vld [vmem:[#allocation2 + $0x139] sm:$0xff]  ;;  %v6739_v16 = vld [vmem:[#allocation2 + $0x22] sm:$0xff] }
 0x34f   : > { %v2468_v46 = vld [vmem:[#allocation2 + $0x140] sm:$0xff]  ;;  %2435 = vst.msk [vmem:[#allocation2 + $0x151] sm:$0xff] %vm279_vm0, %v2402_v10  ;;  %2621 = vrot.lane.b32.xlu0 %v2531_v42, %s5201_s30  ;;  %v2467_v50 = vld [vmem:[#allocation2 + $0x138] sm:$0xff] }
 0x350   : > { %2500 = vst.msk [vmem:[#allocation3 + $0xd8] sm:$0xff] %vm279_vm0, %v2468_v46  ;;  %2499 = vst.msk [vmem:[#allocation3 + $0xd0] sm:$0xff] %vm279_vm0, %v2467_v50  ;;  %v6744_v9 = vld [vmem:[#allocation2 + $0x1a] sm:$0xff]  ;;  %v6752_v29 = vld [vmem:[#allocation2 + $0x32] sm:$0xff] }
 0x351   : > { %v6748_v10 = vld [vmem:[#allocation2 + $0x3a] sm:$0xff]  ;;  %v6757_v50 = vld [vmem:[#allocation2 + $0x52] sm:$0xff] }
 0x353   : > { %v5097_v58 = vpop.f32.mrb[28].mxu0 }
 0x354   : > { %v2334_v2 = vmul.f32 %v5097_v58, %v6474_v28  ;;  %v2279_v61 = vpop.f32.mrb[29].mxu0  ;;  %v6762_v58 = vld [vmem:[#allocation2 + $0x4a] sm:$0xff] }
 0x355   : > { %v2333_v62 = vmul.f32 %v6474_v28, %v2279_v61  ;;  %v2534_v59 = vld [vmem:[#allocation2 + $0x159] sm:$0xff]  ;;  %v6770_v61 = vld [vmem:[#allocation2 + $0x62] sm:$0xff] }
 0x356   : > { %v2373_v12 = vadd.f32 %v6481_v33, %v2334_v2  ;;  %2627 = vrot.lane.b32.xlu1 %v2534_v59, %s5201_s30  ;;  %v2533_v19 = vld [vmem:[#allocation2 + $0x151] sm:$0xff] }
 0x357   : > { %v2470_v31 = vld [vmem:[#allocation2 + $0x158] sm:$0xff]  ;;  %v2372_v32 = vadd.f32 %v6481_v33, %v2333_v62  ;;  %2625 = vrot.lane.b32.xlu0 %v2533_v19, %s5201_s30  ;;  %v2469_v34 = vld [vmem:[#allocation2 + $0x150] sm:$0xff] }
 0x358   : > { %2502 = vst.msk [vmem:[#allocation3 + $0xe8] sm:$0xff] %vm279_vm0, %v2470_v31  ;;  %v2405_v35 = vmax.f32 %v2373_v12, 0.0  ;;  %2501 = vst.msk [vmem:[#allocation3 + $0xe0] sm:$0xff] %vm279_vm0, %v2469_v34  ;;  %v6766_v2 = vld [vmem:[#allocation2 + $0x6a] sm:$0xff]  ;;  %v6775_v12 = vld [vmem:[#allocation2 + $0x82] sm:$0xff] }
 0x359   : > { %v2404_v36 = vmax.f32 %v2372_v32, 0.0  ;;  %v6780_v19 = vld [vmem:[#allocation2 + $0x7a] sm:$0xff]  ;;  %v6788_v32 = vld [vmem:[#allocation2 + $0x92] sm:$0xff] }
 0x35a   : > { %2438 = vst.msk [vmem:[#allocation2 + $0x171] sm:$0xff] %vm279_vm0, %v2405_v35  ;;  %v6784_v31 = vld [vmem:[#allocation2 + $0x9a] sm:$0xff] }
 0x35b   : > { %2437 = vst.msk [vmem:[#allocation2 + $0x169] sm:$0xff] %vm279_vm0, %v2404_v36  ;;  %v6793_v36 = vld [vmem:[#allocation2 + $0xb2] sm:$0xff] }
 0x360   : > { %v2576_v40 = vpop.permute.xlu1 %2575 }
 0x361   : > { %2668 = vst.msk [vmem:[#allocation3 + $0x18] sm:$0xff] %vm549_vm1, %v2576_v40  ;;  %v2574_v44 = vpop.permute.xlu0 %2573  ;;  %v2536_v45 = vld [vmem:[#allocation2 + $0x171] sm:$0xff] }
 0x362   : > { %2667 = vst.msk [vmem:[#allocation3 + $0x10] sm:$0xff] %vm549_vm1, %v2574_v44  ;;  %2631 = vrot.lane.b32.xlu1 %v2536_v45, %s5201_s30  ;;  %v2535_v17 = vld [vmem:[#allocation2 + $0x169] sm:$0xff] }
 0x363   : > { %v2472_v48 = vld [vmem:[#allocation2 + $0x170] sm:$0xff]  ;;  %2629 = vrot.lane.b32.xlu0 %v2535_v17, %s5201_s30  ;;  %v2471_v5 = vld [vmem:[#allocation2 + $0x168] sm:$0xff] }
 0x364   : > { %2504 = vst.msk [vmem:[#allocation3 + $0xf8] sm:$0xff] %vm279_vm0, %v2472_v48  ;;  %2503 = vst.msk [vmem:[#allocation3 + $0xf0] sm:$0xff] %vm279_vm0, %v2471_v5  ;;  %v6798_v40 = vld [vmem:[#allocation2 + $0xaa] sm:$0xff]  ;;  %v6806_v45 = vld [vmem:[#allocation2 + $0xc2] sm:$0xff] }
 0x365   : > { %v6802_v44 = vld [vmem:[#allocation2 + $0xca] sm:$0xff]  ;;  %v6816_v5 = vld [vmem:[#allocation2 + $0xda] sm:$0xff] }
 0x366   : > { %2763 = vrot.lane.b32.xlu1 %v2698_v3, %s5202_s8  ;;  %v6811_v3 = vld [vmem:[#allocation2 + $0xe2] sm:$0xff] }
 0x367   : > { %2761 = vrot.lane.b32.xlu0 %v2697_v63, %s5202_s8  ;;  %v2718_v63 = vld [vmem:[#allocation2 + $0xfa] sm:$0xff] }
 0x368   : > { %v2580_v56 = vpop.permute.xlu1 %2579 }
 0x369   : > { %2670 = vst.msk [vmem:[#allocation3 + $0x28] sm:$0xff] %vm549_vm1, %v2580_v56  ;;  %v2578_v57 = vpop.permute.xlu0 %2577  ;;  %v2717_v56 = vld [vmem:[#allocation2 + $0xf2] sm:$0xff] }
 0x36a   : > { %2669 = vst.msk [vmem:[#allocation3 + $0x20] sm:$0xff] %vm549_vm1, %v2578_v57  ;;  %2767 = vrot.lane.b32.xlu1 %v6739_v16, %s5202_s8 }
 0x36b   : > { %2765 = vrot.lane.b32.xlu0 %v6744_v9, %s5202_s8 }
 0x36e   : > { %2771 = vrot.lane.b32.xlu1 %v6748_v10, %s5202_s8 }
 0x36f   : > { %2769 = vrot.lane.b32.xlu0 %v6752_v29, %s5202_s8 }
 0x370   : > { %v2584_v42 = vpop.permute.xlu1 %2583 }
 0x371   : > { %2672 = vst.msk [vmem:[#allocation3 + $0x38] sm:$0xff] %vm549_vm1, %v2584_v42  ;;  %v2582_v46 = vpop.permute.xlu0 %2581 }
 0x372   : > { %2671 = vst.msk [vmem:[#allocation3 + $0x30] sm:$0xff] %vm549_vm1, %v2582_v46  ;;  %2775 = vrot.lane.b32.xlu1 %v6757_v50, %s5202_s8  ;;  %v2720_v46 = vld [vmem:[#allocation2 + $0x112] sm:$0xff] }
 0x373   : > { %2773 = vrot.lane.b32.xlu0 %v6762_v58, %s5202_s8 }
 0x376   : > { %2779 = vrot.lane.b32.xlu1 %v6766_v2, %s5202_s8 }
 0x377   : > { %2777 = vrot.lane.b32.xlu0 %v6770_v61, %s5202_s8 }
 0x378   : > { %v2588_v62 = vpop.permute.xlu1 %2587 }
 0x379   : > { %2674 = vst.msk [vmem:[#allocation3 + $0x48] sm:$0xff] %vm549_vm1, %v2588_v62  ;;  %v2586_v59 = vpop.permute.xlu0 %2585  ;;  %v2719_v62 = vld [vmem:[#allocation2 + $0x10a] sm:$0xff] }
 0x37a   : > { %2673 = vst.msk [vmem:[#allocation3 + $0x40] sm:$0xff] %vm549_vm1, %v2586_v59  ;;  %2783 = vrot.lane.b32.xlu1 %v6775_v12, %s5202_s8  ;;  %v2722_v59 = vld [vmem:[#allocation2 + $0x12a] sm:$0xff] }
 0x37b   : > { %2781 = vrot.lane.b32.xlu0 %v6780_v19, %s5202_s8 }
 0x37e   : > { %2787 = vrot.lane.b32.xlu1 %v6784_v31, %s5202_s8 }
 0x37f   : > { %2785 = vrot.lane.b32.xlu0 %v6788_v32, %s5202_s8 }
 0x380   : > { %v2592_v34 = vpop.permute.xlu1 %2591 }
 0x381   : > { %2676 = vst.msk [vmem:[#allocation3 + $0x58] sm:$0xff] %vm549_vm1, %v2592_v34  ;;  %v2590_v35 = vpop.permute.xlu0 %2589  ;;  %v2721_v34 = vld [vmem:[#allocation2 + $0x122] sm:$0xff] }
 0x382   : > { %2675 = vst.msk [vmem:[#allocation3 + $0x50] sm:$0xff] %vm549_vm1, %v2590_v35  ;;  %2791 = vrot.lane.b32.xlu1 %v6793_v36, %s5202_s8 }
 0x383   : > { %2789 = vrot.lane.b32.xlu0 %v6798_v40, %s5202_s8 }
 0x386   : > { %2795 = vrot.lane.b32.xlu1 %v6802_v44, %s5202_s8 }
 0x387   : > { %2793 = vrot.lane.b32.xlu0 %v6806_v45, %s5202_s8 }
 0x388   : > { %v2596_v17 = vpop.permute.xlu1 %2595 }
 0x389   : > { %2678 = vst.msk [vmem:[#allocation3 + $0x68] sm:$0xff] %vm549_vm1, %v2596_v17  ;;  %v2594_v48 = vpop.permute.xlu0 %2593 }
 0x38a   : > { %2677 = vst.msk [vmem:[#allocation3 + $0x60] sm:$0xff] %vm549_vm1, %v2594_v48  ;;  %2799 = vrot.lane.b32.xlu1 %v6811_v3, %s5202_s8  ;;  %v2724_v48 = vld [vmem:[#allocation2 + $0x142] sm:$0xff] }
 0x38b   : > { %2797 = vrot.lane.b32.xlu0 %v6816_v5, %s5202_s8 }
 0x38e   : > { %2803 = vrot.lane.b32.xlu1 %v2718_v63, %s5202_s8  ;;  %v2723_v63 = vld [vmem:[#allocation2 + $0x13a] sm:$0xff] }
 0x38f   : > { %2801 = vrot.lane.b32.xlu0 %v2717_v56, %s5202_s8  ;;  %v2726_v56 = vld [vmem:[#allocation2 + $0x15a] sm:$0xff] }
 0x390   : > { %v2600_v57 = vpop.permute.xlu1 %2599 }
 0x391   : > { %2680 = vst.msk [vmem:[#allocation3 + $0x78] sm:$0xff] %vm549_vm1, %v2600_v57  ;;  %v2598_v42 = vpop.permute.xlu0 %2597  ;;  %v2725_v57 = vld [vmem:[#allocation2 + $0x152] sm:$0xff] }
 0x392   : > { %2679 = vst.msk [vmem:[#allocation3 + $0x70] sm:$0xff] %vm549_vm1, %v2598_v42  ;;  %2807 = vrot.lane.b32.xlu1 %v2720_v46, %s5202_s8 }
 0x393   : > { %2805 = vrot.lane.b32.xlu0 %v2719_v62, %s5202_s8  ;;  %v2728_v62 = vld [vmem:[#allocation2 + $0x172] sm:$0xff] }
 0x396   : > { %2811 = vrot.lane.b32.xlu1 %v2722_v59, %s5202_s8  ;;  %v2727_v59 = vld [vmem:[#allocation2 + $0x16a] sm:$0xff] }
 0x397   : > { %2809 = vrot.lane.b32.xlu0 %v2721_v34, %s5202_s8 }
 0x398   : > { %v2604_v35 = vpop.permute.xlu1 %2603 }
 0x399   : > { %2682 = vst.msk [vmem:[#allocation3 + $0x88] sm:$0xff] %vm549_vm1, %v2604_v35  ;;  %v2602_v17 = vpop.permute.xlu0 %2601 }
 0x39a   : > { %2681 = vst.msk [vmem:[#allocation3 + $0x80] sm:$0xff] %vm549_vm1, %v2602_v17  ;;  %2815 = vrot.lane.b32.xlu1 %v2724_v48, %s5202_s8 }
 0x39b   : > { %2813 = vrot.lane.b32.xlu0 %v2723_v63, %s5202_s8 }
 0x39e   : > { %2819 = vrot.lane.b32.xlu1 %v2726_v56, %s5202_s8 }
 0x39f   : > { %2817 = vrot.lane.b32.xlu0 %v2725_v57, %s5202_s8 }
 0x3a0   : > { %v2608_v42 = vpop.permute.xlu1 %2607 }
 0x3a1   : > { %2684 = vst.msk [vmem:[#allocation3 + $0x98] sm:$0xff] %vm549_vm1, %v2608_v42  ;;  %v2606_v46 = vpop.permute.xlu0 %2605 }
 0x3a2   : > { %2683 = vst.msk [vmem:[#allocation3 + $0x90] sm:$0xff] %vm549_vm1, %v2606_v46  ;;  %2823 = vrot.lane.b32.xlu1 %v2728_v62, %s5202_s8 }
 0x3a3   : > { %2821 = vrot.lane.b32.xlu0 %v2727_v59, %s5202_s8  ;;  %v4078_v59 = vld [vmem:[%s7597_s2 + $0x20] sm:$0xf] }
 0x3a6   : > { %2955 = vrot.lane.b32.xlu1 %v6502_v6, %s5203_s9 }
 0x3a7   : > { %2953 = vrot.lane.b32.xlu0 %v6504_v7, %s5203_s9 }
 0x3a8   : > { %v2612_v34 = vpop.permute.xlu1 %2611 }
 0x3a9   : > { %2686 = vst.msk [vmem:[#allocation3 + $0xa8] sm:$0xff] %vm549_vm1, %v2612_v34  ;;  %v2610_v35 = vpop.permute.xlu0 %2609 }
 0x3aa   : > { %2685 = vst.msk [vmem:[#allocation3 + $0xa0] sm:$0xff] %vm549_vm1, %v2610_v35  ;;  %2959 = vrot.lane.b32.xlu1 %v6524_v15, %s5203_s9 }
 0x3ab   : > { %2957 = vrot.lane.b32.xlu0 %v6526_v18, %s5203_s9 }
 0x3ae   : > { %2963 = vrot.lane.b32.xlu1 %v6546_v55, %s5203_s9 }
 0x3af   : > { %2961 = vrot.lane.b32.xlu0 %v6548_v0, %s5203_s9 }
 0x3b0   : > { %v2616_v6 = vpop.permute.xlu1 %2615 }
 0x3b1   : > { %2688 = vst.msk [vmem:[#allocation3 + $0xb8] sm:$0xff] %vm549_vm1, %v2616_v6  ;;  %v2614_v7 = vpop.permute.xlu0 %2613 }
 0x3b2   : > { %2687 = vst.msk [vmem:[#allocation3 + $0xb0] sm:$0xff] %vm549_vm1, %v2614_v7  ;;  %2967 = vrot.lane.b32.xlu1 %v6568_v23, %s5203_s9 }
 0x3b3   : > { %2965 = vrot.lane.b32.xlu0 %v6575_v25, %s5203_s9 }
 0x3b6   : > { %2971 = vrot.lane.b32.xlu1 %v6590_v39, %s5203_s9 }
 0x3b7   : > { %2969 = vrot.lane.b32.xlu0 %v6597_v41, %s5203_s9 }
 0x3b8   : > { %v2620_v17 = vpop.permute.xlu1 %2619 }
 0x3b9   : > { %2690 = vst.msk [vmem:[#allocation3 + $0xc8] sm:$0xff] %vm549_vm1, %v2620_v17  ;;  %v2618_v48 = vpop.permute.xlu0 %2617 }
 0x3ba   : > { %2689 = vst.msk [vmem:[#allocation3 + $0xc0] sm:$0xff] %vm549_vm1, %v2618_v48  ;;  %2975 = vrot.lane.b32.xlu1 %v6607_v60, %s5203_s9 }
 0x3bb   : > { %2973 = vrot.lane.b32.xlu0 %v6613_v8, %s5203_s9 }
 0x3be   : > { %2979 = vrot.lane.b32.xlu1 %v6623_v43, %s5203_s9 }
 0x3bf   : > { %2977 = vrot.lane.b32.xlu0 %v6629_v47, %s5203_s9 }
 0x3c0   : > { %v2624_v63 = vpop.permute.xlu1 %2623 }
 0x3c1   : > { %2692 = vst.msk [vmem:[#allocation3 + $0xd8] sm:$0xff] %vm549_vm1, %v2624_v63  ;;  %v2622_v56 = vpop.permute.xlu0 %2621 }
 0x3c2   : > { %2691 = vst.msk [vmem:[#allocation3 + $0xd0] sm:$0xff] %vm549_vm1, %v2622_v56  ;;  %2983 = vrot.lane.b32.xlu1 %v6639_v24, %s5203_s9  ;;  %v5100_v56 = vpop.f32.mrb[30].mxu0 }
 0x3c3   : > { %2981 = vrot.lane.b32.xlu0 %v6645_v27, %s5203_s9 }
 0x3c6   : > { %3147 = vrot.lane.b32.xlu1 %v6495_v52, %s5204_s10  ;;  %v4074_v52 = vld [vmem:[%s7597_s2] sm:$0xff] }
 0x3c7   : > { %3145 = vrot.lane.b32.xlu0 %v6500_v53, %s5204_s10  ;;  %v4075_v53 = vld [vmem:[%s7597_s2 + $0x8] sm:$0xff] }
 0x3c8   : > { %v2628_v57 = vpop.permute.xlu1 %2627  ;;  %v5167_v46 = vpack.c.bf16 %v4075_v53, %v4074_v52 }
 0x3c9   : > { %2694 = vst.msk [vmem:[#allocation3 + $0xe8] sm:$0xff] %vm549_vm1, %v2628_v57  ;;  %v2626_v42 = vpop.permute.xlu0 %2625  ;;  %v2336_v57 = vmul.f32 %v5100_v56, %v6474_v28 }
 0x3ca   : > { %2693 = vst.msk [vmem:[#allocation3 + $0xe0] sm:$0xff] %vm549_vm1, %v2626_v42  ;;  %3339 = vrot.lane.b32.xlu1 %v6739_v16, %s5205_s11  ;;  %5168 = vmatprep.subr.bf16.mxu1 %v5167_v46  ;;  %v4077_v16 = vld [vmem:[%s7597_s2 + $0x18] sm:$0xff]  ;;  %v2289_v42 = vpop.f32.mrb[31].mxu0 }
 0x3cb   : > { %3337 = vrot.lane.b32.xlu0 %v6744_v9, %s5205_s11  ;;  %5170 = vmatpush3.bf16.msra.mxu1 %v5167_v46  ;;  %v2335_v52 = vmul.f32 %v6474_v28, %v2289_v42  ;;  %v2375_v53 = vadd.f32 %v6481_v33, %v2336_v57 }
 0x3cd   : > { %v2374_v46 = vadd.f32 %v6481_v33, %v2335_v52 }
 0x3ce   : > { %3532 = vrot.lane.b32.xlu1 %v6524_v15, %s5206_s12  ;;  %v4076_v15 = vld [vmem:[%s7597_s2 + $0x10] sm:$0xff] }
 0x3cf   : > { %3530 = vrot.lane.b32.xlu0 %v6526_v18, %s5206_s12  ;;  %v5171_v9 = vpack.c.bf16 %v4077_v16, %v4076_v15  ;;  %v2406_v16 = vmax.f32 %v2374_v46, 0.0  ;;  %v3095_v46 = vld [vmem:[#allocation2 + $0xc1] sm:$0xff] }
 0x3d1   : > { %5172 = vmatprep.subr.bf16.mxu1 %v5171_v9  ;;  %2439 = vst.msk [vmem:[#allocation2 + $0x181] sm:$0xff] %vm279_vm0, %v2406_v16 }
 0x3d2   : > { %3149 = vrot.lane.b32.xlu1 %v6522_v14, %s5204_s10  ;;  %5174 = vmatpush3.bf16.msra.mxu1 %v5171_v9 }
 0x3d3   : > { %3722 = vrot.lane.b32.xlu0 %v6522_v14, %s5207_s23  ;;  %5109 = vmatprep.subr.msk.mxu1 %vm2069_vm6, %v4078_v59 }
 0x3d4   : > { %v2632_v62 = vpop.permute.xlu1 %2631 }
 0x3d5   : > { %2696 = vst.msk [vmem:[#allocation3 + $0xf8] sm:$0xff] %vm549_vm1, %v2632_v62  ;;  %v2630_v18 = vpop.permute.xlu0 %2629 }
 0x3d6   : > { %2695 = vst.msk [vmem:[#allocation3 + $0xf0] sm:$0xff] %vm549_vm1, %v2630_v18  ;;  %3914 = vrot.lane.b32.xlu1 %v6752_v29, %s5208_s26  ;;  %5110 = vmatpush3.msk.msra.mxu1 %vm2069_vm6, %v4078_v59 }
 0x3d7   : > { %3724 = vrot.lane.b32.xlu0 %v6517_v11, %s5207_s23 }
 0x3d8   : > { %v2764_v14 = vpop.permute.xlu1 %2763 }
 0x3d9   : > { %2858 = vst.msk [vmem:[#allocation3 + $0x8] sm:$0xff] %vm742_vm2, %v2764_v14  ;;  %v2762_v34 = vpop.permute.xlu0 %2761 }
 0x3da   : > { %2857 = vst.msk [vmem:[#allocation3] sm:$0xff] %vm742_vm2, %v2762_v34  ;;  %3341 = vrot.lane.b32.xlu1 %v6752_v29, %s5205_s11 }
 0x3db   : > { %3151 = vrot.lane.b32.xlu0 %v6517_v11, %s5204_s10 }
 0x3dc   : > { %v2768_v35 = vpop.permute.xlu1 %2767 }
 0x3dd   : > { %2860 = vst.msk [vmem:[#allocation3 + $0x18] sm:$0xff] %vm742_vm2, %v2768_v35  ;;  %v2766_v6 = vpop.permute.xlu0 %2765 }
 0x3de   : > { %2859 = vst.msk [vmem:[#allocation3 + $0x10] sm:$0xff] %vm742_vm2, %v2766_v6  ;;  %3343 = vrot.lane.b32.xlu1 %v6748_v10, %s5205_s11 }
 0x3df   : > { %3916 = vrot.lane.b32.xlu0 %v6748_v10, %s5208_s26 }
 0x3e0   : > { %v2772_v7 = vpop.permute.xlu1 %2771 }
 0x3e1   : > { %2862 = vst.msk [vmem:[#allocation3 + $0x28] sm:$0xff] %vm742_vm2, %v2772_v7  ;;  %v2770_v29 = vpop.permute.xlu0 %2769 }
 0x3e2   : > { %2861 = vst.msk [vmem:[#allocation3 + $0x20] sm:$0xff] %vm742_vm2, %v2770_v29  ;;  %3536 = vrot.lane.b32.xlu1 %v6546_v55, %s5206_s12  ;;  %v3091_v29 = vld [vmem:[#allocation2 + $0x91] sm:$0xff] }
 0x3e3   : > { %3534 = vrot.lane.b32.xlu0 %v6548_v0, %s5206_s12 }
 0x3e4   : > { %v2776_v11 = vpop.permute.xlu1 %2775 }
 0x3e5   : > { %2864 = vst.msk [vmem:[#allocation3 + $0x38] sm:$0xff] %vm742_vm2, %v2776_v11  ;;  %v2774_v17 = vpop.permute.xlu0 %2773 }
 0x3e6   : > { %2863 = vst.msk [vmem:[#allocation3 + $0x30] sm:$0xff] %vm742_vm2, %v2774_v17  ;;  %3153 = vrot.lane.b32.xlu1 %v6544_v54, %s5204_s10 }
 0x3e7   : > { %3726 = vrot.lane.b32.xlu0 %v6544_v54, %s5207_s23 }
 0x3e8   : > { %v2780_v10 = vpop.permute.xlu1 %2779 }
 0x3e9   : > { %2866 = vst.msk [vmem:[#allocation3 + $0x48] sm:$0xff] %vm742_vm2, %v2780_v10  ;;  %v2778_v48 = vpop.permute.xlu0 %2777 }
 0x3ea   : > { %2865 = vst.msk [vmem:[#allocation3 + $0x40] sm:$0xff] %vm742_vm2, %v2778_v48  ;;  %3918 = vrot.lane.b32.xlu1 %v6762_v58, %s5208_s26 }
 0x3eb   : > { %3728 = vrot.lane.b32.xlu0 %v6539_v51, %s5207_s23 }
 0x3ec   : > { %v2784_v55 = vpop.permute.xlu1 %2783 }
 0x3ed   : > { %2868 = vst.msk [vmem:[#allocation3 + $0x58] sm:$0xff] %vm742_vm2, %v2784_v55  ;;  %v2782_v0 = vpop.permute.xlu0 %2781 }
 0x3ee   : > { %2867 = vst.msk [vmem:[#allocation3 + $0x50] sm:$0xff] %vm742_vm2, %v2782_v0  ;;  %3345 = vrot.lane.b32.xlu1 %v6762_v58, %s5205_s11 }
 0x3ef   : > { %3155 = vrot.lane.b32.xlu0 %v6539_v51, %s5204_s10 }
 0x3f0   : > { %v2788_v54 = vpop.permute.xlu1 %2787 }
 0x3f1   : > { %2870 = vst.msk [vmem:[#allocation3 + $0x68] sm:$0xff] %vm742_vm2, %v2788_v54  ;;  %v2786_v63 = vpop.permute.xlu0 %2785 }
 0x3f2   : > { %2869 = vst.msk [vmem:[#allocation3 + $0x60] sm:$0xff] %vm742_vm2, %v2786_v63  ;;  %3347 = vrot.lane.b32.xlu1 %v6757_v50, %s5205_s11  ;;  %v3093_v63 = vld [vmem:[#allocation2 + $0xa9] sm:$0xff] }
 0x3f3   : > { %3920 = vrot.lane.b32.xlu0 %v6757_v50, %s5208_s26  ;;  %v2407_v50 = vmax.f32 %v2375_v53, 0.0 }
 0x3f4   : > { %v2792_v58 = vpop.permute.xlu1 %2791 }
 0x3f5   : > { %2872 = vst.msk [vmem:[#allocation3 + $0x78] sm:$0xff] %vm742_vm2, %v2792_v58  ;;  %v2790_v51 = vpop.permute.xlu0 %2789 }
 0x3f6   : > { %2871 = vst.msk [vmem:[#allocation3 + $0x70] sm:$0xff] %vm742_vm2, %v2790_v51  ;;  %3540 = vrot.lane.b32.xlu1 %v6568_v23, %s5206_s12 }
 0x3f7   : > { %3538 = vrot.lane.b32.xlu0 %v6575_v25, %s5206_s12  ;;  %2440 = vst.msk [vmem:[#allocation2 + $0x189] sm:$0xff] %vm279_vm0, %v2407_v50 }
 0x3f8   : > { %v2796_v15 = vpop.permute.xlu1 %2795 }
 0x3f9   : > { %2874 = vst.msk [vmem:[#allocation3 + $0x88] sm:$0xff] %vm742_vm2, %v2796_v15  ;;  %v2794_v28 = vpop.permute.xlu0 %2793 }
 0x3fa   : > { %2873 = vst.msk [vmem:[#allocation3 + $0x80] sm:$0xff] %vm742_vm2, %v2794_v28  ;;  %3157 = vrot.lane.b32.xlu1 %v6566_v22, %s5204_s10 }
 0x3fb   : > { %3730 = vrot.lane.b32.xlu0 %v6566_v22, %s5207_s23 }
 0x3fc   : > { %v2800_v33 = vpop.permute.xlu1 %2799 }
 0x3fd   : > { %2876 = vst.msk [vmem:[#allocation3 + $0x98] sm:$0xff] %vm742_vm2, %v2800_v33  ;;  %v2798_v23 = vpop.permute.xlu0 %2797 }
 0x3fe   : > { %2875 = vst.msk [vmem:[#allocation3 + $0x90] sm:$0xff] %vm742_vm2, %v2798_v23  ;;  %3922 = vrot.lane.b32.xlu1 %v6770_v61, %s5208_s26 }
 0x3ff   : > { %3732 = vrot.lane.b32.xlu0 %v6561_v20, %s5207_s23 }
 0x400   : > { %v2804_v25 = vpop.permute.xlu1 %2803 }
 0x401   : > { %2878 = vst.msk [vmem:[#allocation3 + $0xa8] sm:$0xff] %vm742_vm2, %v2804_v25  ;;  %v2802_v9 = vpop.permute.xlu0 %2801 }
 0x402   : > { %2877 = vst.msk [vmem:[#allocation3 + $0xa0] sm:$0xff] %vm742_vm2, %v2802_v9  ;;  %3349 = vrot.lane.b32.xlu1 %v6770_v61, %s5205_s11 }
 0x403   : > { %3159 = vrot.lane.b32.xlu0 %v6561_v20, %s5204_s10 }
 0x404   : > { %v2808_v22 = vpop.permute.xlu1 %2807 }
 0x405   : > { %2880 = vst.msk [vmem:[#allocation3 + $0xb8] sm:$0xff] %vm742_vm2, %v2808_v22  ;;  %v2806_v62 = vpop.permute.xlu0 %2805 }
 0x406   : > { %2879 = vst.msk [vmem:[#allocation3 + $0xb0] sm:$0xff] %vm742_vm2, %v2806_v62  ;;  %3351 = vrot.lane.b32.xlu1 %v6766_v2, %s5205_s11 }
 0x407   : > { %3924 = vrot.lane.b32.xlu0 %v6766_v2, %s5208_s26 }
 0x408   : > { %v2812_v18 = vpop.permute.xlu1 %2811 }
 0x409   : > { %2882 = vst.msk [vmem:[#allocation3 + $0xc8] sm:$0xff] %vm742_vm2, %v2812_v18  ;;  %v2810_v59 = vpop.permute.xlu0 %2809 }
 0x40a   : > { %2881 = vst.msk [vmem:[#allocation3 + $0xc0] sm:$0xff] %vm742_vm2, %v2810_v59  ;;  %3544 = vrot.lane.b32.xlu1 %v6590_v39, %s5206_s12 }
 0x40b   : > { %3542 = vrot.lane.b32.xlu0 %v6597_v41, %s5206_s12 }
 0x40c   : > { %v2816_v20 = vpop.permute.xlu1 %2815 }
 0x40d   : > { %2884 = vst.msk [vmem:[#allocation3 + $0xd8] sm:$0xff] %vm742_vm2, %v2816_v20  ;;  %v2814_v61 = vpop.permute.xlu0 %2813 }
 0x40e   : > { %2883 = vst.msk [vmem:[#allocation3 + $0xd0] sm:$0xff] %vm742_vm2, %v2814_v61  ;;  %3161 = vrot.lane.b32.xlu1 %v6588_v38, %s5204_s10  ;;  %v3673_v61 = vld [vmem:[#allocation2 + $0xe1] sm:$0xff] }
 0x40f   : > { %3734 = vrot.lane.b32.xlu0 %v6588_v38, %s5207_s23  ;;  %v3090_v38 = vld [vmem:[#allocation2 + $0x81] sm:$0xff] }
 0x410   : > { %v2820_v2 = vpop.permute.xlu1 %2819 }
 0x411   : > { %2886 = vst.msk [vmem:[#allocation3 + $0xe8] sm:$0xff] %vm742_vm2, %v2820_v2  ;;  %v2818_v14 = vpop.permute.xlu0 %2817 }
 0x412   : > { %2885 = vst.msk [vmem:[#allocation3 + $0xe0] sm:$0xff] %vm742_vm2, %v2818_v14  ;;  %3926 = vrot.lane.b32.xlu1 %v6780_v19, %s5208_s26 }
 0x413   : > { %3736 = vrot.lane.b32.xlu0 %v6583_v37, %s5207_s23 }
 0x414   : > { %v2824_v39 = vpop.permute.xlu1 %2823 }
 0x415   : > { %2888 = vst.msk [vmem:[#allocation3 + $0xf8] sm:$0xff] %vm742_vm2, %v2824_v39  ;;  %v2822_v41 = vpop.permute.xlu0 %2821 }
 0x416   : > { %2887 = vst.msk [vmem:[#allocation3 + $0xf0] sm:$0xff] %vm742_vm2, %v2822_v41  ;;  %3353 = vrot.lane.b32.xlu1 %v6780_v19, %s5205_s11 }
 0x417   : > { %3163 = vrot.lane.b32.xlu0 %v3090_v38, %s5204_s10 }
 0x418   : > { %v2956_v34 = vpop.permute.xlu1 %2955 }
 0x419   : > { %3050 = vst.msk [vmem:[#allocation3 + $0x8] sm:$0xff] %vm936_vm3, %v2956_v34  ;;  %v2954_v35 = vpop.permute.xlu0 %2953 }
 0x41a   : > { %3049 = vst.msk [vmem:[#allocation3] sm:$0xff] %vm936_vm3, %v2954_v35  ;;  %3355 = vrot.lane.b32.xlu1 %v6775_v12, %s5205_s11 }
 0x41b   : > { %3928 = vrot.lane.b32.xlu0 %v6775_v12, %s5208_s26 }
 0x41c   : > { %v2960_v37 = vpop.permute.xlu1 %2959 }
 0x41d   : > { %3052 = vst.msk [vmem:[#allocation3 + $0x18] sm:$0xff] %vm936_vm3, %v2960_v37  ;;  %v2958_v6 = vpop.permute.xlu0 %2957  ;;  %v3674_v37 = vld [vmem:[#allocation2 + $0xf1] sm:$0xff] }
 0x41e   : > { %3051 = vst.msk [vmem:[#allocation3 + $0x10] sm:$0xff] %vm936_vm3, %v2958_v6  ;;  %3548 = vrot.lane.b32.xlu1 %v6607_v60, %s5206_s12  ;;  %v3667_v60 = vld [vmem:[#allocation2 + $0x99] sm:$0xff] }
 0x41f   : > { %3546 = vrot.lane.b32.xlu0 %v6613_v8, %s5206_s12 }
 0x420   : > { %v2964_v19 = vpop.permute.xlu1 %2963 }
 0x421   : > { %3054 = vst.msk [vmem:[#allocation3 + $0x28] sm:$0xff] %vm936_vm3, %v2964_v19  ;;  %v2962_v7 = vpop.permute.xlu0 %2961 }
 0x422   : > { %3053 = vst.msk [vmem:[#allocation3 + $0x20] sm:$0xff] %vm936_vm3, %v2962_v7  ;;  %3165 = vrot.lane.b32.xlu1 %v3091_v29, %s5204_s10 }
 0x423   : > { %3738 = vrot.lane.b32.xlu0 %v3091_v29, %s5207_s23  ;;  %v3866_v29 = vld [vmem:[#allocation2 + $0xf2] sm:$0xff] }
 0x424   : > { %v2968_v12 = vpop.permute.xlu1 %2967 }
 0x425   : > { %3056 = vst.msk [vmem:[#allocation3 + $0x38] sm:$0xff] %vm936_vm3, %v2968_v12  ;;  %v2966_v11 = vpop.permute.xlu0 %2965  ;;  %v3675_v12 = vld [vmem:[#allocation2 + $0xf9] sm:$0xff] }
 0x426   : > { %3055 = vst.msk [vmem:[#allocation3 + $0x30] sm:$0xff] %vm936_vm3, %v2966_v11  ;;  %3930 = vrot.lane.b32.xlu1 %v6788_v32, %s5208_s26 }
 0x427   : > { %3740 = vrot.lane.b32.xlu0 %v3667_v60, %s5207_s23 }
 0x428   : > { %v2972_v8 = vpop.permute.xlu1 %2971 }
 0x429   : > { %3058 = vst.msk [vmem:[#allocation3 + $0x48] sm:$0xff] %vm936_vm3, %v2972_v8  ;;  %v2970_v17 = vpop.permute.xlu0 %2969 }
 0x42a   : > { %3057 = vst.msk [vmem:[#allocation3 + $0x40] sm:$0xff] %vm936_vm3, %v2970_v17  ;;  %3357 = vrot.lane.b32.xlu1 %v6788_v32, %s5205_s11 }
 0x42b   : > { %3167 = vrot.lane.b32.xlu0 %v3667_v60, %s5204_s10 }
 0x42c   : > { %v2976_v10 = vpop.permute.xlu1 %2975 }
 0x42d   : > { %3060 = vst.msk [vmem:[#allocation3 + $0x58] sm:$0xff] %vm936_vm3, %v2976_v10  ;;  %v2974_v48 = vpop.permute.xlu0 %2973  ;;  %v3292_v10 = vld [vmem:[#allocation2 + $0xfa] sm:$0xff] }
 0x42e   : > { %3059 = vst.msk [vmem:[#allocation3 + $0x50] sm:$0xff] %vm936_vm3, %v2974_v48  ;;  %3359 = vrot.lane.b32.xlu1 %v6784_v31, %s5205_s11 }
 0x42f   : > { %3932 = vrot.lane.b32.xlu0 %v6784_v31, %s5208_s26 }
 0x430   : > { %v2980_v55 = vpop.permute.xlu1 %2979 }
 0x431   : > { %3062 = vst.msk [vmem:[#allocation3 + $0x68] sm:$0xff] %vm936_vm3, %v2980_v55  ;;  %v2978_v0 = vpop.permute.xlu0 %2977 }
 0x432   : > { %3061 = vst.msk [vmem:[#allocation3 + $0x60] sm:$0xff] %vm936_vm3, %v2978_v0  ;;  %3552 = vrot.lane.b32.xlu1 %v6623_v43, %s5206_s12  ;;  %v3669_v43 = vld [vmem:[#allocation2 + $0xb1] sm:$0xff] }
 0x433   : > { %3550 = vrot.lane.b32.xlu0 %v6629_v47, %s5206_s12 }
 0x434   : > { %v2984_v32 = vpop.permute.xlu1 %2983 }
 0x435   : > { %3064 = vst.msk [vmem:[#allocation3 + $0x78] sm:$0xff] %vm936_vm3, %v2984_v32  ;;  %v2982_v54 = vpop.permute.xlu0 %2981 }
 0x436   : > { %3063 = vst.msk [vmem:[#allocation3 + $0x70] sm:$0xff] %vm936_vm3, %v2982_v54  ;;  %3169 = vrot.lane.b32.xlu1 %v3093_v63, %s5204_s10 }
 0x437   : > { %3742 = vrot.lane.b32.xlu0 %v3093_v63, %s5207_s23  ;;  %v3676_v63 = vld [vmem:[#allocation2 + $0x109] sm:$0xff] }
 0x438   : > { %v3148_v31 = vpop.permute.xlu1 %3147 }
 0x439   : > { %3242 = vst.msk [vmem:[#allocation3 + $0x8] sm:$0xff] %vm1129_vm4, %v3148_v31  ;;  %v3146_v56 = vpop.permute.xlu0 %3145 }
 0x43a   : > { %3241 = vst.msk [vmem:[#allocation3] sm:$0xff] %vm1129_vm4, %v3146_v56  ;;  %3934 = vrot.lane.b32.xlu1 %v6798_v40, %s5208_s26 }
 0x43b   : > { %3744 = vrot.lane.b32.xlu0 %v3669_v43, %s5207_s23 }
 0x43c   : > { %v3340_v47 = vpop.permute.xlu1 %3339 }
 0x43d   : > { %3434 = vst.msk [vmem:[#allocation3 + $0x8] sm:$0xff] %vm1322_vm5, %v3340_v47  ;;  %v3338_v57 = vpop.permute.xlu0 %3337  ;;  %v3868_v47 = vld [vmem:[#allocation2 + $0x10a] sm:$0xff] }
 0x43e   : > { %3433 = vst.msk [vmem:[#allocation3] sm:$0xff] %vm1322_vm5, %v3338_v57  ;;  %3361 = vrot.lane.b32.xlu1 %v6798_v40, %s5205_s11 }
 0x43f   : > { %3171 = vrot.lane.b32.xlu0 %v3669_v43, %s5204_s10 }
 0x440   : > { %v3533_v42 = vpop.permute.xlu1 %3532 }
 0x441   : > { %3627 = vst.msk [vmem:[#allocation3 + $0x8] sm:$0xff] %vm1516_vm7, %v3533_v42  ;;  %v3531_v58 = vpop.permute.xlu0 %3530  ;;  %v3677_v42 = vld [vmem:[#allocation2 + $0x111] sm:$0xff] }
 0x442   : > { %3626 = vst.msk [vmem:[#allocation3] sm:$0xff] %vm1516_vm7, %v3531_v58  ;;  %3363 = vrot.lane.b32.xlu1 %v6793_v36, %s5205_s11 }
 0x443   : > { %3936 = vrot.lane.b32.xlu0 %v6793_v36, %s5208_s26 }
 0x444   : > { %v3150_v52 = vpop.permute.xlu1 %3149 }
 0x445   : > { %3243 = vst.msk [vmem:[#allocation3 + $0x10] sm:$0xff] %vm1129_vm4, %v3150_v52  ;;  %v3723_v51 = vpop.permute.xlu0 %3722 }
 0x446   : > { %3818 = vst.msk [vmem:[#allocation3] sm:$0xff] %vm1709_vm8, %v3723_v51  ;;  %3556 = vrot.lane.b32.xlu1 %v6639_v24, %s5206_s12  ;;  %v3671_v24 = vld [vmem:[#allocation2 + $0xc9] sm:$0xff] }
 0x447   : > { %3554 = vrot.lane.b32.xlu0 %v6645_v27, %s5206_s12 }
 0x448   : > { %v3915_v40 = vpop.permute.xlu1 %3914 }
 0x449   : > { %4010 = vst.msk [vmem:[#allocation3] sm:$0xff] %vm1902_vm9, %v3915_v40  ;;  %v3725_v53 = vpop.permute.xlu0 %3724  ;;  %v3294_v40 = vld [vmem:[#allocation2 + $0x112] sm:$0xff] }
 0x44a   : > { %3819 = vst.msk [vmem:[#allocation3 + $0x8] sm:$0xff] %vm1709_vm8, %v3725_v53  ;;  %3173 = vrot.lane.b32.xlu1 %v3095_v46, %s5204_s10 }
 0x44b   : > { %3746 = vrot.lane.b32.xlu0 %v3095_v46, %s5207_s23 }
 0x44c   : > { %v3342_v36 = vpop.permute.xlu1 %3341 }
 0x44d   : > { %3435 = vst.msk [vmem:[#allocation3 + $0x10] sm:$0xff] %vm1322_vm5, %v3342_v36  ;;  %v3152_v50 = vpop.permute.xlu0 %3151 }
 0x44e   : > { %3244 = vst.msk [vmem:[#allocation3 + $0x18] sm:$0xff] %vm1129_vm4, %v3152_v50  ;;  %3938 = vrot.lane.b32.xlu1 %v6806_v45, %s5208_s26 }
 0x44f   : > { %3748 = vrot.lane.b32.xlu0 %v3671_v24, %s5207_s23 }
 0x450   : > { %v3344_v27 = vpop.permute.xlu1 %3343  ;;  %v4042_v15 = vld [vmem:[#allocation3] sm:$0xff] }
 0x451   : > { %3436 = vst.msk [vmem:[#allocation3 + $0x18] sm:$0xff] %vm1322_vm5, %v3344_v27  ;;  %5111 = vmatprep.mubr.msk.f32.mxu1 %vm1972_vm10, %v4042_v15  ;;  %v3917_v16 = vpop.permute.xlu0 %3916  ;;  %v3678_v27 = vld [vmem:[#allocation2 + $0x121] sm:$0xff] }
 0x452   : > { %4011 = vst.msk [vmem:[#allocation3 + $0x8] sm:$0xff] %vm1902_vm9, %v3917_v16  ;;  %3365 = vrot.lane.b32.xlu1 %v6806_v45, %s5205_s11  ;;  %v3487_v15 = vld [vmem:[#allocation2 + $0x128] sm:$0xff] }
 0x453   : > { %3175 = vrot.lane.b32.xlu0 %v3671_v24, %s5204_s10 }
 0x454   : > { %v3537_v28 = vpop.permute.xlu1 %3536 }
 0x455   : > { %3629 = vst.msk [vmem:[#allocation3 + $0x18] sm:$0xff] %vm1516_vm7, %v3537_v28  ;;  %v3535_v33 = vpop.permute.xlu0 %3534 }
 0x456   : > { %3628 = vst.msk [vmem:[#allocation3 + $0x10] sm:$0xff] %vm1516_vm7, %v3535_v33  ;;  %3367 = vrot.lane.b32.xlu1 %v6802_v44, %s5205_s11 }
 0x457   : > { %3940 = vrot.lane.b32.xlu0 %v6802_v44, %s5208_s26  ;;  %v3672_v44 = vld [vmem:[#allocation2 + $0xd9] sm:$0xff] }
 0x458   : > { %v3154_v23 = vpop.permute.xlu1 %3153 }
 0x459   : > { %3245 = vst.msk [vmem:[#allocation3 + $0x20] sm:$0xff] %vm1129_vm4, %v3154_v23  ;;  %v3727_v25 = vpop.permute.xlu0 %3726  ;;  %v4043_v9 = vld [vmem:[#allocation3 + $0x8] sm:$0xff] }
 0x45a   : > { %3820 = vst.msk [vmem:[#allocation3 + $0x10] sm:$0xff] %vm1709_vm8, %v3727_v25  ;;  %2985 = vrot.lane.b32.xlu1 %v6661_v49, %s5203_s9  ;;  %5112 = vmatmul.mubr.msk.f32.vlgmr.msra.gmra.mrb[0].mxu1 %vm1972_vm10, %v4043_v9  ;;  %v3870_v25 = vld [vmem:[#allocation2 + $0x122] sm:$0xff] }
 0x45b   : > { %3558 = vrot.lane.b32.xlu0 %v6661_v49, %s5206_s12  ;;  %v3679_v9 = vld [vmem:[#allocation2 + $0x129] sm:$0xff] }
 0x45c   : > { %v3919_v45 = vpop.permute.xlu1 %3918 }
 0x45d   : > { %4012 = vst.msk [vmem:[#allocation3 + $0x10] sm:$0xff] %vm1902_vm9, %v3919_v45  ;;  %v3729_v22 = vpop.permute.xlu0 %3728 }
 0x45e   : > { %3821 = vst.msk [vmem:[#allocation3 + $0x18] sm:$0xff] %vm1709_vm8, %v3729_v22  ;;  %3750 = vrot.lane.b32.xlu1 %v3672_v44, %s5207_s23 }
 0x45f   : > { %3560 = vrot.lane.b32.xlu0 %v6655_v1, %s5206_s12 }
 0x460   : > { %v3346_v62 = vpop.permute.xlu1 %3345 }
 0x461   : > { %3437 = vst.msk [vmem:[#allocation3 + $0x20] sm:$0xff] %vm1322_vm5, %v3346_v62  ;;  %v3156_v18 = vpop.permute.xlu0 %3155 }
 0x462   : > { %3246 = vst.msk [vmem:[#allocation3 + $0x28] sm:$0xff] %vm1129_vm4, %v3156_v18  ;;  %3177 = vrot.lane.b32.xlu1 %v3672_v44, %s5204_s10 }
 0x463   : > { %2987 = vrot.lane.b32.xlu0 %v6655_v1, %s5203_s9 }
 0x464   : > { %v3348_v49 = vpop.permute.xlu1 %3347  ;;  %v4044_v59 = vld [vmem:[#allocation3 + $0x10] sm:$0xff] }
 0x465   : > { %3438 = vst.msk [vmem:[#allocation3 + $0x28] sm:$0xff] %vm1322_vm5, %v3348_v49  ;;  %5114 = vmatprep.mubr.msk.f32.mxu1 %vm1972_vm10, %v4044_v59  ;;  %v3921_v20 = vpop.permute.xlu0 %3920  ;;  %v3296_v49 = vld [vmem:[#allocation2 + $0x12a] sm:$0xff] }
 0x466   : > { %4013 = vst.msk [vmem:[#allocation3 + $0x18] sm:$0xff] %vm1902_vm9, %v3921_v20  ;;  %3942 = vrot.lane.b32.xlu1 %v6816_v5, %s5208_s26 }
 0x467   : > { %3752 = vrot.lane.b32.xlu0 %v3673_v61, %s5207_s23 }
 0x468   : > { %v3541_v2 = vpop.permute.xlu1 %3540 }
 0x469   : > { %3631 = vst.msk [vmem:[#allocation3 + $0x28] sm:$0xff] %vm1516_vm7, %v3541_v2  ;;  %v3539_v14 = vpop.permute.xlu0 %3538 }
 0x46a   : > { %3630 = vst.msk [vmem:[#allocation3 + $0x20] sm:$0xff] %vm1516_vm7, %v3539_v14  ;;  %3369 = vrot.lane.b32.xlu1 %v6816_v5, %s5205_s11 }
 0x46b   : > { %3179 = vrot.lane.b32.xlu0 %v3673_v61, %s5204_s10  ;;  %v2913_v61 = vld [vmem:[#allocation2 + $0x138] sm:$0xff] }
 0x46c   : > { %v3158_v1 = vpop.permute.xlu1 %3157 }
 0x46d   : > { %3247 = vst.msk [vmem:[#allocation3 + $0x30] sm:$0xff] %vm1129_vm4, %v3158_v1  ;;  %v3731_v39 = vpop.permute.xlu0 %3730  ;;  %v4045_v41 = vld [vmem:[#allocation3 + $0x18] sm:$0xff]  ;;  %v3680_v1 = vld [vmem:[#allocation2 + $0x139] sm:$0xff] }
 0x46e   : > { %3822 = vst.msk [vmem:[#allocation3 + $0x20] sm:$0xff] %vm1709_vm8, %v3731_v39  ;;  %3371 = vrot.lane.b32.xlu1 %v6811_v3, %s5205_s11  ;;  %5115 = vmatmul.mubr.msk.f32.gmra.mrb[2].mxu1 %vm1972_vm10, %v4045_v41  ;;  %v3489_v41 = vld [vmem:[#allocation2 + $0x140] sm:$0xff] }
 0x46f   : > { %3944 = vrot.lane.b32.xlu0 %v6811_v3, %s5208_s26 }
 0x470   : > { %v3923_v38 = vpop.permute.xlu1 %3922 }
 0x471   : > { %4014 = vst.msk [vmem:[#allocation3 + $0x20] sm:$0xff] %vm1902_vm9, %v3923_v38  ;;  %v3733_v5 = vpop.permute.xlu0 %3732 }
 0x472   : > { %3823 = vst.msk [vmem:[#allocation3 + $0x28] sm:$0xff] %vm1709_vm8, %v3733_v5  ;;  %2989 = vrot.lane.b32.xlu1 %v6677_v30, %s5203_s9 }
 0x473   : > { %3562 = vrot.lane.b32.xlu0 %v6677_v30, %s5206_s12 }
 0x474   : > { %v3350_v34 = vpop.permute.xlu1 %3349 }
 0x475   : > { %3439 = vst.msk [vmem:[#allocation3 + $0x30] sm:$0xff] %vm1322_vm5, %v3350_v34  ;;  %v3160_v35 = vpop.permute.xlu0 %3159 }
 0x476   : > { %3248 = vst.msk [vmem:[#allocation3 + $0x38] sm:$0xff] %vm1129_vm4, %v3160_v35  ;;  %3754 = vrot.lane.b32.xlu1 %v3674_v37, %s5207_s23 }
 0x477   : > { %3564 = vrot.lane.b32.xlu0 %v6671_v21, %s5206_s12 }
 0x478   : > { %v3352_v3 = vpop.permute.xlu1 %3351  ;;  %v4046_v6 = vld [vmem:[#allocation3 + $0x20] sm:$0xff] }
 0x479   : > { %3440 = vst.msk [vmem:[#allocation3 + $0x38] sm:$0xff] %vm1322_vm5, %v3352_v3  ;;  %5117 = vmatprep.mubr.msk.f32.mxu1 %vm1972_vm10, %v4046_v6  ;;  %v3925_v19 = vpop.permute.xlu0 %3924  ;;  %v3681_v3 = vld [vmem:[#allocation2 + $0x141] sm:$0xff] }
 0x47a   : > { %4015 = vst.msk [vmem:[#allocation3 + $0x28] sm:$0xff] %vm1902_vm9, %v3925_v19  ;;  %3181 = vrot.lane.b32.xlu1 %v3674_v37, %s5204_s10  ;;  %v3872_v37 = vld [vmem:[#allocation2 + $0x13a] sm:$0xff] }
 0x47b   : > { %2991 = vrot.lane.b32.xlu0 %v6671_v21, %s5203_s9 }
 0x47c   : > { %v3545_v30 = vpop.permute.xlu1 %3544 }
 0x47d   : > { %3633 = vst.msk [vmem:[#allocation3 + $0x38] sm:$0xff] %vm1516_vm7, %v3545_v30  ;;  %v3543_v7 = vpop.permute.xlu0 %3542 }
 0x47e   : > { %3632 = vst.msk [vmem:[#allocation3 + $0x30] sm:$0xff] %vm1516_vm7, %v3543_v7  ;;  %3946 = vrot.lane.b32.xlu1 %v3866_v29, %s5208_s26 }
 0x47f   : > { %3756 = vrot.lane.b32.xlu0 %v3675_v12, %s5207_s23 }
 0x480   : > { %v3162_v11 = vpop.permute.xlu1 %3161 }
 0x481   : > { %3249 = vst.msk [vmem:[#allocation3 + $0x40] sm:$0xff] %vm1129_vm4, %v3162_v11  ;;  %v3735_v60 = vpop.permute.xlu0 %3734  ;;  %v4047_v8 = vld [vmem:[#allocation3 + $0x28] sm:$0xff] }
 0x482   : > { %3824 = vst.msk [vmem:[#allocation3 + $0x30] sm:$0xff] %vm1709_vm8, %v3735_v60  ;;  %3373 = vrot.lane.b32.xlu1 %v3866_v29, %s5205_s11  ;;  %5118 = vmatmul.mubr.msk.f32.gmra.mrb[4].mxu1 %vm1972_vm10, %v4047_v8  ;;  %v2915_v8 = vld [vmem:[#allocation2 + $0x150] sm:$0xff] }
 0x483   : > { %3183 = vrot.lane.b32.xlu0 %v3675_v12, %s5204_s10  ;;  %v3298_v12 = vld [vmem:[#allocation2 + $0x142] sm:$0xff] }
 0x484   : > { %v3927_v21 = vpop.permute.xlu1 %3926 }
 0x485   : > { %4016 = vst.msk [vmem:[#allocation3 + $0x30] sm:$0xff] %vm1902_vm9, %v3927_v21  ;;  %v3737_v17 = vpop.permute.xlu0 %3736 }
 0x486   : > { %3825 = vst.msk [vmem:[#allocation3 + $0x38] sm:$0xff] %vm1709_vm8, %v3737_v17  ;;  %3375 = vrot.lane.b32.xlu1 %v3292_v10, %s5205_s11 }
 0x487   : > { %3948 = vrot.lane.b32.xlu0 %v3292_v10, %s5208_s26 }
 0x488   : > { %v3354_v48 = vpop.permute.xlu1 %3353 }
 0x489   : > { %3441 = vst.msk [vmem:[#allocation3 + $0x40] sm:$0xff] %vm1322_vm5, %v3354_v48  ;;  %v3164_v55 = vpop.permute.xlu0 %3163  ;;  %v3682_v48 = vld [vmem:[#allocation2 + $0x151] sm:$0xff] }
 0x48a   : > { %3250 = vst.msk [vmem:[#allocation3 + $0x48] sm:$0xff] %vm1129_vm4, %v3164_v55  ;;  %2993 = vrot.lane.b32.xlu1 %v6693_v26, %s5203_s9  ;;  %v3491_v55 = vld [vmem:[#allocation2 + $0x158] sm:$0xff] }
 0x48b   : > { %3566 = vrot.lane.b32.xlu0 %v6693_v26, %s5206_s12 }
 0x48c   : > { %v3356_v0 = vpop.permute.xlu1 %3355  ;;  %v4048_v32 = vld [vmem:[#allocation3 + $0x30] sm:$0xff] }
 0x48d   : > { %3442 = vst.msk [vmem:[#allocation3 + $0x48] sm:$0xff] %vm1322_vm5, %v3356_v0  ;;  %5120 = vmatprep.mubr.msk.f32.mxu1 %vm1972_vm10, %v4048_v32  ;;  %v3929_v54 = vpop.permute.xlu0 %3928 }
 0x48e   : > { %4017 = vst.msk [vmem:[#allocation3 + $0x38] sm:$0xff] %vm1902_vm9, %v3929_v54  ;;  %3758 = vrot.lane.b32.xlu1 %v3676_v63, %s5207_s23 }
 0x48f   : > { %3568 = vrot.lane.b32.xlu0 %v6687_v13, %s5206_s12 }
 0x490   : > { %v3549_v31 = vpop.permute.xlu1 %3548 }
 0x491   : > { %3635 = vst.msk [vmem:[#allocation3 + $0x48] sm:$0xff] %vm1516_vm7, %v3549_v31  ;;  %v3547_v56 = vpop.permute.xlu0 %3546  ;;  %v3874_v31 = vld [vmem:[#allocation2 + $0x152] sm:$0xff] }
 0x492   : > { %3634 = vst.msk [vmem:[#allocation3 + $0x40] sm:$0xff] %vm1516_vm7, %v3547_v56  ;;  %3185 = vrot.lane.b32.xlu1 %v3676_v63, %s5204_s10  ;;  %v3683_v56 = vld [vmem:[#allocation2 + $0x159] sm:$0xff] }
 0x493   : > { %2995 = vrot.lane.b32.xlu0 %v6687_v13, %s5203_s9 }
 0x494   : > { %v3166_v26 = vpop.permute.xlu1 %3165 }
 0x495   : > { %3251 = vst.msk [vmem:[#allocation3 + $0x50] sm:$0xff] %vm1129_vm4, %v3166_v26  ;;  %v3739_v43 = vpop.permute.xlu0 %3738  ;;  %v4049_v57 = vld [vmem:[#allocation3 + $0x38] sm:$0xff] }
 0x496   : > { %3826 = vst.msk [vmem:[#allocation3 + $0x40] sm:$0xff] %vm1709_vm8, %v3739_v43  ;;  %3950 = vrot.lane.b32.xlu1 %v3868_v47, %s5208_s26  ;;  %5121 = vmatmul.mubr.msk.f32.gmra.mrb[6].mxu1 %vm1972_vm10, %v4049_v57 }
 0x497   : > { %3760 = vrot.lane.b32.xlu0 %v3677_v42, %s5207_s23 }
 0x498   : > { %v3931_v58 = vpop.permute.xlu1 %3930 }
 0x499   : > { %4018 = vst.msk [vmem:[#allocation3 + $0x40] sm:$0xff] %vm1902_vm9, %v3931_v58  ;;  %v3741_v52 = vpop.permute.xlu0 %3740  ;;  %v3300_v58 = vld [vmem:[#allocation2 + $0x15a] sm:$0xff] }
 0x49a   : > { %3827 = vst.msk [vmem:[#allocation3 + $0x48] sm:$0xff] %vm1709_vm8, %v3741_v52  ;;  %3377 = vrot.lane.b32.xlu1 %v3868_v47, %s5205_s11 }
 0x49b   : > { %3187 = vrot.lane.b32.xlu0 %v3677_v42, %s5204_s10 }
 0x49c   : > { %v3358_v13 = vpop.permute.xlu1 %3357 }
 0x49d   : > { %3443 = vst.msk [vmem:[#allocation3 + $0x50] sm:$0xff] %vm1322_vm5, %v3358_v13  ;;  %v3168_v51 = vpop.permute.xlu0 %3167 }
 0x49e   : > { %3252 = vst.msk [vmem:[#allocation3 + $0x58] sm:$0xff] %vm1129_vm4, %v3168_v51  ;;  %3379 = vrot.lane.b32.xlu1 %v3294_v40, %s5205_s11  ;;  %v2917_v51 = vld [vmem:[#allocation2 + $0x168] sm:$0xff] }
 0x49f   : > { %3952 = vrot.lane.b32.xlu0 %v3294_v40, %s5208_s26 }
 0x4a0   : > { %v3360_v53 = vpop.permute.xlu1 %3359  ;;  %v4050_v46 = vld [vmem:[#allocation3 + $0x40] sm:$0xff] }
 0x4a1   : > { %3444 = vst.msk [vmem:[#allocation3 + $0x58] sm:$0xff] %vm1322_vm5, %v3360_v53  ;;  %5123 = vmatprep.mubr.msk.f32.mxu1 %vm1972_vm10, %v4050_v46  ;;  %v3933_v36 = vpop.permute.xlu0 %3932 }
 0x4a2   : > { %4019 = vst.msk [vmem:[#allocation3 + $0x48] sm:$0xff] %vm1902_vm9, %v3933_v36  ;;  %2997 = vrot.lane.b32.xlu1 %v6706_v4, %s5203_s9  ;;  %v3684_v36 = vld [vmem:[#allocation2 + $0x169] sm:$0xff] }
 0x4a3   : > { %3570 = vrot.lane.b32.xlu0 %v6706_v4, %s5206_s12 }
 0x4a4   : > { %v3553_v50 = vpop.permute.xlu1 %3552 }
 0x4a5   : > { %3637 = vst.msk [vmem:[#allocation3 + $0x58] sm:$0xff] %vm1516_vm7, %v3553_v50  ;;  %v3551_v24 = vpop.permute.xlu0 %3550  ;;  %v3493_v50 = vld [vmem:[#allocation2 + $0x170] sm:$0xff] }
 0x4a6   : > { %3636 = vst.msk [vmem:[#allocation3 + $0x50] sm:$0xff] %vm1516_vm7, %v3551_v24  ;;  %3762 = vrot.lane.b32.xlu1 %v3678_v27, %s5207_s23 }
 0x4a7   : > { %3572 = vrot.lane.b32.xlu0 %v3487_v15, %s5206_s12 }
 0x4a8   : > { %v3170_v16 = vpop.permute.xlu1 %3169 }
 0x4a9   : > { %3253 = vst.msk [vmem:[#allocation3 + $0x60] sm:$0xff] %vm1129_vm4, %v3170_v16  ;;  %v3743_v28 = vpop.permute.xlu0 %3742  ;;  %v4051_v33 = vld [vmem:[#allocation3 + $0x48] sm:$0xff] }
 0x4aa   : > { %3828 = vst.msk [vmem:[#allocation3 + $0x50] sm:$0xff] %vm1709_vm8, %v3743_v28  ;;  %3189 = vrot.lane.b32.xlu1 %v3678_v27, %s5204_s10  ;;  %5124 = vmatmul.mubr.msk.f32.gmra.mrb[8].mxu1 %vm1972_vm10, %v4051_v33  ;;  %v3876_v28 = vld [vmem:[#allocation2 + $0x16a] sm:$0xff] }
 0x4ab   : > { %2999 = vrot.lane.b32.xlu0 %v3487_v15, %s5203_s9  ;;  %v3685_v33 = vld [vmem:[#allocation2 + $0x171] sm:$0xff] }
 0x4ac   : > { %v3935_v4 = vpop.permute.xlu1 %3934 }
 0x4ad   : > { %4020 = vst.msk [vmem:[#allocation3 + $0x50] sm:$0xff] %vm1902_vm9, %v3935_v4  ;;  %v3745_v23 = vpop.permute.xlu0 %3744 }
 0x4ae   : > { %3829 = vst.msk [vmem:[#allocation3 + $0x58] sm:$0xff] %vm1709_vm8, %v3745_v23  ;;  %3954 = vrot.lane.b32.xlu1 %v3870_v25, %s5208_s26 }
 0x4af   : > { %3764 = vrot.lane.b32.xlu0 %v3679_v9, %s5207_s23 }
 0x4b0   : > { %v3362_v45 = vpop.permute.xlu1 %3361 }
 0x4b1   : > { %3445 = vst.msk [vmem:[#allocation3 + $0x60] sm:$0xff] %vm1322_vm5, %v3362_v45  ;;  %v3172_v22 = vpop.permute.xlu0 %3171 }
 0x4b2   : > { %3254 = vst.msk [vmem:[#allocation3 + $0x68] sm:$0xff] %vm1129_vm4, %v3172_v22  ;;  %3381 = vrot.lane.b32.xlu1 %v3870_v25, %s5205_s11  ;;  %v3302_v22 = vld [vmem:[#allocation2 + $0x172] sm:$0xff] }
 0x4b3   : > { %3191 = vrot.lane.b32.xlu0 %v3679_v9, %s5204_s10 }
 0x4b4   : > { %v3364_v44 = vpop.permute.xlu1 %3363  ;;  %v4052_v62 = vld [vmem:[#allocation3 + $0x50] sm:$0xff] }
 0x4b5   : > { %3446 = vst.msk [vmem:[#allocation3 + $0x68] sm:$0xff] %vm1322_vm5, %v3364_v44  ;;  %5126 = vmatprep.mubr.msk.f32.mxu1 %vm1972_vm10, %v4052_v62  ;;  %v3937_v18 = vpop.permute.xlu0 %3936 }
 0x4b6   : > { %4021 = vst.msk [vmem:[#allocation3 + $0x58] sm:$0xff] %vm1902_vm9, %v3937_v18  ;;  %3383 = vrot.lane.b32.xlu1 %v3296_v49, %s5205_s11 }
 0x4b7   : > { %3956 = vrot.lane.b32.xlu0 %v3296_v49, %s5208_s26  ;;  %v2919_v49 = vld [vmem:[#allocation2 + $0x180] sm:$0xff] }
 0x4b8   : > { %v3557_v59 = vpop.permute.xlu1 %3556 }
 0x4b9   : > { %3639 = vst.msk [vmem:[#allocation3 + $0x68] sm:$0xff] %vm1516_vm7, %v3557_v59  ;;  %v3555_v20 = vpop.permute.xlu0 %3554 }
 0x4ba   : > { %3638 = vst.msk [vmem:[#allocation3 + $0x60] sm:$0xff] %vm1516_vm7, %v3555_v20  ;;  %3001 = vrot.lane.b32.xlu1 %v2913_v61, %s5203_s9 }
 0x4bb   : > { %3574 = vrot.lane.b32.xlu0 %v2913_v61, %s5206_s12  ;;  %v3686_v61 = vld [vmem:[#allocation2 + $0x181] sm:$0xff] }
 0x4bc   : > { %v3174_v2 = vpop.permute.xlu1 %3173 }
 0x4bd   : > { %3255 = vst.msk [vmem:[#allocation3 + $0x70] sm:$0xff] %vm1129_vm4, %v3174_v2  ;;  %v3747_v14 = vpop.permute.xlu0 %3746  ;;  %v4053_v39 = vld [vmem:[#allocation3 + $0x58] sm:$0xff] }
 0x4be   : > { %3830 = vst.msk [vmem:[#allocation3 + $0x60] sm:$0xff] %vm1709_vm8, %v3747_v14  ;;  %3766 = vrot.lane.b32.xlu1 %v3680_v1, %s5207_s23  ;;  %5127 = vmatmul.mubr.msk.f32.gmra.mrb[10].mxu1 %vm1972_vm10, %v4053_v39  ;;  %v3495_v2 = vld [vmem:[#allocation2 + $0x188] sm:$0xff] }
 0x4bf   : > { %3576 = vrot.lane.b32.xlu0 %v3489_v41, %s5206_s12 }
 0x4c0   : > { %v3939_v38 = vpop.permute.xlu1 %3938 }
 0x4c1   : > { %4022 = vst.msk [vmem:[#allocation3 + $0x60] sm:$0xff] %vm1902_vm9, %v3939_v38  ;;  %v3749_v5 = vpop.permute.xlu0 %3748  ;;  %v3878_v38 = vld [vmem:[#allocation2 + $0x182] sm:$0xff] }
 0x4c2   : > { %3831 = vst.msk [vmem:[#allocation3 + $0x68] sm:$0xff] %vm1709_vm8, %v3749_v5  ;;  %3193 = vrot.lane.b32.xlu1 %v3680_v1, %s5204_s10  ;;  %v3687_v5 = vld [vmem:[#allocation2 + $0x189] sm:$0xff] }
 0x4c3   : > { %3003 = vrot.lane.b32.xlu0 %v3489_v41, %s5203_s9 }
 0x4c4   : > { %v3366_v34 = vpop.permute.xlu1 %3365 }
 0x4c5   : > { %3447 = vst.msk [vmem:[#allocation3 + $0x70] sm:$0xff] %vm1322_vm5, %v3366_v34  ;;  %v3176_v35 = vpop.permute.xlu0 %3175 }
 0x4c6   : > { %3256 = vst.msk [vmem:[#allocation3 + $0x78] sm:$0xff] %vm1129_vm4, %v3176_v35  ;;  %3958 = vrot.lane.b32.xlu1 %v3872_v37, %s5208_s26 }
 0x4c7   : > { %3768 = vrot.lane.b32.xlu0 %v3681_v3, %s5207_s23 }
 0x4c8   : > { %v3368_v6 = vpop.permute.xlu1 %3367  ;;  %v4054_v19 = vld [vmem:[#allocation3 + $0x60] sm:$0xff] }
 0x4c9   : > { %3448 = vst.msk [vmem:[#allocation3 + $0x78] sm:$0xff] %vm1322_vm5, %v3368_v6  ;;  %5129 = vmatprep.mubr.msk.f32.mxu1 %vm1972_vm10, %v4054_v19  ;;  %v3941_v30 = vpop.permute.xlu0 %3940  ;;  %v3304_v19 = vld [vmem:[#allocation2 + $0x18a] sm:$0xff] }
 0x4ca   : > { %4023 = vst.msk [vmem:[#allocation3 + $0x68] sm:$0xff] %vm1902_vm9, %v3941_v30  ;;  %3385 = vrot.lane.b32.xlu1 %v3872_v37, %s5205_s11  ;;  %v3497_v30 = vld [vmem:[#allocation2 + $0x1a0] sm:$0xff] }
 0x4cb   : > { %3195 = vrot.lane.b32.xlu0 %v3681_v3, %s5204_s10 }
 0x4cc   : > { %v2986_v7 = vpop.permute.xlu1 %2985 }
 0x4cd   : > { %3065 = vst.msk [vmem:[#allocation3 + $0x80] sm:$0xff] %vm936_vm3, %v2986_v7  ;;  %v3559_v29 = vpop.permute.xlu0 %3558 }
 0x4ce   : > { %3640 = vst.msk [vmem:[#allocation3 + $0x70] sm:$0xff] %vm1516_vm7, %v3559_v29  ;;  %3387 = vrot.lane.b32.xlu1 %v3298_v12, %s5205_s11  ;;  %v3496_v29 = vld [vmem:[#allocation2 + $0x198] sm:$0xff] }
 0x4cf   : > { %3960 = vrot.lane.b32.xlu0 %v3298_v12, %s5208_s26 }
 0x4d0   : > { %v3751_v11 = vpop.permute.xlu1 %3750 }
 0x4d1   : > { %3832 = vst.msk [vmem:[#allocation3 + $0x70] sm:$0xff] %vm1709_vm8, %v3751_v11  ;;  %v3561_v60 = vpop.permute.xlu0 %3560  ;;  %v4055_v21 = vld [vmem:[#allocation3 + $0x68] sm:$0xff] }
 0x4d2   : > { %3641 = vst.msk [vmem:[#allocation3 + $0x78] sm:$0xff] %vm1516_vm7, %v3561_v60  ;;  %3005 = vrot.lane.b32.xlu1 %v2915_v8, %s5203_s9  ;;  %5130 = vmatmul.mubr.msk.f32.gmra.mrb[12].mxu1 %vm1972_vm10, %v4055_v21  ;;  %v3689_v60 = vld [vmem:[#allocation2 + $0x1a1] sm:$0xff]  ;;  %v3688_v21 = vld [vmem:[#allocation2 + $0x199] sm:$0xff] }
 0x4d3   : > { %3578 = vrot.lane.b32.xlu0 %v2915_v8, %s5206_s12 }
 0x4d4   : > { %v3178_v17 = vpop.permute.xlu1 %3177 }
 0x4d5   : > { %3257 = vst.msk [vmem:[#allocation3 + $0x80] sm:$0xff] %vm1129_vm4, %v3178_v17  ;;  %v2988_v10 = vpop.permute.xlu0 %2987 }
 0x4d6   : > { %3066 = vst.msk [vmem:[#allocation3 + $0x88] sm:$0xff] %vm936_vm3, %v2988_v10  ;;  %3770 = vrot.lane.b32.xlu1 %v3682_v48, %s5207_s23  ;;  %v3881_v10 = vld [vmem:[#allocation2 + $0x1a2] sm:$0xff] }
 0x4d7   : > { %3580 = vrot.lane.b32.xlu0 %v3491_v55, %s5206_s12 }
 0x4d8   : > { %v3943_v0 = vpop.permute.xlu1 %3942 }
 0x4d9   : > { %4024 = vst.msk [vmem:[#allocation3 + $0x70] sm:$0xff] %vm1902_vm9, %v3943_v0  ;;  %v3753_v32 = vpop.permute.xlu0 %3752 }
 0x4da   : > { %3833 = vst.msk [vmem:[#allocation3 + $0x78] sm:$0xff] %vm1709_vm8, %v3753_v32  ;;  %3197 = vrot.lane.b32.xlu1 %v3682_v48, %s5204_s10 }
 0x4db   : > { %3007 = vrot.lane.b32.xlu0 %v3491_v55, %s5203_s9  ;;  %v3880_v55 = vld [vmem:[#allocation2 + $0x19a] sm:$0xff] }
 0x4dc   : > { %v3370_v54 = vpop.permute.xlu1 %3369 }
 0x4dd   : > { %3449 = vst.msk [vmem:[#allocation3 + $0x80] sm:$0xff] %vm1322_vm5, %v3370_v54  ;;  %v3180_v63 = vpop.permute.xlu0 %3179 }
 0x4de   : > { %3258 = vst.msk [vmem:[#allocation3 + $0x88] sm:$0xff] %vm1129_vm4, %v3180_v63  ;;  %3962 = vrot.lane.b32.xlu1 %v3874_v31, %s5208_s26 }
 0x4df   : > { %3772 = vrot.lane.b32.xlu0 %v3683_v56, %s5207_s23 }
 0x4e0   : > { %v3372_v26 = vpop.permute.xlu1 %3371  ;;  %v4056_v43 = vld [vmem:[#allocation3 + $0x70] sm:$0xff] }
 0x4e1   : > { %3450 = vst.msk [vmem:[#allocation3 + $0x88] sm:$0xff] %vm1322_vm5, %v3372_v26  ;;  %5132 = vmatprep.mubr.msk.f32.mxu1 %vm1972_vm10, %v4056_v43  ;;  %v3945_v47 = vpop.permute.xlu0 %3944  ;;  %v7354_v26 = vld [vmem:[%s7600_s5] ss:$0 sm:$0xff] }
 0x4e2   : > { %4025 = vst.msk [vmem:[#allocation3 + $0x78] sm:$0xff] %vm1902_vm9, %v3945_v47  ;;  %3389 = vrot.lane.b32.xlu1 %v3874_v31, %s5205_s11 }
 0x4e3   : > { %3199 = vrot.lane.b32.xlu0 %v3683_v56, %s5204_s10 }
 0x4e4   : > { %v2990_v57 = vpop.permute.xlu1 %2989 }
 0x4e5   : > { %3067 = vst.msk [vmem:[#allocation3 + $0x90] sm:$0xff] %vm936_vm3, %v2990_v57  ;;  %v3563_v42 = vpop.permute.xlu0 %3562  ;;  %v7360_v57 = vld [vmem:[%s7601_s6] ss:$0 sm:$0xff] }
 0x4e6   : > { %3642 = vst.msk [vmem:[#allocation3 + $0x80] sm:$0xff] %vm1516_vm7, %v3563_v42  ;;  %3391 = vrot.lane.b32.xlu1 %v3300_v58, %s5205_s11 }
 0x4e7   : > { %3964 = vrot.lane.b32.xlu0 %v3300_v58, %s5208_s26 }
 0x4e8   : > { %v3755_v52 = vpop.permute.xlu1 %3754 }
 0x4e9   : > { %3834 = vst.msk [vmem:[#allocation3 + $0x80] sm:$0xff] %vm1709_vm8, %v3755_v52  ;;  %v3565_v13 = vpop.permute.xlu0 %3564  ;;  %v4057_v40 = vld [vmem:[#allocation3 + $0x78] sm:$0xff] }
 0x4ea   : > { %3643 = vst.msk [vmem:[#allocation3 + $0x88] sm:$0xff] %vm1516_vm7, %v3565_v13  ;;  %3009 = vrot.lane.b32.xlu1 %v2917_v51, %s5203_s9  ;;  %5133 = vmatmul.mubr.msk.f32.gmra.mrb[14].mxu1 %vm1972_vm10, %v4057_v40  ;;  %v4935_v13 = vld [vmem:[%s5264_s29 + $0x21] sm:$0xff] }
 0x4eb   : > { %3582 = vrot.lane.b32.xlu0 %v2917_v51, %s5206_s12 }
 0x4ec   : > { %v3182_v53 = vpop.permute.xlu1 %3181 }
 0x4ed   : > { %3259 = vst.msk [vmem:[#allocation3 + $0x90] sm:$0xff] %vm1129_vm4, %v3182_v53  ;;  %v2992_v46 = vpop.permute.xlu0 %2991  ;;  %v4934_v53 = vld [vmem:[%s5264_s29 + $0x19] sm:$0xff] }
 0x4ee   : > { %3068 = vst.msk [vmem:[#allocation3 + $0x98] sm:$0xff] %vm936_vm3, %v2992_v46  ;;  %3774 = vrot.lane.b32.xlu1 %v3684_v36, %s5207_s23 }
 0x4ef   : > { %3584 = vrot.lane.b32.xlu0 %v3493_v50, %s5206_s12 }
 0x4f0   : > { %v3947_v24 = vpop.permute.xlu1 %3946 }
 0x4f1   : > { %4026 = vst.msk [vmem:[#allocation3 + $0x80] sm:$0xff] %vm1902_vm9, %v3947_v24  ;;  %v3757_v27 = vpop.permute.xlu0 %3756 }
 0x4f2   : > { %3835 = vst.msk [vmem:[#allocation3 + $0x88] sm:$0xff] %vm1709_vm8, %v3757_v27  ;;  %3201 = vrot.lane.b32.xlu1 %v3684_v36, %s5204_s10 }
 0x4f3   : > { %3011 = vrot.lane.b32.xlu0 %v3493_v50, %s5203_s9 }
 0x4f4   : > { %v3374_v15 = vpop.permute.xlu1 %3373 }
 0x4f5   : > { %3451 = vst.msk [vmem:[#allocation3 + $0x90] sm:$0xff] %vm1322_vm5, %v3374_v15  ;;  %v3184_v16 = vpop.permute.xlu0 %3183 }
 0x4f6   : > { %3260 = vst.msk [vmem:[#allocation3 + $0x98] sm:$0xff] %vm1129_vm4, %v3184_v16  ;;  %3966 = vrot.lane.b32.xlu1 %v3876_v28, %s5208_s26 }
 0x4f7   : > { %3776 = vrot.lane.b32.xlu0 %v3685_v33, %s5207_s23 }
 0x4f8   : > { %v3376_v4 = vpop.permute.xlu1 %3375  ;;  %v4058_v23 = vld [vmem:[#allocation3 + $0x80] sm:$0xff] }
 0x4f9   : > { %3452 = vst.msk [vmem:[#allocation3 + $0x98] sm:$0xff] %vm1322_vm5, %v3376_v4  ;;  %5135 = vmatprep.mubr.msk.f32.mxu1 %vm1972_vm10, %v4058_v23  ;;  %v3949_v25 = vpop.permute.xlu0 %3948 }
 0x4fa   : > { %4027 = vst.msk [vmem:[#allocation3 + $0x88] sm:$0xff] %vm1902_vm9, %v3949_v25  ;;  %3393 = vrot.lane.b32.xlu1 %v3876_v28, %s5205_s11 }
 0x4fb   : > { %3203 = vrot.lane.b32.xlu0 %v3685_v33, %s5204_s10 }
 0x4fc   : > { %v2994_v9 = vpop.permute.xlu1 %2993 }
 0x4fd   : > { %3069 = vst.msk [vmem:[#allocation3 + $0xa0] sm:$0xff] %vm936_vm3, %v2994_v9  ;;  %v3567_v45 = vpop.permute.xlu0 %3566 }
 0x4fe   : > { %3644 = vst.msk [vmem:[#allocation3 + $0x90] sm:$0xff] %vm1516_vm7, %v3567_v45  ;;  %3395 = vrot.lane.b32.xlu1 %v3302_v22, %s5205_s11 }
 0x4ff   : > { %3968 = vrot.lane.b32.xlu0 %v3302_v22, %s5208_s26 }
 0x500   : > { %v3759_v44 = vpop.permute.xlu1 %3758 }
 0x501   : > { %3836 = vst.msk [vmem:[#allocation3 + $0x90] sm:$0xff] %vm1709_vm8, %v3759_v44  ;;  %v3569_v62 = vpop.permute.xlu0 %3568  ;;  %v4059_v18 = vld [vmem:[#allocation3 + $0x88] sm:$0xff] }
 0x502   : > { %3645 = vst.msk [vmem:[#allocation3 + $0x98] sm:$0xff] %vm1516_vm7, %v3569_v62  ;;  %5136 = vmatmul.mubr.msk.f32.gmra.mrb[16].mxu1 %vm1972_vm10, %v4059_v18  ;;  %3013 = vrot.lane.b32.xlu1 %v2919_v49, %s5203_s9 }
 0x503   : > { %3586 = vrot.lane.b32.xlu0 %v2919_v49, %s5206_s12 }
 0x504   : > { %v3186_v59 = vpop.permute.xlu1 %3185 }
 0x505   : > { %3261 = vst.msk [vmem:[#allocation3 + $0xa0] sm:$0xff] %vm1129_vm4, %v3186_v59  ;;  %v2996_v20 = vpop.permute.xlu0 %2995 }
 0x506   : > { %3070 = vst.msk [vmem:[#allocation3 + $0xa8] sm:$0xff] %vm936_vm3, %v2996_v20  ;;  %3778 = vrot.lane.b32.xlu1 %v3686_v61, %s5207_s23  ;;  %v4937_v20 = vld [vmem:[%s5264_s29 + $0x39] sm:$0xff] }
 0x507   : > { %3588 = vrot.lane.b32.xlu0 %v3495_v2, %s5206_s12 }
 0x508   : > { %v3951_v14 = vpop.permute.xlu1 %3950 }
 0x509   : > { %4028 = vst.msk [vmem:[#allocation3 + $0x90] sm:$0xff] %vm1902_vm9, %v3951_v14  ;;  %v3761_v1 = vpop.permute.xlu0 %3760  ;;  %v4936_v14 = vld [vmem:[%s5264_s29 + $0x31] sm:$0xff] }
 0x50a   : > { %3837 = vst.msk [vmem:[#allocation3 + $0x98] sm:$0xff] %vm1709_vm8, %v3761_v1  ;;  %3205 = vrot.lane.b32.xlu1 %v3686_v61, %s5204_s10 }
 0x50b   : > { %3015 = vrot.lane.b32.xlu0 %v3495_v2, %s5203_s9 }
 0x50c   : > { %v3378_v39 = vpop.permute.xlu1 %3377 }
 0x50d   : > { %3453 = vst.msk [vmem:[#allocation3 + $0xa0] sm:$0xff] %vm1322_vm5, %v3378_v39  ;;  %v3188_v41 = vpop.permute.xlu0 %3187 }
 0x50e   : > { %3262 = vst.msk [vmem:[#allocation3 + $0xa8] sm:$0xff] %vm1129_vm4, %v3188_v41  ;;  %3970 = vrot.lane.b32.xlu1 %v3878_v38, %s5208_s26 }
 0x50f   : > { %3780 = vrot.lane.b32.xlu0 %v3687_v5, %s5207_s23 }
 0x510   : > { %v3380_v34 = vpop.permute.xlu1 %3379  ;;  %v4060_v35 = vld [vmem:[#allocation3 + $0x90] sm:$0xff] }
 0x511   : > { %3454 = vst.msk [vmem:[#allocation3 + $0xa8] sm:$0xff] %vm1322_vm5, %v3380_v34  ;;  %5138 = vmatprep.mubr.msk.f32.mxu1 %vm1972_vm10, %v4060_v35  ;;  %v3953_v37 = vpop.permute.xlu0 %3952 }
 0x512   : > { %4029 = vst.msk [vmem:[#allocation3 + $0x98] sm:$0xff] %vm1902_vm9, %v3953_v37  ;;  %3397 = vrot.lane.b32.xlu1 %v3878_v38, %s5205_s11 }
 0x513   : > { %3207 = vrot.lane.b32.xlu0 %v3687_v5, %s5204_s10 }
 0x514   : > { %v2998_v3 = vpop.permute.xlu1 %2997 }
 0x515   : > { %3071 = vst.msk [vmem:[#allocation3 + $0xb0] sm:$0xff] %vm936_vm3, %v2998_v3  ;;  %v3571_v6 = vpop.permute.xlu0 %3570 }
 0x516   : > { %3646 = vst.msk [vmem:[#allocation3 + $0xa0] sm:$0xff] %vm1516_vm7, %v3571_v6  ;;  %3399 = vrot.lane.b32.xlu1 %v3304_v19, %s5205_s11 }
 0x517   : > { %3972 = vrot.lane.b32.xlu0 %v3304_v19, %s5208_s26 }
 0x518   : > { %v3763_v7 = vpop.permute.xlu1 %3762 }
 0x519   : > { %3838 = vst.msk [vmem:[#allocation3 + $0xa0] sm:$0xff] %vm1709_vm8, %v3763_v7  ;;  %v3573_v12 = vpop.permute.xlu0 %3572  ;;  %v4061_v11 = vld [vmem:[#allocation3 + $0x98] sm:$0xff] }
 0x51a   : > { %3647 = vst.msk [vmem:[#allocation3 + $0xa8] sm:$0xff] %vm1516_vm7, %v3573_v12  ;;  %5139 = vmatmul.mubr.msk.f32.gmra.mrb[18].mxu1 %vm1972_vm10, %v4061_v11  ;;  %3592 = vrot.lane.b32.xlu1 %v3497_v30, %s5206_s12 }
 0x51b   : > { %3590 = vrot.lane.b32.xlu0 %v3496_v29, %s5206_s12 }
 0x51c   : > { %v3190_v8 = vpop.permute.xlu1 %3189 }
 0x51d   : > { %3263 = vst.msk [vmem:[#allocation3 + $0xb0] sm:$0xff] %vm1129_vm4, %v3190_v8  ;;  %v3000_v17 = vpop.permute.xlu0 %2999 }
 0x51e   : > { %3072 = vst.msk [vmem:[#allocation3 + $0xb8] sm:$0xff] %vm936_vm3, %v3000_v17  ;;  %3784 = vrot.lane.b32.xlu1 %v3689_v60, %s5207_s23  ;;  %v4939_v17 = vld [vmem:[%s5264_s29 + $0x51] sm:$0xff] }
 0x51f   : > { %3782 = vrot.lane.b32.xlu0 %v3688_v21, %s5207_s23  ;;  %s4968_s23 = sshll.u32 %s7697_s25, 8 }
 0x520   : > { %v3955_v48 = vpop.permute.xlu1 %3954  ;;  %s7376_s28 = scalar_lea.vmem %s7602_s7, %s4968_s23 }
 0x521   : > { %4030 = vst.msk [vmem:[#allocation3 + $0xa0] sm:$0xff] %vm1902_vm9, %v3955_v48  ;;  %v3765_v0 = vpop.permute.xlu0 %3764 }
 0x522   : > { %3839 = vst.msk [vmem:[#allocation3 + $0xa8] sm:$0xff] %vm1709_vm8, %v3765_v0  ;;  %3976 = vrot.lane.b32.xlu1 %v3881_v10, %s5208_s26 }
 0x523   : > { %3974 = vrot.lane.b32.xlu0 %v3880_v55, %s5208_s26  ;;  %v4938_v55 = vld [vmem:[%s5264_s29 + $0x49] sm:$0xff] }
 0x524   : > { %v3382_v32 = vpop.permute.xlu1 %3381 }
 0x525   : > { %3455 = vst.msk [vmem:[#allocation3 + $0xb0] sm:$0xff] %vm1322_vm5, %v3382_v32  ;;  %v3192_v54 = vpop.permute.xlu0 %3191 }
 0x526   : > { %3264 = vst.msk [vmem:[#allocation3 + $0xb8] sm:$0xff] %vm1129_vm4, %v3192_v54 }
 0x528   : > { %v3384_v63 = vpop.permute.xlu1 %3383  ;;  %v4062_v31 = vld [vmem:[#allocation3 + $0xa0] sm:$0xff] }
 0x529   : > { %3456 = vst.msk [vmem:[#allocation3 + $0xb8] sm:$0xff] %vm1322_vm5, %v3384_v63  ;;  %5141 = vmatprep.mubr.msk.f32.mxu1 %vm1972_vm10, %v4062_v31  ;;  %v3957_v56 = vpop.permute.xlu0 %3956 }
 0x52a   : > { %4031 = vst.msk [vmem:[#allocation3 + $0xa8] sm:$0xff] %vm1902_vm9, %v3957_v56 }
 0x52c   : > { %v3002_v43 = vpop.permute.xlu1 %3001 }
 0x52d   : > { %3073 = vst.msk [vmem:[#allocation3 + $0xc0] sm:$0xff] %vm936_vm3, %v3002_v43  ;;  %v5113_v47 = vpop.f32.mrb[0].mxu1  ;;  %v3575_v42 = vpop.permute.xlu0 %3574 }
 0x52e   : > { %v4411_v58 = vmul.f32 %v5113_v47, %v7354_v26  ;;  %3648 = vst.msk [vmem:[#allocation3 + $0xb0] sm:$0xff] %vm1516_vm7, %v3575_v42  ;;  %v4244_v52 = vpop.f32.mrb[1].mxu1 }
 0x52f   : > { %v4410_v51 = vmul.f32 %v7354_v26, %v4244_v52 }
 0x530   : > { %v4450_v40 = vadd.f32 %v7360_v57, %v4411_v58  ;;  %v3767_v46 = vpop.permute.xlu1 %3766 }
 0x531   : > { %v4449_v36 = vadd.f32 %v7360_v57, %v4410_v51  ;;  %3840 = vst.msk [vmem:[#allocation3 + $0xb0] sm:$0xff] %vm1709_vm8, %v3767_v46  ;;  %v3577_v50 = vpop.permute.xlu0 %3576  ;;  %v4063_v24 = vld [vmem:[#allocation3 + $0xa8] sm:$0xff] }
 0x532   : > { %v4514_v27 = vadd.f32 %v4935_v13, %v4450_v40  ;;  %3649 = vst.msk [vmem:[#allocation3 + $0xb8] sm:$0xff] %vm1516_vm7, %v3577_v50  ;;  %5142 = vmatmul.mubr.msk.f32.gmra.mrb[20].mxu1 %vm1972_vm10, %v4063_v24 }
 0x533   : > { %v4513_v15 = vadd.f32 %v4934_v53, %v4449_v36 }
 0x534   : > { %v4546_v16 = vmax.f32 %v4514_v27, 0.0  ;;  %v3194_v28 = vpop.permute.xlu1 %3193 }
 0x535   : > { %v4545_v33 = vmax.f32 %v4513_v15, 0.0  ;;  %3265 = vst.msk [vmem:[#allocation3 + $0xc0] sm:$0xff] %vm1129_vm4, %v3194_v28  ;;  %v3004_v4 = vpop.permute.xlu0 %3003  ;;  %v4941_v15 = vld [vmem:[%s5264_s29 + $0x69] sm:$0xff] }
 0x536   : > { %4578 = vst.msk [vmem:[%s7376_s28 + $0x8] sm:$0xff] %vm279_vm0, %v4546_v16 }
 0x537   : > { %3074 = vst.msk [vmem:[#allocation3 + $0xc8] sm:$0xff] %vm936_vm3, %v3004_v4 }
 0x538   : > { %4577 = vst.msk [vmem:[%s7376_s28] sm:$0xff] %vm279_vm0, %v4545_v33  ;;  %v3959_v23 = vpop.permute.xlu1 %3958  ;;  %v4940_v33 = vld [vmem:[%s5264_s29 + $0x61] sm:$0xff] }
 0x539   : > { %4032 = vst.msk [vmem:[#allocation3 + $0xb0] sm:$0xff] %vm1902_vm9, %v3959_v23  ;;  %v3769_v25 = vpop.permute.xlu0 %3768 }
 0x53a   : > { %3841 = vst.msk [vmem:[#allocation3 + $0xb8] sm:$0xff] %vm1709_vm8, %v3769_v25 }
 0x53c   : > { %v3386_v9 = vpop.permute.xlu1 %3385 }
 0x53d   : > { %3457 = vst.msk [vmem:[#allocation3 + $0xc0] sm:$0xff] %vm1322_vm5, %v3386_v9  ;;  %v3196_v45 = vpop.permute.xlu0 %3195 }
 0x53e   : > { %3266 = vst.msk [vmem:[#allocation3 + $0xc8] sm:$0xff] %vm1129_vm4, %v3196_v45 }
 0x540   : > { %v3388_v22 = vpop.permute.xlu1 %3387  ;;  %v4064_v44 = vld [vmem:[#allocation3 + $0xb0] sm:$0xff] }
 0x541   : > { %3458 = vst.msk [vmem:[#allocation3 + $0xc8] sm:$0xff] %vm1322_vm5, %v3388_v22  ;;  %v5116_v62 = vpop.f32.mrb[2].mxu1  ;;  %5144 = vmatprep.mubr.msk.f32.mxu1 %vm1972_vm10, %v4064_v44  ;;  %v3961_v18 = vpop.permute.xlu0 %3960 }
 0x542   : > { %v4413_v49 = vmul.f32 %v5116_v62, %v7354_v26  ;;  %4033 = vst.msk [vmem:[#allocation3 + $0xb8] sm:$0xff] %vm1902_vm9, %v3961_v18  ;;  %v4254_v59 = vpop.f32.mrb[3].mxu1 }
 0x543   : > { %v4412_v61 = vmul.f32 %v7354_v26, %v4254_v59 }
 0x544   : > { %v4452_v2 = vadd.f32 %v7360_v57, %v4413_v49  ;;  %v3006_v1 = vpop.permute.xlu1 %3005 }
 0x545   : > { %v4451_v39 = vadd.f32 %v7360_v57, %v4412_v61  ;;  %3075 = vst.msk [vmem:[#allocation3 + $0xd0] sm:$0xff] %vm936_vm3, %v3006_v1  ;;  %v3579_v41 = vpop.permute.xlu0 %3578 }
 0x546   : > { %v4516_v38 = vadd.f32 %v4937_v20, %v4452_v2  ;;  %3650 = vst.msk [vmem:[#allocation3 + $0xc0] sm:$0xff] %vm1516_vm7, %v3579_v41 }
 0x547   : > { %v4515_v5 = vadd.f32 %v4936_v14, %v4451_v39 }
 0x548   : > { %v4548_v34 = vmax.f32 %v4516_v38, 0.0  ;;  %v3771_v35 = vpop.permute.xlu1 %3770 }
 0x549   : > { %v4547_v37 = vmax.f32 %v4515_v5, 0.0  ;;  %3842 = vst.msk [vmem:[#allocation3 + $0xc0] sm:$0xff] %vm1709_vm8, %v3771_v35  ;;  %v3581_v3 = vpop.permute.xlu0 %3580  ;;  %v4065_v6 = vld [vmem:[#allocation3 + $0xb8] sm:$0xff] }
 0x54a   : > { %4580 = vst.msk [vmem:[%s7376_s28 + $0x18] sm:$0xff] %vm279_vm0, %v4548_v34  ;;  %5145 = vmatmul.mubr.msk.f32.gmra.mrb[22].mxu1 %vm1972_vm10, %v4065_v6  ;;  %v4943_v34 = vld [vmem:[%s5264_s29 + $0x81] sm:$0xff] }
 0x54b   : > { %3651 = vst.msk [vmem:[#allocation3 + $0xc8] sm:$0xff] %vm1516_vm7, %v3581_v3  ;;  %v4942_v3 = vld [vmem:[%s5264_s29 + $0x79] sm:$0xff] }
 0x54c   : > { %4579 = vst.msk [vmem:[%s7376_s28 + $0x10] sm:$0xff] %vm279_vm0, %v4547_v37  ;;  %v3198_v19 = vpop.permute.xlu1 %3197 }
 0x54d   : > { %3267 = vst.msk [vmem:[#allocation3 + $0xd0] sm:$0xff] %vm1129_vm4, %v3198_v19  ;;  %v3008_v30 = vpop.permute.xlu0 %3007 }
 0x54e   : > { %3076 = vst.msk [vmem:[#allocation3 + $0xd8] sm:$0xff] %vm936_vm3, %v3008_v30 }
 0x550   : > { %v3963_v7 = vpop.permute.xlu1 %3962 }
 0x551   : > { %4034 = vst.msk [vmem:[#allocation3 + $0xc0] sm:$0xff] %vm1902_vm9, %v3963_v7  ;;  %v3773_v29 = vpop.permute.xlu0 %3772 }
 0x552   : > { %3843 = vst.msk [vmem:[#allocation3 + $0xc8] sm:$0xff] %vm1709_vm8, %v3773_v29 }
 0x554   : > { %v3390_v12 = vpop.permute.xlu1 %3389 }
 0x555   : > { %3459 = vst.msk [vmem:[#allocation3 + $0xd0] sm:$0xff] %vm1322_vm5, %v3390_v12  ;;  %v5119_v11 = vpop.f32.mrb[4].mxu1  ;;  %v3200_v60 = vpop.permute.xlu0 %3199 }
 0x556   : > { %v4415_v8 = vmul.f32 %v5119_v11, %v7354_v26  ;;  %3268 = vst.msk [vmem:[#allocation3 + $0xd8] sm:$0xff] %vm1129_vm4, %v3200_v60  ;;  %v4264_v21 = vpop.f32.mrb[5].mxu1 }
 0x557   : > { %v4414_v10 = vmul.f32 %v7354_v26, %v4264_v21 }
 0x558   : > { %v4454_v48 = vadd.f32 %v7360_v57, %v4415_v8  ;;  %v3392_v0 = vpop.permute.xlu1 %3391  ;;  %v4066_v32 = vld [vmem:[#allocation3 + $0xc0] sm:$0xff] }
 0x559   : > { %v4453_v54 = vadd.f32 %v7360_v57, %v4414_v10  ;;  %3460 = vst.msk [vmem:[#allocation3 + $0xd8] sm:$0xff] %vm1322_vm5, %v3392_v0  ;;  %5147 = vmatprep.mubr.msk.f32.mxu1 %vm1972_vm10, %v4066_v32  ;;  %v3965_v63 = vpop.permute.xlu0 %3964 }
 0x55a   : > { %v4518_v31 = vadd.f32 %v4939_v17, %v4454_v48  ;;  %4035 = vst.msk [vmem:[#allocation3 + $0xc8] sm:$0xff] %vm1902_vm9, %v3965_v63 }
 0x55b   : > { %v4517_v56 = vadd.f32 %v4938_v55, %v4453_v54 }
 0x55c   : > { %v4550_v43 = vmax.f32 %v4518_v31, 0.0  ;;  %v3010_v47 = vpop.permute.xlu1 %3009 }
 0x55d   : > { %v4549_v42 = vmax.f32 %v4517_v56, 0.0  ;;  %3077 = vst.msk [vmem:[#allocation3 + $0xe0] sm:$0xff] %vm936_vm3, %v3010_v47  ;;  %v3583_v58 = vpop.permute.xlu0 %3582 }
 0x55e   : > { %4582 = vst.msk [vmem:[%s7376_s28 + $0x28] sm:$0xff] %vm279_vm0, %v4550_v43  ;;  %v4945_v43 = vld [vmem:[%s5264_s29 + $0x99] sm:$0xff] }
 0x55f   : > { %3652 = vst.msk [vmem:[#allocation3 + $0xd0] sm:$0xff] %vm1516_vm7, %v3583_v58  ;;  %v4944_v58 = vld [vmem:[%s5264_s29 + $0x91] sm:$0xff] }
 0x560   : > { %4581 = vst.msk [vmem:[%s7376_s28 + $0x20] sm:$0xff] %vm279_vm0, %v4549_v42  ;;  %v3775_v52 = vpop.permute.xlu1 %3774 }
 0x561   : > { %3844 = vst.msk [vmem:[#allocation3 + $0xd0] sm:$0xff] %vm1709_vm8, %v3775_v52  ;;  %v3585_v13 = vpop.permute.xlu0 %3584  ;;  %v4067_v51 = vld [vmem:[#allocation3 + $0xc8] sm:$0xff] }
 0x562   : > { %3653 = vst.msk [vmem:[#allocation3 + $0xd8] sm:$0xff] %vm1516_vm7, %v3585_v13  ;;  %5148 = vmatmul.mubr.msk.f32.gmra.mrb[24].mxu1 %vm1972_vm10, %v4067_v51 }
 0x564   : > { %v3202_v40 = vpop.permute.xlu1 %3201 }
 0x565   : > { %3269 = vst.msk [vmem:[#allocation3 + $0xe0] sm:$0xff] %vm1129_vm4, %v3202_v40  ;;  %v3012_v53 = vpop.permute.xlu0 %3011 }
 0x566   : > { %3078 = vst.msk [vmem:[#allocation3 + $0xe8] sm:$0xff] %vm936_vm3, %v3012_v53 }
 0x568   : > { %v3967_v46 = vpop.permute.xlu1 %3966 }
 0x569   : > { %4036 = vst.msk [vmem:[#allocation3 + $0xd0] sm:$0xff] %vm1902_vm9, %v3967_v46  ;;  %v5122_v36 = vpop.f32.mrb[6].mxu1  ;;  %v3777_v50 = vpop.permute.xlu0 %3776 }
 0x56a   : > { %v4417_v24 = vmul.f32 %v5122_v36, %v7354_v26  ;;  %3845 = vst.msk [vmem:[#allocation3 + $0xd8] sm:$0xff] %vm1709_vm8, %v3777_v50  ;;  %v4274_v27 = vpop.f32.mrb[7].mxu1 }
 0x56b   : > { %v4416_v16 = vmul.f32 %v7354_v26, %v4274_v27 }
 0x56c   : > { %v4456_v28 = vadd.f32 %v7360_v57, %v4417_v24  ;;  %v3394_v4 = vpop.permute.xlu1 %3393 }
 0x56d   : > { %v4455_v23 = vadd.f32 %v7360_v57, %v4416_v16  ;;  %3461 = vst.msk [vmem:[#allocation3 + $0xe0] sm:$0xff] %vm1322_vm5, %v3394_v4  ;;  %v3204_v25 = vpop.permute.xlu0 %3203 }
 0x56e   : > { %v4520_v9 = vadd.f32 %v4941_v15, %v4456_v28  ;;  %3270 = vst.msk [vmem:[#allocation3 + $0xe8] sm:$0xff] %vm1129_vm4, %v3204_v25  ;;  %v4947_v28 = vld [vmem:[%s5264_s29 + $0xb1] sm:$0xff] }
 0x56f   : > { %v4519_v45 = vadd.f32 %v4940_v33, %v4455_v23  ;;  %v4946_v23 = vld [vmem:[%s5264_s29 + $0xa9] sm:$0xff] }
 0x570   : > { %v4552_v22 = vmax.f32 %v4520_v9, 0.0  ;;  %v3396_v44 = vpop.permute.xlu1 %3395  ;;  %v4068_v62 = vld [vmem:[#allocation3 + $0xd0] sm:$0xff] }
 0x571   : > { %v4551_v18 = vmax.f32 %v4519_v45, 0.0  ;;  %3462 = vst.msk [vmem:[#allocation3 + $0xe8] sm:$0xff] %vm1322_vm5, %v3396_v44  ;;  %5150 = vmatprep.mubr.msk.f32.mxu1 %vm1972_vm10, %v4068_v62  ;;  %v3969_v49 = vpop.permute.xlu0 %3968 }
 0x572   : > { %4584 = vst.msk [vmem:[%s7376_s28 + $0x38] sm:$0xff] %vm279_vm0, %v4552_v22 }
 0x573   : > { %4037 = vst.msk [vmem:[#allocation3 + $0xd8] sm:$0xff] %vm1902_vm9, %v3969_v49 }
 0x574   : > { %4583 = vst.msk [vmem:[%s7376_s28 + $0x30] sm:$0xff] %vm279_vm0, %v4551_v18  ;;  %v3014_v59 = vpop.permute.xlu1 %3013 }
 0x575   : > { %3079 = vst.msk [vmem:[#allocation3 + $0xf0] sm:$0xff] %vm936_vm3, %v3014_v59  ;;  %v3587_v20 = vpop.permute.xlu0 %3586  ;;  %v4949_v59 = vld [vmem:[%s5264_s29 + $0xc9] sm:$0xff] }
 0x576   : > { %3654 = vst.msk [vmem:[#allocation3 + $0xe0] sm:$0xff] %vm1516_vm7, %v3587_v20 }
 0x578   : > { %v3779_v61 = vpop.permute.xlu1 %3778 }
 0x579   : > { %3846 = vst.msk [vmem:[#allocation3 + $0xe0] sm:$0xff] %vm1709_vm8, %v3779_v61  ;;  %v3589_v2 = vpop.permute.xlu0 %3588 }
 0x57a   : > { %v4069_v14 = vld [vmem:[#allocation3 + $0xd8] sm:$0xff]  ;;  %3655 = vst.msk [vmem:[#allocation3 + $0xe8] sm:$0xff] %vm1516_vm7, %v3589_v2 }
 0x57b   : > { %5151 = vmatmul.mubr.msk.f32.gmra.mrb[26].mxu1 %vm1972_vm10, %v4069_v14  ;;  %v4948_v2 = vld [vmem:[%s5264_s29 + $0xc1] sm:$0xff] }
 0x57c   : > { %v3206_v1 = vpop.permute.xlu1 %3205 }
 0x57d   : > { %3271 = vst.msk [vmem:[#allocation3 + $0xf0] sm:$0xff] %vm1129_vm4, %v3206_v1  ;;  %v5125_v39 = vpop.f32.mrb[8].mxu1  ;;  %v3016_v41 = vpop.permute.xlu0 %3015 }
 0x57e   : > { %v4419_v38 = vmul.f32 %v5125_v39, %v7354_v26  ;;  %3080 = vst.msk [vmem:[#allocation3 + $0xf8] sm:$0xff] %vm936_vm3, %v3016_v41  ;;  %v4284_v5 = vpop.f32.mrb[9].mxu1 }
 0x57f   : > { %v4418_v35 = vmul.f32 %v7354_v26, %v4284_v5 }
 0x580   : > { %v4458_v37 = vadd.f32 %v7360_v57, %v4419_v38  ;;  %v3971_v6 = vpop.permute.xlu1 %3970 }
 0x581   : > { %v4457_v19 = vadd.f32 %v7360_v57, %v4418_v35  ;;  %4038 = vst.msk [vmem:[#allocation3 + $0xe0] sm:$0xff] %vm1902_vm9, %v3971_v6  ;;  %v3781_v30 = vpop.permute.xlu0 %3780 }
 0x582   : > { %v4522_v7 = vadd.f32 %v4943_v34, %v4458_v37  ;;  %3847 = vst.msk [vmem:[#allocation3 + $0xe8] sm:$0xff] %vm1709_vm8, %v3781_v30  ;;  %v4951_v37 = vld [vmem:[%s5264_s29 + $0xe1] sm:$0xff] }
 0x583   : > { %v4521_v29 = vadd.f32 %v4942_v3, %v4457_v19  ;;  %v4950_v19 = vld [vmem:[%s5264_s29 + $0xd9] sm:$0xff] }
 0x584   : > { %v4554_v12 = vmax.f32 %v4522_v7, 0.0  ;;  %v3398_v11 = vpop.permute.xlu1 %3397 }
 0x585   : > { %v4553_v60 = vmax.f32 %v4521_v29, 0.0  ;;  %3463 = vst.msk [vmem:[#allocation3 + $0xf0] sm:$0xff] %vm1322_vm5, %v3398_v11  ;;  %v3208_v8 = vpop.permute.xlu0 %3207 }
 0x586   : > { %4586 = vst.msk [vmem:[%s7376_s28 + $0x48] sm:$0xff] %vm279_vm0, %v4554_v12 }
 0x587   : > { %3272 = vst.msk [vmem:[#allocation3 + $0xf8] sm:$0xff] %vm1129_vm4, %v3208_v8 }
 0x588   : > { %4585 = vst.msk [vmem:[%s7376_s28 + $0x40] sm:$0xff] %vm279_vm0, %v4553_v60  ;;  %v3400_v21 = vpop.permute.xlu1 %3399  ;;  %v4070_v17 = vld [vmem:[#allocation3 + $0xe0] sm:$0xff] }
 0x589   : > { %3464 = vst.msk [vmem:[#allocation3 + $0xf8] sm:$0xff] %vm1322_vm5, %v3400_v21  ;;  %v3973_v10 = vpop.permute.xlu0 %3972  ;;  %5153 = vmatprep.mubr.msk.f32.mxu1 %vm1972_vm10, %v4070_v17  ;;  %v4953_v17 = vld [vmem:[%s5264_s29 + $0xf9] sm:$0xff] }
 0x58a   : > { %4039 = vst.msk [vmem:[#allocation3 + $0xe8] sm:$0xff] %vm1902_vm9, %v3973_v10 }
 0x58c   : > { %v3593_v48 = vpop.permute.xlu1 %3592 }
 0x58d   : > { %v3591_v55 = vpop.permute.xlu0 %3590  ;;  %3657 = vst.msk [vmem:[#allocation3 + $0xf8] sm:$0xff] %vm1516_vm7, %v3593_v48 }
 0x58e   : > { %3656 = vst.msk [vmem:[#allocation3 + $0xf0] sm:$0xff] %vm1516_vm7, %v3591_v55  ;;  %v4952_v55 = vld [vmem:[%s5264_s29 + $0xf1] sm:$0xff] }
 0x590   : > { %v3785_v0 = vpop.permute.xlu1 %3784 }
 0x591   : > { %v5128_v32 = vpop.f32.mrb[10].mxu1  ;;  %v3783_v54 = vpop.permute.xlu0 %3782  ;;  %v4071_v63 = vld [vmem:[#allocation3 + $0xe8] sm:$0xff]  ;;  %3849 = vst.msk [vmem:[#allocation3 + $0xf8] sm:$0xff] %vm1709_vm8, %v3785_v0 }
 0x592   : > { %v4421_v31 = vmul.f32 %v5128_v32, %v7354_v26  ;;  %3848 = vst.msk [vmem:[#allocation3 + $0xf0] sm:$0xff] %vm1709_vm8, %v3783_v54  ;;  %v4294_v56 = vpop.f32.mrb[11].mxu1  ;;  %5154 = vmatmul.mubr.msk.f32.gmra.mrb[28].mxu1 %vm1972_vm10, %v4071_v63 }
 0x593   : > { %v4420_v47 = vmul.f32 %v7354_v26, %v4294_v56 }
 0x594   : > { %v4460_v42 = vadd.f32 %v7360_v57, %v4421_v31  ;;  %v3977_v52 = vpop.permute.xlu1 %3976 }
 0x595   : > { %v4459_v13 = vadd.f32 %v7360_v57, %v4420_v47  ;;  %v3975_v51 = vpop.permute.xlu0 %3974  ;;  %4041 = vst.msk [vmem:[#allocation3 + $0xf8] sm:$0xff] %vm1902_vm9, %v3977_v52 }
 0x596   : > { %v4524_v40 = vadd.f32 %v4945_v43, %v4460_v42  ;;  %4040 = vst.msk [vmem:[#allocation3 + $0xf0] sm:$0xff] %vm1902_vm9, %v3975_v51  ;;  %v4955_v42 = vld [vmem:[%s5264_s29 + $0x111] sm:$0xff] }
 0x597   : > { %v4523_v53 = vadd.f32 %v4944_v58, %v4459_v13  ;;  %v4954_v13 = vld [vmem:[%s5264_s29 + $0x109] sm:$0xff] }
 0x598   : > { %v4556_v46 = vmax.f32 %v4524_v40, 0.0 }
 0x599   : > { %v4555_v36 = vmax.f32 %v4523_v53, 0.0 }
 0x59a   : > { %4588 = vst.msk [vmem:[%s7376_s28 + $0x58] sm:$0xff] %vm279_vm0, %v4556_v46 }
 0x59b   : > { %4587 = vst.msk [vmem:[%s7376_s28 + $0x50] sm:$0xff] %vm279_vm0, %v4555_v36 }
 0x59c   : > { %v4073_v50 = vld [vmem:[#allocation3 + $0xf8] sm:$0xff] }
 0x59d   : > { %v4072_v24 = vld [vmem:[#allocation3 + $0xf0] sm:$0xff] }
 0x59e   : > { %5156 = vmatprep.mubr.msk.f32.mxu1 %vm1972_vm10, %v4072_v24 }
 0x59f   : > { %5157 = vmatmul.mubr.msk.f32.gmra.mrb[30].mxu1 %vm1972_vm10, %v4073_v50 }
 0x5a5   : > { %v5131_v27 = vpop.f32.mrb[12].mxu1 }
 0x5a6   : > { %v4423_v15 = vmul.f32 %v5131_v27, %v7354_v26  ;;  %v4304_v16 = vpop.f32.mrb[13].mxu1 }
 0x5a7   : > { %v4422_v33 = vmul.f32 %v7354_v26, %v4304_v16 }
 0x5a8   : > { %v4462_v4 = vadd.f32 %v7360_v57, %v4423_v15  ;;  %v4957_v15 = vld [vmem:[%s5264_s29 + $0x129] sm:$0xff] }
 0x5a9   : > { %v4461_v25 = vadd.f32 %v7360_v57, %v4422_v33  ;;  %v4956_v33 = vld [vmem:[%s5264_s29 + $0x121] sm:$0xff] }
 0x5aa   : > { %v4526_v9 = vadd.f32 %v4947_v28, %v4462_v4 }
 0x5ab   : > { %v4525_v45 = vadd.f32 %v4946_v23, %v4461_v25 }
 0x5ac   : > { %v4558_v22 = vmax.f32 %v4526_v9, 0.0 }
 0x5ad   : > { %v4557_v44 = vmax.f32 %v4525_v45, 0.0 }
 0x5ae   : > { %4590 = vst.msk [vmem:[%s7376_s28 + $0x68] sm:$0xff] %vm279_vm0, %v4558_v22 }
 0x5af   : > { %4589 = vst.msk [vmem:[%s7376_s28 + $0x60] sm:$0xff] %vm279_vm0, %v4557_v44 }
 0x5bd   : > { %v5134_v62 = vpop.f32.mrb[14].mxu1 }
 0x5be   : > { %v4425_v18 = vmul.f32 %v5134_v62, %v7354_v26  ;;  %v4314_v49 = vpop.f32.mrb[15].mxu1 }
 0x5bf   : > { %v4424_v20 = vmul.f32 %v7354_v26, %v4314_v49 }
 0x5c0   : > { %v4464_v61 = vadd.f32 %v7360_v57, %v4425_v18  ;;  %v4959_v18 = vld [vmem:[%s5264_s29 + $0x141] sm:$0xff] }
 0x5c1   : > { %v4463_v14 = vadd.f32 %v7360_v57, %v4424_v20  ;;  %v4958_v20 = vld [vmem:[%s5264_s29 + $0x139] sm:$0xff] }
 0x5c2   : > { %v4528_v1 = vadd.f32 %v4949_v59, %v4464_v61 }
 0x5c3   : > { %v4527_v39 = vadd.f32 %v4948_v2, %v4463_v14 }
 0x5c4   : > { %v4560_v41 = vmax.f32 %v4528_v1, 0.0 }
 0x5c5   : > { %v4559_v38 = vmax.f32 %v4527_v39, 0.0 }
 0x5c6   : > { %4592 = vst.msk [vmem:[%s7376_s28 + $0x78] sm:$0xff] %vm279_vm0, %v4560_v41 }
 0x5c7   : > { %4591 = vst.msk [vmem:[%s7376_s28 + $0x70] sm:$0xff] %vm279_vm0, %v4559_v38 }
 0x5d5   : > { %v5137_v5 = vpop.f32.mrb[16].mxu1 }
 0x5d6   : > { %v4427_v34 = vmul.f32 %v5137_v5, %v7354_v26  ;;  %v4324_v35 = vpop.f32.mrb[17].mxu1 }
 0x5d7   : > { %v4426_v3 = vmul.f32 %v7354_v26, %v4324_v35 }
 0x5d8   : > { %v4466_v6 = vadd.f32 %v7360_v57, %v4427_v34  ;;  %v4961_v34 = vld [vmem:[%s5264_s29 + $0x159] sm:$0xff] }
 0x5d9   : > { %v4465_v30 = vadd.f32 %v7360_v57, %v4426_v3  ;;  %v4960_v3 = vld [vmem:[%s5264_s29 + $0x151] sm:$0xff] }
 0x5da   : > { %v4530_v7 = vadd.f32 %v4951_v37, %v4466_v6 }
 0x5db   : > { %v4529_v29 = vadd.f32 %v4950_v19, %v4465_v30 }
 0x5dc   : > { %v4562_v12 = vmax.f32 %v4530_v7, 0.0 }
 0x5dd   : > { %v4561_v11 = vmax.f32 %v4529_v29, 0.0 }
 0x5de   : > { %4594 = vst.msk [vmem:[%s7376_s28 + $0x88] sm:$0xff] %vm279_vm0, %v4562_v12 }
 0x5df   : > { %4593 = vst.msk [vmem:[%s7376_s28 + $0x80] sm:$0xff] %vm279_vm0, %v4561_v11 }
 0x5ed   : > { %v5140_v60 = vpop.f32.mrb[18].mxu1 }
 0x5ee   : > { %v4429_v8 = vmul.f32 %v5140_v60, %v7354_v26  ;;  %v4334_v21 = vpop.f32.mrb[19].mxu1 }
 0x5ef   : > { %v4428_v10 = vmul.f32 %v7354_v26, %v4334_v21 }
 0x5f0   : > { %v4468_v48 = vadd.f32 %v7360_v57, %v4429_v8  ;;  %v4963_v8 = vld [vmem:[%s5264_s29 + $0x171] sm:$0xff] }
 0x5f1   : > { %v4467_v0 = vadd.f32 %v7360_v57, %v4428_v10  ;;  %v4962_v10 = vld [vmem:[%s5264_s29 + $0x169] sm:$0xff] }
 0x5f2   : > { %v4532_v32 = vadd.f32 %v4953_v17, %v4468_v48 }
 0x5f3   : > { %v4531_v54 = vadd.f32 %v4952_v55, %v4467_v0 }
 0x5f4   : > { %v4564_v63 = vmax.f32 %v4532_v32, 0.0 }
 0x5f5   : > { %v4563_v31 = vmax.f32 %v4531_v54, 0.0 }
 0x5f6   : > { %4596 = vst.msk [vmem:[%s7376_s28 + $0x98] sm:$0xff] %vm279_vm0, %v4564_v63 }
 0x5f7   : > { %4595 = vst.msk [vmem:[%s7376_s28 + $0x90] sm:$0xff] %vm279_vm0, %v4563_v31 }
 0x605   : > { %v5143_v56 = vpop.f32.mrb[20].mxu1 }
 0x606   : > { %v4431_v43 = vmul.f32 %v5143_v56, %v7354_v26  ;;  %v4344_v47 = vpop.f32.mrb[21].mxu1 }
 0x607   : > { %v4430_v58 = vmul.f32 %v7354_v26, %v4344_v47 }
 0x608   : > { %v4470_v52 = vadd.f32 %v7360_v57, %v4431_v43  ;;  %v4965_v43 = vld [vmem:[%s5264_s29 + $0x189] sm:$0xff] }
 0x609   : > { %v4469_v51 = vadd.f32 %v7360_v57, %v4430_v58  ;;  %v4964_v58 = vld [vmem:[%s5264_s29 + $0x181] sm:$0xff] }
 0x60a   : > { %v4534_v40 = vadd.f32 %v4955_v42, %v4470_v52 }
 0x60b   : > { %v4533_v53 = vadd.f32 %v4954_v13, %v4469_v51 }
 0x60c   : > { %v4566_v46 = vmax.f32 %v4534_v40, 0.0 }
 0x60d   : > { %v4565_v36 = vmax.f32 %v4533_v53, 0.0 }
 0x60e   : > { %4598 = vst.msk [vmem:[%s7376_s28 + $0xa8] sm:$0xff] %vm279_vm0, %v4566_v46 }
 0x60f   : > { %4597 = vst.msk [vmem:[%s7376_s28 + $0xa0] sm:$0xff] %vm279_vm0, %v4565_v36 }
 0x61d   : > { %v5146_v50 = vpop.f32.mrb[22].mxu1 }
 0x61e   : > { %v4433_v24 = vmul.f32 %v5146_v50, %v7354_v26  ;;  %v4354_v27 = vpop.f32.mrb[23].mxu1 }
 0x61f   : > { %v4432_v16 = vmul.f32 %v7354_v26, %v4354_v27 }
 0x620   : > { %v4472_v28 = vadd.f32 %v7360_v57, %v4433_v24 }
 0x621   : > { %v4471_v4 = vadd.f32 %v7360_v57, %v4432_v16 }
 0x622   : > { %v4536_v23 = vadd.f32 %v4957_v15, %v4472_v28 }
 0x623   : > { %v4535_v25 = vadd.f32 %v4956_v33, %v4471_v4 }
 0x624   : > { %v4568_v9 = vmax.f32 %v4536_v23, 0.0 }
 0x625   : > { %v4567_v45 = vmax.f32 %v4535_v25, 0.0 }
 0x626   : > { %4600 = vst.msk [vmem:[%s7376_s28 + $0xb8] sm:$0xff] %vm279_vm0, %v4568_v9 }
 0x627   : > { %4599 = vst.msk [vmem:[%s7376_s28 + $0xb0] sm:$0xff] %vm279_vm0, %v4567_v45 }
 0x635   : > { %v5149_v22 = vpop.f32.mrb[24].mxu1 }
 0x636   : > { %v4435_v44 = vmul.f32 %v5149_v22, %v7354_v26  ;;  %v4364_v62 = vpop.f32.mrb[25].mxu1 }
 0x637   : > { %v4434_v49 = vmul.f32 %v7354_v26, %v4364_v62 }
 0x638   : > { %v4474_v59 = vadd.f32 %v7360_v57, %v4435_v44 }
 0x639   : > { %v4473_v61 = vadd.f32 %v7360_v57, %v4434_v49 }
 0x63a   : > { %v4538_v2 = vadd.f32 %v4959_v18, %v4474_v59 }
 0x63b   : > { %v4537_v14 = vadd.f32 %v4958_v20, %v4473_v61 }
 0x63c   : > { %v4570_v1 = vmax.f32 %v4538_v2, 0.0 }
 0x63d   : > { %v4569_v39 = vmax.f32 %v4537_v14, 0.0 }
 0x63e   : > { %4602 = vst.msk [vmem:[%s7376_s28 + $0xc8] sm:$0xff] %vm279_vm0, %v4570_v1 }
 0x63f   : > { %4601 = vst.msk [vmem:[%s7376_s28 + $0xc0] sm:$0xff] %vm279_vm0, %v4569_v39 }
 0x64e   : > { %v5152_v41 = vpop.f32.mrb[26].mxu1 }
 0x64f   : > { %v4437_v38 = vmul.f32 %v5152_v41, %v7354_v26  ;;  %v4374_v5 = vpop.f32.mrb[27].mxu1 }
 0x650   : > { %v4436_v35 = vmul.f32 %v7354_v26, %v4374_v5 }
 0x651   : > { %v4476_v37 = vadd.f32 %v7360_v57, %v4437_v38 }
 0x652   : > { %v4475_v6 = vadd.f32 %v7360_v57, %v4436_v35 }
 0x653   : > { %v4540_v19 = vadd.f32 %v4961_v34, %v4476_v37 }
 0x654   : > { %v4539_v30 = vadd.f32 %v4960_v3, %v4475_v6 }
 0x655   : > { %v4572_v7 = vmax.f32 %v4540_v19, 0.0 }
 0x656   : > { %v4571_v29 = vmax.f32 %v4539_v30, 0.0 }
 0x657   : > { %4604 = vst.msk [vmem:[%s7376_s28 + $0xd8] sm:$0xff] %vm279_vm0, %v4572_v7 }
 0x658   : > { %4603 = vst.msk [vmem:[%s7376_s28 + $0xd0] sm:$0xff] %vm279_vm0, %v4571_v29 }
 0x665   : > { %v5155_v12 = vpop.f32.mrb[28].mxu1 }
 0x666   : > { %v4439_v11 = vmul.f32 %v5155_v12, %v7354_v26  ;;  %v4384_v60 = vpop.f32.mrb[29].mxu1 }
 0x667   : > { %v4438_v21 = vmul.f32 %v7354_v26, %v4384_v60 }
 0x668   : > { %v4478_v17 = vadd.f32 %v7360_v57, %v4439_v11 }
 0x669   : > { %v4477_v48 = vadd.f32 %v7360_v57, %v4438_v21 }
 0x66a   : > { %v4542_v55 = vadd.f32 %v4963_v8, %v4478_v17 }
 0x66b   : > { %v4541_v0 = vadd.f32 %v4962_v10, %v4477_v48 }
 0x66c   : > { %v4574_v32 = vmax.f32 %v4542_v55, 0.0 }
 0x66d   : > { %v4573_v54 = vmax.f32 %v4541_v0, 0.0 }
 0x66e   : > { %4606 = vst.msk [vmem:[%s7376_s28 + $0xe8] sm:$0xff] %vm279_vm0, %v4574_v32 }
 0x66f   : > { %4605 = vst.msk [vmem:[%s7376_s28 + $0xe0] sm:$0xff] %vm279_vm0, %v4573_v54 }
 0x672   : > { %v5158_v63 = vpop.f32.mrb[30].mxu1 }
 0x673   : > { %v4441_v31 = vmul.f32 %v5158_v63, %v7354_v26  ;;  %v4394_v56 = vpop.f32.mrb[31].mxu1 }
 0x674   : > { %v4440_v47 = vmul.f32 %v7354_v26, %v4394_v56 }
 0x675   : > { %v4480_v42 = vadd.f32 %v7360_v57, %v4441_v31 }
 0x676   : > { %v4479_v52 = vadd.f32 %v7360_v57, %v4440_v47 }
 0x677   : > { %v4544_v13 = vadd.f32 %v4965_v43, %v4480_v42 }
 0x678   : > { %v4543_v51 = vadd.f32 %v4964_v58, %v4479_v52 }
 0x679   : > { %v4576_v40 = vmax.f32 %v4544_v13, 0.0 }
 0x67a   : > { %v4575_v53 = vmax.f32 %v4543_v51, 0.0 }
 0x67b   : > { %4608 = vst.msk [vmem:[%s7376_s28 + $0xf8] sm:$0xff] %vm279_vm0, %v4576_v40 }
 0x67c   : > { %4607 = vst.msk [vmem:[%s7376_s28 + $0xf0] sm:$0xff] %vm279_vm0, %v4575_v53 }
 0x67d PF: > { %s17_s24 = sadd.s32 1, %s5199_s24  }
 0x67e   : > { %p14_p4 = scmp.ge.s32.totalorder %s17_s24, 4  }
 0x680   :  { %16 = sbr.rel (!%p14_p4) target bundleno = 1 (0x1), region = 83 }

</bundles_post_ra>
